<compile_context>
chip_gen: v7x
topology: tpu7x:2x2x1
jax: 0.10.0
libtpu: 0.0.40
codegen_flags: <defaults>
</compile_context>

<pallas_src>
import numpy as np
import jax
import jax.numpy as jnp
from jax.experimental import pallas as pl
from jax.experimental.pallas import tpu as pltpu


# ----------------------------------------------------------------------------
# The fused kernel
# ----------------------------------------------------------------------------
#
# Layouts (derived from ref shapes at trace time):
#   xs[(t*R1 + p')*B + b, :] = x[b, 4*p' + t, :]   for t = 0..7   (row strip-mine)
#   conv1 tap i LHS  = xs[i*B*R1 : (i+4)*B*R1]      (contiguous slice)
#   conv1 output rows ordered (d, p', b) with oh1 = 4*p' + d, d = 2*pi + a
#   conv1 output lanes: beta*48 + q'*4 + c   with ow1 = 2*q' + beta (W parity)
#   pool1_pi rows (p', b) -> ph1 = 2*p' + pi ; lanes q1*4 + c1
#   conv2 stacked LHS block t = pool1_{t%2}[(t//2)*B : (t//2)*B + B*R2]
#   conv2 output rows ordered (a2, p2, b) with oh2 = 2*p2 + a2
#   conv2 output lanes: beta2*64 + q2'*16 + c2  with ow2 = 2*q2' + beta2
#   pooled2 rows (p2, b); lanes q2'*16 + c2  -> FC1 weight pre-permuted on host.

def _lenet_kernel(xs_ref, t1_ref, cb1_ref, sh1_ref,
                  t2_ref, cb2_ref, sh2_ref,
                  w1_ref, fb1_ref, sh3_ref,
                  w2_ref, fb2_ref, sh4_ref,
                  w3_ref, fb3_ref, o_ref):
    KH = 5
    B = o_ref.shape[0]
    IW = xs_ref.shape[1]
    OH1 = IW - 4                  # 24
    R1 = OH1 // 4                 # 6
    half1 = t1_ref.shape[2] // 2  # 48
    P1 = OH1 // 2                 # 12
    OH2 = P1 - 4                  # 8
    R2 = OH2 // 2                 # 4
    half2 = t2_ref.shape[2] // 2  # 64
    P2 = OH2 // 2                 # 4
    BR1 = B * R1
    BR2 = B * R2

    cb1 = cb1_ref[...]
    sh1 = sh1_ref[...]
    cb2 = cb2_ref[...]
    sh2 = sh2_ref[...]

    # -------- conv1 + bias + ReLU + BN1 shift + 2x2 max-pool ----------------
    # 5 stacked-M GEMMs (one per kernel row tap) against banded weight mats.
    acc1 = None
    for i in range(KH):
        lhs = xs_ref[i * BR1:(i + 4) * BR1, :]               # (4*BR1, IW)
        part = jnp.dot(lhs, t1_ref[i], preferred_element_type=jnp.float32)
        acc1 = part if acc1 is None else acc1 + part
    z1 = jnp.maximum(acc1 + cb1, 0.0) + sh1                  # (4*BR1, 2*half1)
    zp1 = jnp.maximum(z1[:, :half1], z1[:, half1:])          # pool W (parity halves)
    pool1 = [jnp.maximum(zp1[(2 * pi) * BR1:(2 * pi + 1) * BR1],
                         zp1[(2 * pi + 1) * BR1:(2 * pi + 2) * BR1])
             for pi in range(2)]                             # pool H: (BR1, half1) each

    # -------- conv2 + bias + ReLU + BN2 shift + 2x2 max-pool ----------------
    # Stack the shared-RHS LHS blocks so each tap is a single contiguous slice.
    s3 = jnp.concatenate(
        [pool1[t % 2][(t // 2) * B:(t // 2) * B + BR2, :] for t in range(KH + 1)],
        axis=0)                                              # (6*BR2, half1)
    acc2 = None
    for i in range(KH):
        lhs = s3[i * BR2:(i + 2) * BR2, :]                   # (2*BR2, half1)
        part = jnp.dot(lhs, t2_ref[i], preferred_element_type=jnp.float32)
        acc2 = part if acc2 is None else acc2 + part
    z2 = jnp.maximum(acc2 + cb2, 0.0) + sh2                  # (2*BR2, 2*half2)
    zp2 = jnp.maximum(z2[:, :half2], z2[:, half2:])          # pool W
    pooled2 = jnp.maximum(zp2[:BR2], zp2[BR2:])              # pool H -> (B*P2, half2)

    # -------- FC head, batched over B ---------------------------------------
    h = None
    for r in range(P2):
        part = jnp.dot(pooled2[r * B:(r + 1) * B, :], w1_ref[r],
                       preferred_element_type=jnp.float32)   # (B, 1024)
        h = part if h is None else h + part
    h = jnp.maximum(h + fb1_ref[...], 0.0) + sh3_ref[...]
    h = jnp.maximum(
        jnp.dot(h, w2_ref[...], preferred_element_type=jnp.float32)
        + fb2_ref[...], 0.0) + sh4_ref[...]
    logits = (jnp.dot(h, w3_ref[...], preferred_element_type=jnp.float32)
              + fb3_ref[...])
    m = jnp.max(logits, axis=-1, keepdims=True)
    e = jnp.exp(logits - m)
    o_ref[...] = e / jnp.sum(e, axis=-1, keepdims=True)      # exact softmax


def _full_spec(shape):
    nd = len(shape)

    def index_map(i):
        return (0,) * nd

    return pl.BlockSpec(shape, index_map)


def lenet_pallas(prep, x_nchw):
    """Forward pass: one tiny XLA row-gather of the input + 1 pallas_call."""
    B, _, IH, IW = x_nchw.shape
    assert IH == IW and IH % 4 == 0
    OH1 = IW - 4
    R1 = OH1 // 4
    x = x_nchw.reshape(B, IH, IW)
    # Strip-mined input slab: xs[(t*R1 + p')*B + b, :] = x[b, 4*p' + t, :]
    rows = 4 * np.arange(R1)[None, :] + np.arange(8)[:, None]   # (8, R1)
    xg = x[:, rows, :]                                           # (B, 8, R1, IW)
    xs = jnp.transpose(xg, (1, 2, 0, 3)).reshape(8 * R1 * B, IW)

    operands = (xs,
                prep["t1"], prep["bias1"], prep["shift1"],
                prep["t2"], prep["bias2"], prep["shift2"],
                prep["w1f"], prep["b1f"], prep["shift3"],
                prep["w2f"], prep["b2f"], prep["shift4"],
                prep["w3"], prep["b3"])
    out_dim = prep["w3"].shape[1]
    return pl.pallas_call(
        _lenet_kernel,
        out_shape=jax.ShapeDtypeStruct((B, out_dim), jnp.float32),
        grid=(1,),
        in_specs=[_full_spec(op.shape) for op in operands],
        out_specs=_full_spec((B, out_dim)),
        compiler_params=pltpu.CompilerParams(
            dimension_semantics=("arbitrary",)),
    )(*operands)


# ----------------------------------------------------------------------------
# Host-side parameter init and one-time weight preparation
# ----------------------------------------------------------------------------

def bn_fold(gamma, beta, mean, var, eps=1e-5):
    scale = gamma / np.sqrt(var + eps)
    shift = beta - mean * scale
    return scale.astype(np.float32), shift.astype(np.float32)


def init_raw_params(key, image_size, output):
    n = ((image_size - 4) // 2 - 4) // 2
    keys = jax.random.split(key, 10)

    def unif(k, shape, fan_in):
        bound = 1.0 / np.sqrt(float(fan_in))
        return jax.random.uniform(k, shape, jnp.float32, -bound, bound)

    p = {}
    p["w1"] = unif(keys[0], (4, 1, 5, 5), 1 * 5 * 5)
    p["b1"] = unif(keys[1], (4,), 1 * 5 * 5)
    p["w2"] = unif(keys[2], (16, 4, 5, 5), 4 * 5 * 5)
    p["b2"] = unif(keys[3], (16,), 4 * 5 * 5)
    p["wl1"] = unif(keys[4], (n * n * 16, 1024), n * n * 16)   # (in, out)
    p["bl1"] = unif(keys[5], (1024,), n * n * 16)
    p["wl2"] = unif(keys[6], (1024, 256), 1024)
    p["bl2"] = unif(keys[7], (256,), 1024)
    p["wl3"] = unif(keys[8], (256, output), 256)
    p["bl3"] = unif(keys[9], (output,), 256)
    # BatchNorm at PyTorch defaults (eval mode): gamma=1, beta=0, mean=0, var=1
    for name, c in (("bn1", 4), ("bn2", 16), ("bn3", 1024), ("bn4", 256)):
        p[name] = bn_fold(np.ones((c,), np.float32), np.zeros((c,), np.float32),
                          np.zeros((c,), np.float32), np.ones((c,), np.float32))
    p["n"] = n
    return p


def prepare_kernel_params(raw, image_size):
    """One-time host prep: banded conv->GEMM matrices with W-parity-packed
    output lanes, BN scale folded into weights/bias (requires scale > 0, true
    for default gamma=1), FC1 permuted to the kernel's (h, w, c) flatten order."""
    w1 = np.asarray(raw["w1"]); b1 = np.asarray(raw["b1"])
    w2 = np.asarray(raw["w2"]); b2 = np.asarray(raw["b2"])
    wl1 = np.asarray(raw["wl1"]); bl1 = np.asarray(raw["bl1"])
    wl2 = np.asarray(raw["wl2"]); bl2 = np.asarray(raw["bl2"])
    wl3 = np.asarray(raw["wl3"]); bl3 = np.asarray(raw["bl3"])
    sc1, sh1 = raw["bn1"]; sc2, sh2 = raw["bn2"]
    sc3, sh3 = raw["bn3"]; sc4, sh4 = raw["bn4"]
    # ReLU<->scale commutation used in the fold requires positive scales.
    assert (np.all(sc1 > 0) and np.all(sc2 > 0)
            and np.all(sc3 > 0) and np.all(sc4 > 0))

    KH = 5
    IW = image_size
    OH1 = IW - 4
    P1 = OH1 // 2
    OH2 = P1 - 4
    P2 = OH2 // 2
    C1, C2 = w1.shape[0], w2.shape[0]
    half1 = (OH1 // 2) * C1
    half2 = (OH2 // 2) * C2
    assert IW % 4 == 0 and OH1 % 4 == 0 and OH2 % 2 == 0
    assert P2 * P2 * C2 == wl1.shape[0]

    # conv1 banded matrices: t1[i, iw, col(ow,c)] = w1[c,0,i,iw-ow] * sc1[c]
    t1 = np.zeros((KH, IW, OH1 * C1), np.float32)
    for i in range(KH):
        for ow in range(OH1):
            col = (ow % 2) * half1 + (ow // 2) * C1
            for j in range(KH):
                t1[i, ow + j, col:col + C1] = w1[:, 0, i, j] * sc1

    # conv2 banded matrices: t2[i, q1*C1+c1, col(ow,c2)] = w2[c2,c1,i,q1-ow]*sc2[c2]
    t2 = np.zeros((KH, P1 * C1, OH2 * C2), np.float32)
    for i in range(KH):
        for ow in range(OH2):
            col = (ow % 2) * half2 + (ow // 2) * C2
            for j in range(KH):
                q1 = ow + j
                t2[i, q1 * C1:(q1 + 1) * C1, col:col + C2] = \
                    (w2[:, :, i, j] * sc2[:, None]).T

    # FC1: PyTorch flatten order is (c, h, w); kernel produces (h) rows with
    # (w, c) lanes -> permute and fold BN3 scale.
    w1p = wl1.reshape(C2, P2, P2, wl1.shape[1]).transpose(1, 2, 0, 3)
    w1p = w1p.reshape(P2, P2 * C2, wl1.shape[1])

    prep = {
        "t1": jnp.asarray(t1),
        "bias1": jnp.asarray(np.tile(b1 * sc1, OH1).reshape(1, -1)),
        "shift1": jnp.asarray(np.tile(sh1, OH1).reshape(1, -1)),
        "t2": jnp.asarray(t2),
        "bias2": jnp.asarray(np.tile(b2 * sc2, OH2).reshape(1, -1)),
        "shift2": jnp.asarray(np.tile(sh2, OH2).reshape(1, -1)),
        "w1f": jnp.asarray((w1p * sc3[None, None, :]).astype(np.float32)),
        "b1f": jnp.asarray((bl1 * sc3).reshape(1, -1)),
        "shift3": jnp.asarray(sh3.reshape(1, -1)),
        "w2f": jnp.asarray((wl2 * sc4[None, :]).astype(np.float32)),
        "b2f": jnp.asarray((bl2 * sc4).reshape(1, -1)),
        "shift4": jnp.asarray(sh4.reshape(1, -1)),
        "w3": jnp.asarray(wl3),
        "b3": jnp.asarray(bl3.reshape(1, -1)),
    }
    return prep


# ----------------------------------------------------------------------------
# Pure-JAX reference (eval-mode PyTorch semantics) for correctness checking
# ----------------------------------------------------------------------------

def reference_forward(raw, x):
    def conv(x, w, b):
        y = jax.lax.conv_general_dilated(
            x, jnp.asarray(w), (1, 1), "VALID",
            dimension_numbers=("NCHW", "OIHW", "NCHW"))
        return y + jnp.asarray(b).reshape(1, -1, 1, 1)

    def bn2d(x, sc_sh):
        sc, sh = sc_sh
        return x * sc.reshape(1, -1, 1, 1) + sh.reshape(1, -1, 1, 1)

    def pool(x):
        return jax.lax.reduce_window(x, -jnp.inf, jax.lax.max,
                                     (1, 1, 2, 2), (1, 1, 2, 2), "VALID")

    y = pool(bn2d(jax.nn.relu(conv(x, raw["w1"], raw["b1"])), raw["bn1"]))
    y = pool(bn2d(jax.nn.relu(conv(y, raw["w2"], raw["b2"])), raw["bn2"]))
    flat = y.reshape(y.shape[0], -1)
    h = jax.nn.relu(flat @ raw["wl1"] + raw["bl1"]) * raw["bn3"][0] + raw["bn3"][1]
    h = jax.nn.relu(h @ raw["wl2"] + raw["bl2"]) * raw["bn4"][0] + raw["bn4"][1]
    logits = h @ raw["wl3"] + raw["bl3"]
    return jax.nn.softmax(logits, axis=-1)


if __name__ == "__main__":
    IMAGE_SIZE = 28
    OUTPUT = 10
    BATCH = 2

    key = jax.random.PRNGKey(0)
    k_params, k_x = jax.random.split(key)
    raw = init_raw_params(k_params, IMAGE_SIZE, OUTPUT)
    prep = prepare_kernel_params(raw, IMAGE_SIZE)
    x = jax.random.normal(k_x, (BATCH, 1, IMAGE_SIZE, IMAGE_SIZE), jnp.float32)

    fwd = jax.jit(lenet_pallas)
    probs = jax.block_until_ready(fwd(prep, x))

    assert probs.shape == (BATCH, OUTPUT)
    row_sums = jnp.sum(probs, axis=1)
    assert bool(jnp.all(jnp.abs(row_sums - 1.0) < 1e-3))

    ref = jax.block_until_ready(reference_forward(raw, x))
    np.testing.assert_allclose(np.asarray(probs), np.asarray(ref),
                               atol=2e-3, rtol=1e-2)
    print("KERNEL_OK")
</pallas_src>

<mosaic_0001>
module attributes {stable_mosaic.version = 11 : i64} {
  func.func @_lenet_kernel(%arg0: i32, %arg1: memref<96x28xf32, #tpu.memory_space<vmem>>, %arg2: memref<5x28x96xf32, #tpu.memory_space<vmem>>, %arg3: memref<1x96xf32, #tpu.memory_space<vmem>>, %arg4: memref<1x96xf32, #tpu.memory_space<vmem>>, %arg5: memref<5x48x128xf32, #tpu.memory_space<vmem>>, %arg6: memref<1x128xf32, #tpu.memory_space<vmem>>, %arg7: memref<1x128xf32, #tpu.memory_space<vmem>>, %arg8: memref<4x64x1024xf32, #tpu.memory_space<vmem>>, %arg9: memref<1x1024xf32, #tpu.memory_space<vmem>>, %arg10: memref<1x1024xf32, #tpu.memory_space<vmem>>, %arg11: memref<1024x256xf32, #tpu.memory_space<vmem>>, %arg12: memref<1x256xf32, #tpu.memory_space<vmem>>, %arg13: memref<1x256xf32, #tpu.memory_space<vmem>>, %arg14: memref<256x10xf32, #tpu.memory_space<vmem>>, %arg15: memref<1x10xf32, #tpu.memory_space<vmem>>, %arg16: memref<2x10xf32, #tpu.memory_space<vmem>>) attributes {dimension_semantics = [#tpu.dimension_semantics<arbitrary>], iteration_bounds = array<i64: 1>, scalar_prefetch = 0 : i64, scratch_operands = 0 : i64, tpu.core_type = #tpu.core_type<tc>, window_params = [{pipeline_mode = #tpu.pipeline_mode<synchronous>, transform_indices = @transform_0, window_bounds = array<i64: 96, 28>}, {pipeline_mode = #tpu.pipeline_mode<synchronous>, transform_indices = @transform_1, window_bounds = array<i64: 5, 28, 96>}, {pipeline_mode = #tpu.pipeline_mode<synchronous>, transform_indices = @transform_2, window_bounds = array<i64: 1, 96>}, {pipeline_mode = #tpu.pipeline_mode<synchronous>, transform_indices = @transform_3, window_bounds = array<i64: 1, 96>}, {pipeline_mode = #tpu.pipeline_mode<synchronous>, transform_indices = @transform_4, window_bounds = array<i64: 5, 48, 128>}, {pipeline_mode = #tpu.pipeline_mode<synchronous>, transform_indices = @transform_5, window_bounds = array<i64: 1, 128>}, {pipeline_mode = #tpu.pipeline_mode<synchronous>, transform_indices = @transform_6, window_bounds = array<i64: 1, 128>}, {pipeline_mode = #tpu.pipeline_mode<synchronous>, transform_indices = @transform_7, window_bounds = array<i64: 4, 64, 1024>}, {pipeline_mode = #tpu.pipeline_mode<synchronous>, transform_indices = @transform_8, window_bounds = array<i64: 1, 1024>}, {pipeline_mode = #tpu.pipeline_mode<synchronous>, transform_indices = @transform_9, window_bounds = array<i64: 1, 1024>}, {pipeline_mode = #tpu.pipeline_mode<synchronous>, transform_indices = @transform_10, window_bounds = array<i64: 1024, 256>}, {pipeline_mode = #tpu.pipeline_mode<synchronous>, transform_indices = @transform_11, window_bounds = array<i64: 1, 256>}, {pipeline_mode = #tpu.pipeline_mode<synchronous>, transform_indices = @transform_12, window_bounds = array<i64: 1, 256>}, {pipeline_mode = #tpu.pipeline_mode<synchronous>, transform_indices = @transform_13, window_bounds = array<i64: 256, 10>}, {pipeline_mode = #tpu.pipeline_mode<synchronous>, transform_indices = @transform_14, window_bounds = array<i64: 1, 10>}, {pipeline_mode = #tpu.pipeline_mode<synchronous>, transform_indices = @transform_15, window_bounds = array<i64: 2, 10>}]} {
    %c0 = arith.constant 0 : index
    %c0_0 = arith.constant 0 : index
    %0 = vector.load %arg3[%c0, %c0_0] : memref<1x96xf32, #tpu.memory_space<vmem>>, vector<1x96xf32>
    %c0_1 = arith.constant 0 : index
    %c0_2 = arith.constant 0 : index
    %1 = vector.load %arg4[%c0_1, %c0_2] : memref<1x96xf32, #tpu.memory_space<vmem>>, vector<1x96xf32>
    %c0_3 = arith.constant 0 : index
    %c0_4 = arith.constant 0 : index
    %2 = vector.load %arg6[%c0_3, %c0_4] : memref<1x128xf32, #tpu.memory_space<vmem>>, vector<1x128xf32>
    %c0_5 = arith.constant 0 : index
    %c0_6 = arith.constant 0 : index
    %3 = vector.load %arg7[%c0_5, %c0_6] : memref<1x128xf32, #tpu.memory_space<vmem>>, vector<1x128xf32>
    %c0_7 = arith.constant 0 : index
    %c0_8 = arith.constant 0 : index
    %4 = vector.load %arg1[%c0_7, %c0_8] : memref<96x28xf32, #tpu.memory_space<vmem>>, vector<48x28xf32>
    %c0_9 = arith.constant 0 : index
    %c0_10 = arith.constant 0 : index
    %c0_11 = arith.constant 0 : index
    %5 = vector.load %arg2[%c0_9, %c0_10, %c0_11] : memref<5x28x96xf32, #tpu.memory_space<vmem>>, vector<1x28x96xf32>
    %6 = vector.shape_cast %5 : vector<1x28x96xf32> to vector<28x96xf32>
    %cst = arith.constant dense<0.000000e+00> : vector<48x96xf32>
    %7 = tpu.matmul %4, %6, %cst {dimension_numbers = #tpu.dot_dimension_numbers<[1], [0], [0], [1], [0, 0, 1, 1], [], []>} : vector<48x28xf32>, vector<28x96xf32>, vector<48x96xf32> -> vector<48x96xf32>
    %c12 = arith.constant 12 : index
    %c0_12 = arith.constant 0 : index
    %8 = vector.load %arg1[%c12, %c0_12] : memref<96x28xf32, #tpu.memory_space<vmem>>, vector<48x28xf32>
    %c1 = arith.constant 1 : index
    %c0_13 = arith.constant 0 : index
    %c0_14 = arith.constant 0 : index
    %9 = vector.load %arg2[%c1, %c0_13, %c0_14] : memref<5x28x96xf32, #tpu.memory_space<vmem>>, vector<1x28x96xf32>
    %10 = vector.shape_cast %9 : vector<1x28x96xf32> to vector<28x96xf32>
    %cst_15 = arith.constant dense<0.000000e+00> : vector<48x96xf32>
    %11 = tpu.matmul %8, %10, %cst_15 {dimension_numbers = #tpu.dot_dimension_numbers<[1], [0], [0], [1], [0, 0, 1, 1], [], []>} : vector<48x28xf32>, vector<28x96xf32>, vector<48x96xf32> -> vector<48x96xf32>
    %12 = arith.addf %7, %11 : vector<48x96xf32>
    %c24 = arith.constant 24 : index
    %c0_16 = arith.constant 0 : index
    %13 = vector.load %arg1[%c24, %c0_16] : memref<96x28xf32, #tpu.memory_space<vmem>>, vector<48x28xf32>
    %c2 = arith.constant 2 : index
    %c0_17 = arith.constant 0 : index
    %c0_18 = arith.constant 0 : index
    %14 = vector.load %arg2[%c2, %c0_17, %c0_18] : memref<5x28x96xf32, #tpu.memory_space<vmem>>, vector<1x28x96xf32>
    %15 = vector.shape_cast %14 : vector<1x28x96xf32> to vector<28x96xf32>
    %cst_19 = arith.constant dense<0.000000e+00> : vector<48x96xf32>
    %16 = tpu.matmul %13, %15, %cst_19 {dimension_numbers = #tpu.dot_dimension_numbers<[1], [0], [0], [1], [0, 0, 1, 1], [], []>} : vector<48x28xf32>, vector<28x96xf32>, vector<48x96xf32> -> vector<48x96xf32>
    %17 = arith.addf %12, %16 : vector<48x96xf32>
    %c36 = arith.constant 36 : index
    %c0_20 = arith.constant 0 : index
    %18 = vector.load %arg1[%c36, %c0_20] : memref<96x28xf32, #tpu.memory_space<vmem>>, vector<48x28xf32>
    %c3 = arith.constant 3 : index
    %c0_21 = arith.constant 0 : index
    %c0_22 = arith.constant 0 : index
    %19 = vector.load %arg2[%c3, %c0_21, %c0_22] : memref<5x28x96xf32, #tpu.memory_space<vmem>>, vector<1x28x96xf32>
    %20 = vector.shape_cast %19 : vector<1x28x96xf32> to vector<28x96xf32>
    %cst_23 = arith.constant dense<0.000000e+00> : vector<48x96xf32>
    %21 = tpu.matmul %18, %20, %cst_23 {dimension_numbers = #tpu.dot_dimension_numbers<[1], [0], [0], [1], [0, 0, 1, 1], [], []>} : vector<48x28xf32>, vector<28x96xf32>, vector<48x96xf32> -> vector<48x96xf32>
    %22 = arith.addf %17, %21 : vector<48x96xf32>
    %c48 = arith.constant 48 : index
    %c0_24 = arith.constant 0 : index
    %23 = vector.load %arg1[%c48, %c0_24] : memref<96x28xf32, #tpu.memory_space<vmem>>, vector<48x28xf32>
    %c4 = arith.constant 4 : index
    %c0_25 = arith.constant 0 : index
    %c0_26 = arith.constant 0 : index
    %24 = vector.load %arg2[%c4, %c0_25, %c0_26] : memref<5x28x96xf32, #tpu.memory_space<vmem>>, vector<1x28x96xf32>
    %25 = vector.shape_cast %24 : vector<1x28x96xf32> to vector<28x96xf32>
    %cst_27 = arith.constant dense<0.000000e+00> : vector<48x96xf32>
    %26 = tpu.matmul %23, %25, %cst_27 {dimension_numbers = #tpu.dot_dimension_numbers<[1], [0], [0], [1], [0, 0, 1, 1], [], []>} : vector<48x28xf32>, vector<28x96xf32>, vector<48x96xf32> -> vector<48x96xf32>
    %27 = arith.addf %22, %26 : vector<48x96xf32>
    %28 = vector.broadcast %0 : vector<1x96xf32> to vector<48x96xf32>
    %29 = arith.addf %27, %28 : vector<48x96xf32>
    %cst_28 = arith.constant 0.000000e+00 : f32
    %30 = vector.broadcast %cst_28 : f32 to vector<48x96xf32>
    %31 = arith.maximumf %29, %30 : vector<48x96xf32>
    %32 = vector.broadcast %1 : vector<1x96xf32> to vector<48x96xf32>
    %33 = arith.addf %31, %32 : vector<48x96xf32>
    %34 = vector.extract_strided_slice %33 {offsets = [0, 0], sizes = [48, 48], strides = [1, 1]} : vector<48x96xf32> to vector<48x48xf32>
    %35 = vector.extract_strided_slice %33 {offsets = [0, 48], sizes = [48, 48], strides = [1, 1]} : vector<48x96xf32> to vector<48x48xf32>
    %36 = arith.maximumf %34, %35 : vector<48x48xf32>
    %37 = vector.extract_strided_slice %36 {offsets = [0, 0], sizes = [12, 48], strides = [1, 1]} : vector<48x48xf32> to vector<12x48xf32>
    %38 = vector.extract_strided_slice %36 {offsets = [12, 0], sizes = [12, 48], strides = [1, 1]} : vector<48x48xf32> to vector<12x48xf32>
    %39 = arith.maximumf %37, %38 : vector<12x48xf32>
    %40 = vector.extract_strided_slice %36 {offsets = [24, 0], sizes = [12, 48], strides = [1, 1]} : vector<48x48xf32> to vector<12x48xf32>
    %41 = vector.extract_strided_slice %36 {offsets = [36, 0], sizes = [12, 48], strides = [1, 1]} : vector<48x48xf32> to vector<12x48xf32>
    %42 = arith.maximumf %40, %41 : vector<12x48xf32>
    %43 = vector.extract_strided_slice %39 {offsets = [0, 0], sizes = [8, 48], strides = [1, 1]} : vector<12x48xf32> to vector<8x48xf32>
    %44 = vector.extract_strided_slice %42 {offsets = [0, 0], sizes = [8, 48], strides = [1, 1]} : vector<12x48xf32> to vector<8x48xf32>
    %45 = vector.extract_strided_slice %39 {offsets = [2, 0], sizes = [8, 48], strides = [1, 1]} : vector<12x48xf32> to vector<8x48xf32>
    %46 = vector.extract_strided_slice %42 {offsets = [2, 0], sizes = [8, 48], strides = [1, 1]} : vector<12x48xf32> to vector<8x48xf32>
    %47 = vector.extract_strided_slice %39 {offsets = [4, 0], sizes = [8, 48], strides = [1, 1]} : vector<12x48xf32> to vector<8x48xf32>
    %48 = vector.extract_strided_slice %42 {offsets = [4, 0], sizes = [8, 48], strides = [1, 1]} : vector<12x48xf32> to vector<8x48xf32>
    %49 = tpu.concatenate %43, %44, %45, %46, %47, %48 in 0 : vector<8x48xf32>, vector<8x48xf32>, vector<8x48xf32>, vector<8x48xf32>, vector<8x48xf32>, vector<8x48xf32> -> vector<48x48xf32>
    %50 = vector.extract_strided_slice %49 {offsets = [0, 0], sizes = [16, 48], strides = [1, 1]} : vector<48x48xf32> to vector<16x48xf32>
    %c0_29 = arith.constant 0 : index
    %c0_30 = arith.constant 0 : index
    %c0_31 = arith.constant 0 : index
    %51 = vector.load %arg5[%c0_29, %c0_30, %c0_31] : memref<5x48x128xf32, #tpu.memory_space<vmem>>, vector<1x48x128xf32>
    %52 = vector.shape_cast %51 : vector<1x48x128xf32> to vector<48x128xf32>
    %cst_32 = arith.constant dense<0.000000e+00> : vector<16x128xf32>
    %53 = tpu.matmul %50, %52, %cst_32 {dimension_numbers = #tpu.dot_dimension_numbers<[1], [0], [0], [1], [0, 0, 1, 1], [], []>} : vector<16x48xf32>, vector<48x128xf32>, vector<16x128xf32> -> vector<16x128xf32>
    %54 = vector.extract_strided_slice %49 {offsets = [8, 0], sizes = [16, 48], strides = [1, 1]} : vector<48x48xf32> to vector<16x48xf32>
    %c1_33 = arith.constant 1 : index
    %c0_34 = arith.constant 0 : index
    %c0_35 = arith.constant 0 : index
    %55 = vector.load %arg5[%c1_33, %c0_34, %c0_35] : memref<5x48x128xf32, #tpu.memory_space<vmem>>, vector<1x48x128xf32>
    %56 = vector.shape_cast %55 : vector<1x48x128xf32> to vector<48x128xf32>
    %cst_36 = arith.constant dense<0.000000e+00> : vector<16x128xf32>
    %57 = tpu.matmul %54, %56, %cst_36 {dimension_numbers = #tpu.dot_dimension_numbers<[1], [0], [0], [1], [0, 0, 1, 1], [], []>} : vector<16x48xf32>, vector<48x128xf32>, vector<16x128xf32> -> vector<16x128xf32>
    %58 = arith.addf %53, %57 : vector<16x128xf32>
    %59 = vector.extract_strided_slice %49 {offsets = [16, 0], sizes = [16, 48], strides = [1, 1]} : vector<48x48xf32> to vector<16x48xf32>
    %c2_37 = arith.constant 2 : index
    %c0_38 = arith.constant 0 : index
    %c0_39 = arith.constant 0 : index
    %60 = vector.load %arg5[%c2_37, %c0_38, %c0_39] : memref<5x48x128xf32, #tpu.memory_space<vmem>>, vector<1x48x128xf32>
    %61 = vector.shape_cast %60 : vector<1x48x128xf32> to vector<48x128xf32>
    %cst_40 = arith.constant dense<0.000000e+00> : vector<16x128xf32>
    %62 = tpu.matmul %59, %61, %cst_40 {dimension_numbers = #tpu.dot_dimension_numbers<[1], [0], [0], [1], [0, 0, 1, 1], [], []>} : vector<16x48xf32>, vector<48x128xf32>, vector<16x128xf32> -> vector<16x128xf32>
    %63 = arith.addf %58, %62 : vector<16x128xf32>
    %64 = vector.extract_strided_slice %49 {offsets = [24, 0], sizes = [16, 48], strides = [1, 1]} : vector<48x48xf32> to vector<16x48xf32>
    %c3_41 = arith.constant 3 : index
    %c0_42 = arith.constant 0 : index
    %c0_43 = arith.constant 0 : index
    %65 = vector.load %arg5[%c3_41, %c0_42, %c0_43] : memref<5x48x128xf32, #tpu.memory_space<vmem>>, vector<1x48x128xf32>
    %66 = vector.shape_cast %65 : vector<1x48x128xf32> to vector<48x128xf32>
    %cst_44 = arith.constant dense<0.000000e+00> : vector<16x128xf32>
    %67 = tpu.matmul %64, %66, %cst_44 {dimension_numbers = #tpu.dot_dimension_numbers<[1], [0], [0], [1], [0, 0, 1, 1], [], []>} : vector<16x48xf32>, vector<48x128xf32>, vector<16x128xf32> -> vector<16x128xf32>
    %68 = arith.addf %63, %67 : vector<16x128xf32>
    %69 = vector.extract_strided_slice %49 {offsets = [32, 0], sizes = [16, 48], strides = [1, 1]} : vector<48x48xf32> to vector<16x48xf32>
    %c4_45 = arith.constant 4 : index
    %c0_46 = arith.constant 0 : index
    %c0_47 = arith.constant 0 : index
    %70 = vector.load %arg5[%c4_45, %c0_46, %c0_47] : memref<5x48x128xf32, #tpu.memory_space<vmem>>, vector<1x48x128xf32>
    %71 = vector.shape_cast %70 : vector<1x48x128xf32> to vector<48x128xf32>
    %cst_48 = arith.constant dense<0.000000e+00> : vector<16x128xf32>
    %72 = tpu.matmul %69, %71, %cst_48 {dimension_numbers = #tpu.dot_dimension_numbers<[1], [0], [0], [1], [0, 0, 1, 1], [], []>} : vector<16x48xf32>, vector<48x128xf32>, vector<16x128xf32> -> vector<16x128xf32>
    %73 = arith.addf %68, %72 : vector<16x128xf32>
    %74 = vector.broadcast %2 : vector<1x128xf32> to vector<16x128xf32>
    %75 = arith.addf %73, %74 : vector<16x128xf32>
    %cst_49 = arith.constant 0.000000e+00 : f32
    %76 = vector.broadcast %cst_49 : f32 to vector<16x128xf32>
    %77 = arith.maximumf %75, %76 : vector<16x128xf32>
    %78 = vector.broadcast %3 : vector<1x128xf32> to vector<16x128xf32>
    %79 = arith.addf %77, %78 : vector<16x128xf32>
    %80 = vector.extract_strided_slice %79 {offsets = [0, 0], sizes = [16, 64], strides = [1, 1]} : vector<16x128xf32> to vector<16x64xf32>
    %81 = vector.extract_strided_slice %79 {offsets = [0, 64], sizes = [16, 64], strides = [1, 1]} : vector<16x128xf32> to vector<16x64xf32>
    %82 = arith.maximumf %80, %81 : vector<16x64xf32>
    %83 = vector.extract_strided_slice %82 {offsets = [0, 0], sizes = [8, 64], strides = [1, 1]} : vector<16x64xf32> to vector<8x64xf32>
    %84 = vector.extract_strided_slice %82 {offsets = [8, 0], sizes = [8, 64], strides = [1, 1]} : vector<16x64xf32> to vector<8x64xf32>
    %85 = arith.maximumf %83, %84 : vector<8x64xf32>
    %86 = vector.extract_strided_slice %85 {offsets = [0, 0], sizes = [2, 64], strides = [1, 1]} : vector<8x64xf32> to vector<2x64xf32>
    %c0_50 = arith.constant 0 : index
    %c0_51 = arith.constant 0 : index
    %c0_52 = arith.constant 0 : index
    %87 = vector.load %arg8[%c0_50, %c0_51, %c0_52] : memref<4x64x1024xf32, #tpu.memory_space<vmem>>, vector<1x64x1024xf32>
    %88 = vector.shape_cast %87 : vector<1x64x1024xf32> to vector<64x1024xf32>
    %cst_53 = arith.constant dense<0.000000e+00> : vector<2x1024xf32>
    %89 = tpu.matmul %86, %88, %cst_53 {dimension_numbers = #tpu.dot_dimension_numbers<[1], [0], [0], [1], [0, 0, 1, 1], [], []>} : vector<2x64xf32>, vector<64x1024xf32>, vector<2x1024xf32> -> vector<2x1024xf32>
    %90 = vector.extract_strided_slice %85 {offsets = [2, 0], sizes = [2, 64], strides = [1, 1]} : vector<8x64xf32> to vector<2x64xf32>
    %c1_54 = arith.constant 1 : index
    %c0_55 = arith.constant 0 : index
    %c0_56 = arith.constant 0 : index
    %91 = vector.load %arg8[%c1_54, %c0_55, %c0_56] : memref<4x64x1024xf32, #tpu.memory_space<vmem>>, vector<1x64x1024xf32>
    %92 = vector.shape_cast %91 : vector<1x64x1024xf32> to vector<64x1024xf32>
    %cst_57 = arith.constant dense<0.000000e+00> : vector<2x1024xf32>
    %93 = tpu.matmul %90, %92, %cst_57 {dimension_numbers = #tpu.dot_dimension_numbers<[1], [0], [0], [1], [0, 0, 1, 1], [], []>} : vector<2x64xf32>, vector<64x1024xf32>, vector<2x1024xf32> -> vector<2x1024xf32>
    %94 = arith.addf %89, %93 : vector<2x1024xf32>
    %95 = vector.extract_strided_slice %85 {offsets = [4, 0], sizes = [2, 64], strides = [1, 1]} : vector<8x64xf32> to vector<2x64xf32>
    %c2_58 = arith.constant 2 : index
    %c0_59 = arith.constant 0 : index
    %c0_60 = arith.constant 0 : index
    %96 = vector.load %arg8[%c2_58, %c0_59, %c0_60] : memref<4x64x1024xf32, #tpu.memory_space<vmem>>, vector<1x64x1024xf32>
    %97 = vector.shape_cast %96 : vector<1x64x1024xf32> to vector<64x1024xf32>
    %cst_61 = arith.constant dense<0.000000e+00> : vector<2x1024xf32>
    %98 = tpu.matmul %95, %97, %cst_61 {dimension_numbers = #tpu.dot_dimension_numbers<[1], [0], [0], [1], [0, 0, 1, 1], [], []>} : vector<2x64xf32>, vector<64x1024xf32>, vector<2x1024xf32> -> vector<2x1024xf32>
    %99 = arith.addf %94, %98 : vector<2x1024xf32>
    %100 = vector.extract_strided_slice %85 {offsets = [6, 0], sizes = [2, 64], strides = [1, 1]} : vector<8x64xf32> to vector<2x64xf32>
    %c3_62 = arith.constant 3 : index
    %c0_63 = arith.constant 0 : index
    %c0_64 = arith.constant 0 : index
    %101 = vector.load %arg8[%c3_62, %c0_63, %c0_64] : memref<4x64x1024xf32, #tpu.memory_space<vmem>>, vector<1x64x1024xf32>
    %102 = vector.shape_cast %101 : vector<1x64x1024xf32> to vector<64x1024xf32>
    %cst_65 = arith.constant dense<0.000000e+00> : vector<2x1024xf32>
    %103 = tpu.matmul %100, %102, %cst_65 {dimension_numbers = #tpu.dot_dimension_numbers<[1], [0], [0], [1], [0, 0, 1, 1], [], []>} : vector<2x64xf32>, vector<64x1024xf32>, vector<2x1024xf32> -> vector<2x1024xf32>
    %104 = arith.addf %99, %103 : vector<2x1024xf32>
    %c0_66 = arith.constant 0 : index
    %c0_67 = arith.constant 0 : index
    %105 = vector.load %arg9[%c0_66, %c0_67] : memref<1x1024xf32, #tpu.memory_space<vmem>>, vector<1x1024xf32>
    %106 = vector.broadcast %105 : vector<1x1024xf32> to vector<2x1024xf32>
    %107 = arith.addf %104, %106 : vector<2x1024xf32>
    %cst_68 = arith.constant 0.000000e+00 : f32
    %108 = vector.broadcast %cst_68 : f32 to vector<2x1024xf32>
    %109 = arith.maximumf %107, %108 : vector<2x1024xf32>
    %c0_69 = arith.constant 0 : index
    %c0_70 = arith.constant 0 : index
    %110 = vector.load %arg10[%c0_69, %c0_70] : memref<1x1024xf32, #tpu.memory_space<vmem>>, vector<1x1024xf32>
    %111 = vector.broadcast %110 : vector<1x1024xf32> to vector<2x1024xf32>
    %112 = arith.addf %109, %111 : vector<2x1024xf32>
    %c0_71 = arith.constant 0 : index
    %c0_72 = arith.constant 0 : index
    %113 = vector.load %arg11[%c0_71, %c0_72] : memref<1024x256xf32, #tpu.memory_space<vmem>>, vector<1024x256xf32>
    %cst_73 = arith.constant dense<0.000000e+00> : vector<2x256xf32>
    %114 = tpu.matmul %112, %113, %cst_73 {dimension_numbers = #tpu.dot_dimension_numbers<[1], [0], [0], [1], [0, 0, 1, 1], [], []>} : vector<2x1024xf32>, vector<1024x256xf32>, vector<2x256xf32> -> vector<2x256xf32>
    %c0_74 = arith.constant 0 : index
    %c0_75 = arith.constant 0 : index
    %115 = vector.load %arg12[%c0_74, %c0_75] : memref<1x256xf32, #tpu.memory_space<vmem>>, vector<1x256xf32>
    %116 = vector.broadcast %115 : vector<1x256xf32> to vector<2x256xf32>
    %117 = arith.addf %114, %116 : vector<2x256xf32>
    %cst_76 = arith.constant 0.000000e+00 : f32
    %118 = vector.broadcast %cst_76 : f32 to vector<2x256xf32>
    %119 = arith.maximumf %117, %118 : vector<2x256xf32>
    %c0_77 = arith.constant 0 : index
    %c0_78 = arith.constant 0 : index
    %120 = vector.load %arg13[%c0_77, %c0_78] : memref<1x256xf32, #tpu.memory_space<vmem>>, vector<1x256xf32>
    %121 = vector.broadcast %120 : vector<1x256xf32> to vector<2x256xf32>
    %122 = arith.addf %119, %121 : vector<2x256xf32>
    %c0_79 = arith.constant 0 : index
    %c0_80 = arith.constant 0 : index
    %123 = vector.load %arg14[%c0_79, %c0_80] : memref<256x10xf32, #tpu.memory_space<vmem>>, vector<256x10xf32>
    %cst_81 = arith.constant dense<0.000000e+00> : vector<2x10xf32>
    %124 = tpu.matmul %122, %123, %cst_81 {dimension_numbers = #tpu.dot_dimension_numbers<[1], [0], [0], [1], [0, 0, 1, 1], [], []>} : vector<2x256xf32>, vector<256x10xf32>, vector<2x10xf32> -> vector<2x10xf32>
    %c0_82 = arith.constant 0 : index
    %c0_83 = arith.constant 0 : index
    %125 = vector.load %arg15[%c0_82, %c0_83] : memref<1x10xf32, #tpu.memory_space<vmem>>, vector<1x10xf32>
    %126 = vector.broadcast %125 : vector<1x10xf32> to vector<2x10xf32>
    %127 = arith.addf %124, %126 : vector<2x10xf32>
    %cst_84 = arith.constant dense<0xFF800000> : vector<2xf32>
    %128 = vector.multi_reduction <maximumf>, %127, %cst_84 [1] : vector<2x10xf32> to vector<2xf32>
    %129 = vector.shape_cast %128 : vector<2xf32> to vector<2x1xf32>
    %130 = vector.broadcast %129 : vector<2x1xf32> to vector<2x10xf32>
    %131 = arith.subf %127, %130 : vector<2x10xf32>
    %132 = math.exp %131 : vector<2x10xf32>
    %cst_85 = arith.constant dense<0.000000e+00> : vector<2xf32>
    %133 = vector.multi_reduction <add>, %132, %cst_85 [1] : vector<2x10xf32> to vector<2xf32>
    %134 = vector.shape_cast %133 : vector<2xf32> to vector<2x1xf32>
    %135 = vector.broadcast %134 : vector<2x1xf32> to vector<2x10xf32>
    %136 = arith.divf %132, %135 : vector<2x10xf32>
    %c0_86 = arith.constant 0 : index
    %c0_87 = arith.constant 0 : index
    %137 = vector.load %arg16[%c0_86, %c0_87] : memref<2x10xf32, #tpu.memory_space<vmem>>, vector<2x10xf32>
    tpu.vector_store %arg16[%c0_86, %c0_87], %136 {strides = array<i32>} : memref<2x10xf32, #tpu.memory_space<vmem>>, vector<2x10xf32>,
    return
  }
  func.func @transform_0(%arg0: i32) -> (i32, i32) {
    %c0_i32 = arith.constant 0 : i32
    %c0_i32_0 = arith.constant 0 : i32
    %c0_i32_1 = arith.constant 0 : i32
    return %c0_i32, %c0_i32_0 : i32, i32
  }
  func.func @transform_1(%arg0: i32) -> (i32, i32, i32) {
    %c0_i32 = arith.constant 0 : i32
    %c0_i32_0 = arith.constant 0 : i32
    %c0_i32_1 = arith.constant 0 : i32
    %c0_i32_2 = arith.constant 0 : i32
    return %c0_i32, %c0_i32_0, %c0_i32_1 : i32, i32, i32
  }
  func.func @transform_2(%arg0: i32) -> (i32, i32) {
    %c0_i32 = arith.constant 0 : i32
    %c0_i32_0 = arith.constant 0 : i32
    %c0_i32_1 = arith.constant 0 : i32
    return %c0_i32, %c0_i32_0 : i32, i32
  }
  func.func @transform_3(%arg0: i32) -> (i32, i32) {
    %c0_i32 = arith.constant 0 : i32
    %c0_i32_0 = arith.constant 0 : i32
    %c0_i32_1 = arith.constant 0 : i32
    return %c0_i32, %c0_i32_0 : i32, i32
  }
  func.func @transform_4(%arg0: i32) -> (i32, i32, i32) {
    %c0_i32 = arith.constant 0 : i32
    %c0_i32_0 = arith.constant 0 : i32
    %c0_i32_1 = arith.constant 0 : i32
    %c0_i32_2 = arith.constant 0 : i32
    return %c0_i32, %c0_i32_0, %c0_i32_1 : i32, i32, i32
  }
  func.func @transform_5(%arg0: i32) -> (i32, i32) {
    %c0_i32 = arith.constant 0 : i32
    %c0_i32_0 = arith.constant 0 : i32
    %c0_i32_1 = arith.constant 0 : i32
    return %c0_i32, %c0_i32_0 : i32, i32
  }
  func.func @transform_6(%arg0: i32) -> (i32, i32) {
    %c0_i32 = arith.constant 0 : i32
    %c0_i32_0 = arith.constant 0 : i32
    %c0_i32_1 = arith.constant 0 : i32
    return %c0_i32, %c0_i32_0 : i32, i32
  }
  func.func @transform_7(%arg0: i32) -> (i32, i32, i32) {
    %c0_i32 = arith.constant 0 : i32
    %c0_i32_0 = arith.constant 0 : i32
    %c0_i32_1 = arith.constant 0 : i32
    %c0_i32_2 = arith.constant 0 : i32
    return %c0_i32, %c0_i32_0, %c0_i32_1 : i32, i32, i32
  }
  func.func @transform_8(%arg0: i32) -> (i32, i32) {
    %c0_i32 = arith.constant 0 : i32
    %c0_i32_0 = arith.constant 0 : i32
    %c0_i32_1 = arith.constant 0 : i32
    return %c0_i32, %c0_i32_0 : i32, i32
  }
  func.func @transform_9(%arg0: i32) -> (i32, i32) {
    %c0_i32 = arith.constant 0 : i32
    %c0_i32_0 = arith.constant 0 : i32
    %c0_i32_1 = arith.constant 0 : i32
    return %c0_i32, %c0_i32_0 : i32, i32
  }
  func.func @transform_10(%arg0: i32) -> (i32, i32) {
    %c0_i32 = arith.constant 0 : i32
    %c0_i32_0 = arith.constant 0 : i32
    %c0_i32_1 = arith.constant 0 : i32
    return %c0_i32, %c0_i32_0 : i32, i32
  }
  func.func @transform_11(%arg0: i32) -> (i32, i32) {
    %c0_i32 = arith.constant 0 : i32
    %c0_i32_0 = arith.constant 0 : i32
    %c0_i32_1 = arith.constant 0 : i32
    return %c0_i32, %c0_i32_0 : i32, i32
  }
  func.func @transform_12(%arg0: i32) -> (i32, i32) {
    %c0_i32 = arith.constant 0 : i32
    %c0_i32_0 = arith.constant 0 : i32
    %c0_i32_1 = arith.constant 0 : i32
    return %c0_i32, %c0_i32_0 : i32, i32
  }
  func.func @transform_13(%arg0: i32) -> (i32, i32) {
    %c0_i32 = arith.constant 0 : i32
    %c0_i32_0 = arith.constant 0 : i32
    %c0_i32_1 = arith.constant 0 : i32
    return %c0_i32, %c0_i32_0 : i32, i32
  }
  func.func @transform_14(%arg0: i32) -> (i32, i32) {
    %c0_i32 = arith.constant 0 : i32
    %c0_i32_0 = arith.constant 0 : i32
    %c0_i32_1 = arith.constant 0 : i32
    return %c0_i32, %c0_i32_0 : i32, i32
  }
  func.func @transform_15(%arg0: i32) -> (i32, i32) {
    %c0_i32 = arith.constant 0 : i32
    %c0_i32_0 = arith.constant 0 : i32
    %c0_i32_1 = arith.constant 0 : i32
    return %c0_i32, %c0_i32_0 : i32, i32
  }
}

</mosaic_0001>

<bundles_post_ra>
// kernel: lenet_pallas.1
= control target key start
LH: loop header
LB: loop body
LE: loop exit
PB: predicated region body
PF: predicated region fallthrough
CT: control target
= control target key end

     0   :  { %20 = vsyncpa [#allocation3], 0  ;;  %s5401_s0 = inlined_call_operand.vmem [shape: f32[96,28], index: 0, kind: input, shape index: {}]   ;;  %s5402_s1 = inlined_call_operand.vmem [shape: f32[5,28,96], index: 1, kind: input, shape index: {}]   ;;  %s5403_s2 = inlined_call_operand.vmem [shape: f32[1,96], index: 2, kind: input, shape index: {}]   ;;  %s5404_s3 = inlined_call_operand.vmem [shape: f32[1,96], index: 3, kind: input, shape index: {}]   ;;  %s5405_s4 = inlined_call_operand.vmem [shape: f32[5,48,128], index: 4, kind: input, shape index: {}]   ;;  %s5406_s5 = inlined_call_operand.vmem [shape: f32[1,128], index: 5, kind: input, shape index: {}]   ;;  %s5407_s6 = inlined_call_operand.vmem [shape: f32[1,128], index: 6, kind: input, shape index: {}]   ;;  %s5408_s7 = inlined_call_operand.hbm [shape: f32[4,64,1024], index: 7, kind: input, shape index: {}]   ;;  %s5409_s8 = inlined_call_operand.vmem [shape: f32[1,1024], index: 8, kind: input, shape index: {}]   ;;  %s5410_s9 = inlined_call_operand.vmem [shape: f32[1,1024], index: 9, kind: input, shape index: {}]   ;;  %s5411_s10 = inlined_call_operand.hbm [shape: f32[1024,256], index: 10, kind: input, shape index: {}]   ;;  %s5412_s11 = inlined_call_operand.vmem [shape: f32[1,256], index: 11, kind: input, shape index: {}]   ;;  %s5413_s12 = inlined_call_operand.vmem [shape: f32[1,256], index: 12, kind: input, shape index: {}]   ;;  %s5414_s13 = inlined_call_operand.vmem [shape: f32[256,10], index: 13, kind: input, shape index: {}]   ;;  %s5415_s14 = inlined_call_operand.vmem [shape: f32[1,10], index: 14, kind: input, shape index: {}]   ;;  %s5416_s15 = inlined_call_operand.hbm [shape: f32[2,10], index: 15, kind: output, shape index: {}]  }
   0x1   :  { %21 = vsyncpa [#allocation6], 0 }
   0x2   :  { %22 = vsyncpa [#allocation4], 0  ;;  %s4722_s18 = smov [#allocation2]   ;;  %s4650_s22 = scalar_lea.hbm %s5408_s7, 32768 }
   0x3   :  { %s42_s19 = sshll.u32 %s4722_s18, 4  ;;  %p4651_p0 = scmp.ne.s32.totalorder %s5408_s7, %s4650_s22  ;;  %s43_s19 = int_to_ptr.vmem [resolvable:$true] %s42_s19 }
   0x4   :  { %p4654_p1 = scmp.lt.u32.totalorder %s4650_s22, %s5408_s7 }
   0x6   :  { %p4656_p2 = pnand %p4654_p1, %p4651_p0 }
   0x8   :  { %4659 = shalt.err (!%p4656_p2)
}
   0x9   :  { %s4660_s27 = scalar_lea.vmem %s43_s19, 32768  ;;  %p4665_p4 = scmp.lt.s32.totalorder %s43_s19, %s43_s19 }
   0xa   :  { %p4661_p3 = scmp.ne.s32.totalorder %s43_s19, %s4660_s27  ;;  %p4666_p5 = scmp.lt.s32.totalorder %s4660_s27, %s4660_s27 }
   0xc   :  { %p4667_p6 = por %p4666_p5, %p4665_p4 }
   0xe   :  { %p4668_p7 = pnand %p4667_p6, %p4661_p3 }
  0x10   :  { %4671 = shalt.err (!%p4668_p7)
}
  0x11   :  { %s4723_s28 = smov 1024   ;;  %s4724_s29 = smov 64  }
  0x12   :  { %48 = dma.hbm_to_vmem [thread:$0]  %s5408_s7, 32768, %s43_s19, [#allocation3], %s4723_s28, %s4723_s28, %s4724_s29  }
  0x13   :  { %s4725_s17 = smov [#allocation5]   ;;  %s4672_s22 = scalar_lea.hbm %s5411_s10, 32768 }
  0x14   :  { %s58_s18 = sshll.u32 %s4725_s17, 4  ;;  %p4673_p8 = scmp.ne.s32.totalorder %s5411_s10, %s4672_s22  ;;  %s59_s18 = int_to_ptr.vmem [resolvable:$true] %s58_s18 }
  0x15   :  { %p4676_p9 = scmp.lt.u32.totalorder %s4672_s22, %s5411_s10 }
  0x17   :  { %p4678_p10 = pnand %p4676_p9, %p4673_p8 }
  0x19   :  { %4681 = shalt.err (!%p4678_p10)
}
  0x1a   :  { %s4682_s27 = scalar_lea.vmem %s59_s18, 32768  ;;  %p4687_p12 = scmp.lt.s32.totalorder %s59_s18, %s59_s18 }
  0x1b   :  { %p4683_p11 = scmp.ne.s32.totalorder %s59_s18, %s4682_s27  ;;  %p4688_p13 = scmp.lt.s32.totalorder %s4682_s27, %s4682_s27 }
  0x1d   :  { %p4689_p0 = por %p4688_p13, %p4687_p12 }
  0x1f   :  { %p4690_p1 = pnand %p4689_p0, %p4683_p11 }
  0x21   :  { %4693 = shalt.err (!%p4690_p1)
}
  0x22   :  { %s4726_s7 = smov 256   ;;  %s4727_s19 = smov 16  }
  0x23   :  { %64 = dma.hbm_to_vmem [thread:$0]  %s5411_s10, 32768, %s59_s18, [#allocation6], %s4726_s7, %s4726_s7, %s4727_s19  }
  0x24   :  { %4716 = dma.done.wait [#allocation3], 32768  }
  0x25   :  { %4717 = vsyncadd [#allocation3], 4294934528 }
  0x26   :  { %4718 = dma.done.wait [#allocation6], 32768  }
  0x27   :  { %4719 = vsyncadd [#allocation6], 4294934528  ;;  %vm123_vm0 = vcmask 1043456   ;;  %vm104_vm1 = vcmask 228352   ;;  %v3527_v0 = vld [vmem:[%s5402_s1 + $0x20] sm:$0xff]  ;;  %v3528_v1 = vld [vmem:[%s5402_s1 + $0x28] sm:$0xff] }
  0x28   :  { %v3529_v2 = vld [vmem:[%s5402_s1 + $0x30] sm:$0xff]  ;;  %v3918_v3 = vpack.c.bf16 %v3528_v1, %v3527_v0  ;;  %v3530_v4 = vld [vmem:[%s5402_s1 + $0x38] sm:$0xf]  ;;  %vm4728_vm2 = vmmov 1   ;;  %v89_v8 = vld [vmem:[%s5402_s1] sm:$0xff]  ;;  %s4729_s26 = smov 80  }
  0x29   :  { %v93_v5 = vld [vmem:[%s5401_s0 + $0xc] sm:$0xff]  ;;  %v3922_v6 = vpack.c.bf16 %v3530_v4, %v3529_v2  ;;  %vm4853_vm3 = vmpackc.low %vm123_vm0, %vm4728_vm2  ;;  %v92_v12 = vld [vmem:[%s5402_s1 + $0x18] sm:$0xf]  ;;  %vm845_vm4 = vcmask 392192   ;;  %vm817_vm5 = vcmask 1045504   ;;  %vm1420_vm6 = vcmask 523264  }
  0x2a   :  { %3766 = vmatprep.mubr.msk.f32.mxu0 %vm104_vm1, %v93_v5  ;;  %v90_v9 = vld [vmem:[%s5402_s1 + $0x8] sm:$0xff]  ;;  %3919 = vmatprep.subr.bf16.mxu0 %v3918_v3  ;;  %v91_v11 = vld [vmem:[%s5402_s1 + $0x10] sm:$0xff]  ;;  %v95_v14 = vld [vmem:[%s5401_s0 + $0x1c] sm:$0xff]  ;;  %vm3498_vm7 = vcmask 74752  }
  0x2b   :  { %3921 = vmatpush3.bf16.msra.mxu0 %v3918_v3  ;;  %v3928_v10 = vpack.c.bf16 %v90_v9, %v89_v8  ;;  %v94_v13 = vld [vmem:[%s5401_s0 + $0x14] sm:$0xff]  ;;  %v3932_v15 = vpack.c.bf16 %v92_v12, %v91_v11  ;;  %v3545_v16 = vld [vmem:[%s5402_s1 + $0x40] sm:$0xff]  ;;  %v3546_v17 = vld [vmem:[%s5402_s1 + $0x48] sm:$0xff] }
  0x2c   :  { %3924 = vmatprep.subr.msk.bf16.mxu0 %vm4853_vm3, %v3922_v6  ;;  %v96_v18 = vld [vmem:[%s5401_s0 + $0x24] sm:$0xff]  ;;  %v97_v19 = vld [vmem:[%s5401_s0 + $0x2c] sm:$0xff]  ;;  %v3938_v20 = vpack.c.bf16 %v3546_v17, %v3545_v16  ;;  %v98_v21 = vld [vmem:[%s5401_s0 + $0x34] sm:$0xff] }
  0x2d   :  { %v83_v22 = vld [vmem:[%s5401_s0] sm:$0xff]  ;;  %v3547_v23 = vld [vmem:[%s5402_s1 + $0x50] sm:$0xff]  ;;  %v3548_v24 = vld [vmem:[%s5402_s1 + $0x58] sm:$0xf] }
  0x2e   :  { %v84_v25 = vld [vmem:[%s5401_s0 + $0x8] sm:$0xff]  ;;  %v85_v26 = vld [vmem:[%s5401_s0 + $0x10] sm:$0xff]  ;;  %v3942_v27 = vpack.c.bf16 %v3548_v24, %v3547_v23  ;;  %v3556_v28 = vld [vmem:[%s5402_s1 + $0x60] sm:$0xff] }
  0x2f   :  { %3927 = vmatpush3.bf16.msk.msra.mxu0 %vm4853_vm3, %v3922_v6  ;;  %v3557_v29 = vld [vmem:[%s5402_s1 + $0x68] sm:$0xff]  ;;  %v86_v30 = vld [vmem:[%s5401_s0 + $0x18] sm:$0xff]  ;;  %v87_v31 = vld [vmem:[%s5401_s0 + $0x20] sm:$0xff] }
  0x30   :  { %3929 = vmatprep.subr.bf16.mxu0 %v3928_v10  ;;  %v3948_v32 = vpack.c.bf16 %v3557_v29, %v3556_v28  ;;  %v88_v33 = vld [vmem:[%s5401_s0 + $0x28] sm:$0xff]  ;;  %v3558_v34 = vld [vmem:[%s5402_s1 + $0x70] sm:$0xff]  ;;  %v3559_v35 = vld [vmem:[%s5402_s1 + $0x78] sm:$0xf] }
  0x31   :  { %v3952_v36 = vpack.c.bf16 %v3559_v35, %v3558_v34  ;;  %v3567_v37 = vld [vmem:[%s5402_s1 + $0x80] sm:$0xff]  ;;  %v3568_v38 = vld [vmem:[%s5402_s1 + $0x88] sm:$0xff]  ;;  %v341_v39 = vld [vmem:[%s5401_s0 + $0x30] sm:$0xff] }
  0x32   :  { %3767 = vmatmul.mubr.msk.f32.vlgmr.msra.gmra.mrb[0].mxu0 %vm104_vm1, %v94_v13  ;;  %v342_v40 = vld [vmem:[%s5401_s0 + $0x38] sm:$0xff]  ;;  %v3958_v41 = vpack.c.bf16 %v3568_v38, %v3567_v37  ;;  %v343_v42 = vld [vmem:[%s5401_s0 + $0x40] sm:$0xff]  ;;  %v3569_v43 = vld [vmem:[%s5402_s1 + $0x90] sm:$0xff] }
  0x33   :  { %3931 = vmatpush3.bf16.msra.mxu0 %v3928_v10  ;;  %3769 = vmatprep.mubr.msk.f32.mxu0 %vm104_vm1, %v95_v14  ;;  %v3570_v44 = vld [vmem:[%s5402_s1 + $0x98] sm:$0xf]  ;;  %v474_v46 = vld [vmem:[%s5401_s0 + $0x3c] sm:$0xff]  ;;  %v475_v47 = vld [vmem:[%s5401_s0 + $0x44] sm:$0xff] }
  0x34   :  { %3934 = vmatprep.subr.msk.bf16.mxu0 %vm4853_vm3, %v3932_v15  ;;  %v3962_v45 = vpack.c.bf16 %v3570_v44, %v3569_v43  ;;  %v476_v48 = vld [vmem:[%s5401_s0 + $0x4c] sm:$0xff]  ;;  %v609_v51 = vld [vmem:[%s5401_s0 + $0x58] sm:$0xff]  ;;  %v3578_v52 = vld [vmem:[%s5403_s2] ss:$0 sm:$0xff] }
  0x35   :  { %v607_v49 = vld [vmem:[%s5401_s0 + $0x48] sm:$0xff]  ;;  %v608_v50 = vld [vmem:[%s5401_s0 + $0x50] sm:$0xff]  ;;  %v3581_v54 = vld [vmem:[%s5405_s4 + $0x38] sm:$0xff] }
  0x36   :  { %3770 = vmatmul.mubr.msk.f32.gmra.mrb[2].mxu0 %vm104_vm1, %v96_v18  ;;  %v3580_v53 = vld [vmem:[%s5405_s4 + $0x30] sm:$0xff]  ;;  %v3579_v59 = vld [vmem:[%s5404_s3] ss:$0 sm:$0xff]  ;;  %v3583_v62 = vld [vmem:[%s5405_s4 + $0x48] sm:$0xff] }
  0x37   :  { %3772 = vmatprep.mubr.msk.f32.mxu0 %vm104_vm1, %v97_v19  ;;  %3937 = vmatpush3.bf16.msk.msra.mxu0 %vm4853_vm3, %v3932_v15  ;;  %v3968_v56 = vpack.c.bf16 %v3581_v54, %v3580_v53  ;;  %v3582_v61 = vld [vmem:[%s5405_s4 + $0x40] sm:$0xff]  ;;  %v3584_v5 = vld [vmem:[%s5405_s4 + $0x50] sm:$0xff]  ;;  %v3585_v6 = vld [vmem:[%s5405_s4 + $0x58] sm:$0xff] }
  0x38   :  { %3939 = vmatprep.subr.bf16.mxu0 %v3938_v20  ;;  %v3972_v0 = vpack.c.bf16 %v3583_v62, %v3582_v61  ;;  %v3976_v9 = vpack.c.bf16 %v3585_v6, %v3584_v5  ;;  %v832_v16 = vld [vmem:[%s5405_s4] sm:$0xff]  ;;  %v833_v17 = vld [vmem:[%s5405_s4 + $0x8] sm:$0xff] }
  0x39   :  { %3969 = vmatprep.subr.bf16.mxu1 %v3968_v56  ;;  %v836_v53 = vld [vmem:[%s5405_s4 + $0x20] sm:$0xff]  ;;  %v837_v54 = vld [vmem:[%s5405_s4 + $0x28] sm:$0xff] }
  0x3a   :  { %3773 = vmatmul.mubr.msk.f32.gmra.mrb[4].mxu0 %vm104_vm1, %v98_v21  ;;  %3971 = vmatpush3.bf16.msra.mxu1 %v3968_v56  ;;  %v3590_v56 = vld [vmem:[%s5405_s4 + $0x60] sm:$0xff] }
  0x3b   :  { %3783 = vmatprep.mubr.msk.f32.mxu0 %vm104_vm1, %v83_v22  ;;  %3973 = vmatprep.subr.bf16.mxu1 %v3972_v0  ;;  %v3594_v62 = vld [vmem:[%s5405_s4 + $0x80] sm:$0xff] }
  0x3c   :  { %v3600_v6 = vld [vmem:[%s5405_s4 + $0xa0] sm:$0xff] }
  0x3e   :  { %3784 = vmatmul.mubr.msk.f32.vlgmr.msra.gmra.mrb[0].mxu0 %vm104_vm1, %v84_v25  ;;  %3975 = vmatpush3.bf16.msra.mxu1 %v3972_v0 }
  0x3f   :  { %3941 = vmatpush3.bf16.msra.mxu0 %v3938_v20  ;;  %3786 = vmatprep.mubr.msk.f32.mxu0 %vm104_vm1, %v85_v26 }
  0x40   :  { %3944 = vmatprep.subr.msk.bf16.mxu0 %vm4853_vm3, %v3942_v27  ;;  %3977 = vmatprep.subr.bf16.mxu1 %v3976_v9 }
  0x42   :  { %3787 = vmatmul.mubr.msk.f32.gmra.mrb[2].mxu0 %vm104_vm1, %v86_v30  ;;  %3979 = vmatpush3.bf16.msra.mxu1 %v3976_v9 }
  0x43   :  { %3789 = vmatprep.mubr.msk.f32.mxu0 %vm104_vm1, %v87_v31  ;;  %3947 = vmatpush3.bf16.msk.msra.mxu0 %vm4853_vm3, %v3942_v27 }
  0x44   :  { %3949 = vmatprep.subr.bf16.mxu0 %v3948_v32 }
  0x46   :  { %3790 = vmatmul.mubr.msk.f32.gmra.mrb[4].mxu0 %vm104_vm1, %v88_v33 }
  0x47   :  { %3800 = vmatprep.mubr.msk.f32.mxu0 %vm104_vm1, %v86_v30 }
  0x4a   :  { %3801 = vmatmul.mubr.msk.f32.vlgmr.msra.gmra.mrb[0].mxu0 %vm104_vm1, %v87_v31 }
  0x4b   :  { %3951 = vmatpush3.bf16.msra.mxu0 %v3948_v32  ;;  %3803 = vmatprep.mubr.msk.f32.mxu0 %vm104_vm1, %v88_v33 }
  0x4c   :  { %3954 = vmatprep.subr.msk.bf16.mxu0 %vm4853_vm3, %v3952_v36 }
  0x4e   :  { %3804 = vmatmul.mubr.msk.f32.gmra.mrb[2].mxu0 %vm104_vm1, %v341_v39 }
  0x4f   :  { %3806 = vmatprep.mubr.msk.f32.mxu0 %vm104_vm1, %v342_v40  ;;  %3957 = vmatpush3.bf16.msk.msra.mxu0 %vm4853_vm3, %v3952_v36 }
  0x50   :  { %3959 = vmatprep.subr.bf16.mxu0 %v3958_v41 }
  0x52   :  { %3807 = vmatmul.mubr.msk.f32.gmra.mrb[4].mxu0 %vm104_vm1, %v343_v42 }
  0x53   :  { %3817 = vmatprep.mubr.msk.f32.mxu0 %vm104_vm1, %v96_v18  ;;  %v3980_v18 = vpack.c.bf16 %v833_v17, %v832_v16 }
  0x55   :  { %3981 = vmatprep.subr.bf16.mxu1 %v3980_v18 }
  0x56   :  { %3818 = vmatmul.mubr.msk.f32.vlgmr.msra.gmra.mrb[0].mxu0 %vm104_vm1, %v97_v19 }
  0x57   :  { %3961 = vmatpush3.bf16.msra.mxu0 %v3958_v41  ;;  %3820 = vmatprep.mubr.msk.f32.mxu0 %vm104_vm1, %v98_v21 }
  0x58   :  { %3964 = vmatprep.subr.msk.bf16.mxu0 %vm4853_vm3, %v3962_v45 }
  0x5a   :  { %3821 = vmatmul.mubr.msk.f32.gmra.mrb[2].mxu0 %vm104_vm1, %v474_v46 }
  0x5b   :  { %3823 = vmatprep.mubr.msk.f32.mxu0 %vm104_vm1, %v475_v47  ;;  %3967 = vmatpush3.bf16.msk.msra.mxu0 %vm4853_vm3, %v3962_v45  ;;  %v834_v47 = vld [vmem:[%s5405_s4 + $0x10] sm:$0xff] }
  0x5e   :  { %3824 = vmatmul.mubr.msk.f32.gmra.mrb[4].mxu0 %vm104_vm1, %v476_v48  ;;  %v835_v48 = vld [vmem:[%s5405_s4 + $0x18] sm:$0xff] }
  0x5f   :  { %3834 = vmatprep.mubr.msk.f32.mxu0 %vm104_vm1, %v341_v39 }
  0x62   :  { %3835 = vmatmul.mubr.msk.f32.vlgmr.msra.gmra.mrb[0].mxu0 %vm104_vm1, %v342_v40 }
  0x63   :  { %3837 = vmatprep.mubr.msk.f32.mxu0 %vm104_vm1, %v343_v42 }
  0x66   :  { %3838 = vmatmul.mubr.msk.f32.gmra.mrb[2].mxu0 %vm104_vm1, %v607_v49 }
  0x67   :  { %3840 = vmatprep.mubr.msk.f32.mxu0 %vm104_vm1, %v608_v50 }
  0x6a   :  { %3841 = vmatmul.mubr.msk.f32.gmra.mrb[4].mxu0 %vm104_vm1, %v609_v51  ;;  %v3984_v51 = vpack.c.bf16 %v835_v48, %v834_v47  ;;  %v1370_v47 = vld [vmem:[#allocation2 + $0x280] sm:$0xff] }
  0x6b   :  { %v1378_v48 = vld [vmem:[#allocation2 + $0x2c0] sm:$0xff] }
 0x135   :  { %v3836_v55 = vpop.f32.mrb[0].mxu0 }
 0x136   :  { %v744_v57 = vadd.f32 %v3836_v55, %v3578_v52  ;;  %v702_v58 = vpop.f32.mrb[1].mxu0  ;;  %v3988_v55 = vpack.c.bf16 %v837_v54, %v836_v53  ;;  %v1395_v53 = vld [vmem:[#allocation2 + $0x348] sm:$0xff] }
 0x137   :  { %v743_v3 = vadd.f32 %v3578_v52, %v702_v58 }
 0x138   :  { %v750_v60 = vmax.f32 %v744_v57, 0.0  ;;  %v3591_v57 = vld [vmem:[%s5405_s4 + $0x68] sm:$0xff] }
 0x139   :  { %v3839_v63 = vpop.f32.mrb[2].mxu0  ;;  %v749_v12 = vmax.f32 %v743_v3, 0.0  ;;  %v3992_v58 = vpack.c.bf16 %v3591_v57, %v3590_v56  ;;  %v1393_v56 = vld [vmem:[#allocation2 + $0x338] sm:$0xff] }
 0x13a   :  { %v712_v1 = vpop.f32.mrb[3].mxu0  ;;  %v762_v2 = vadd.f32 %v3579_v59, %v750_v60  ;;  %v746_v19 = vadd.f32 %v3839_v63, %v3578_v52  ;;  %v3593_v60 = vld [vmem:[%s5405_s4 + $0x78] sm:$0xff]  ;;  %v3595_v63 = vld [vmem:[%s5405_s4 + $0x88] sm:$0xff] }
 0x13b   :  { %v745_v4 = vadd.f32 %v3578_v52, %v712_v1  ;;  %v761_v22 = vadd.f32 %v3579_v59, %v749_v12  ;;  %v4000_v0 = vpack.c.bf16 %v3595_v63, %v3594_v62  ;;  %v3598_v1 = vld [vmem:[%s5405_s4 + $0x90] sm:$0xff]  ;;  %v3603_v12 = vld [vmem:[%s5405_s4 + $0xb8] sm:$0xff] }
 0x13c   :  { %775 = vrot.lane.b32.xlu0 %v762_v2, %s4729_s26  ;;  %v752_v23 = vmax.f32 %v746_v19, 0.0  ;;  %v3609_v19 = vld [vmem:[%s5405_s4 + $0xd8] sm:$0xff]  ;;  %v1400_v62 = vld [vmem:[#allocation2 + $0x370] sm:$0xff] }
 0x13d   :  { %v751_v7 = vmax.f32 %v745_v4, 0.0  ;;  %v3842_v8 = vpop.f32.mrb[4].mxu0  ;;  %v1401_v57 = vld [vmem:[#allocation2 + $0x378] sm:$0xff] }
 0x13e   :  { %v748_v10 = vadd.f32 %v3842_v8, %v3578_v52  ;;  %v722_v11 = vpop.f32.mrb[5].mxu0  ;;  %v764_v25 = vadd.f32 %v3579_v59, %v752_v23  ;;  %v3610_v23 = vld [vmem:[%s5405_s4 + $0xe0] sm:$0xff] }
 0x13f   :  { %v763_v13 = vadd.f32 %v3579_v59, %v751_v7  ;;  %v747_v14 = vadd.f32 %v3578_v52, %v722_v11  ;;  %v3601_v7 = vld [vmem:[%s5405_s4 + $0xa8] sm:$0xff]  ;;  %v3602_v11 = vld [vmem:[%s5405_s4 + $0xb0] sm:$0xff] }
 0x140   :  { %v754_v15 = vmax.f32 %v748_v10, 0.0  ;;  %v4008_v9 = vpack.c.bf16 %v3601_v7, %v3600_v6  ;;  %v1402_v6 = vld [vmem:[#allocation2 + $0x380] sm:$0xff] }
 0x141   :  { %777 = vrot.lane.b32.xlu0 %v763_v13, %s4729_s26  ;;  %v753_v20 = vmax.f32 %v747_v14, 0.0  ;;  %v3606_v14 = vld [vmem:[%s5405_s4 + $0xc0] sm:$0xff] }
 0x142   :  { %v766_v21 = vadd.f32 %v3579_v59, %v754_v15  ;;  %v3607_v15 = vld [vmem:[%s5405_s4 + $0xc8] sm:$0xff]  ;;  %v1410_v7 = vld [vmem:[#allocation2 + $0x3c0] sm:$0xff] }
 0x143   :  { %v765_v24 = vadd.f32 %v3579_v59, %v753_v20  ;;  %v3592_v59 = vld [vmem:[%s5405_s4 + $0x70] sm:$0xff]  ;;  %v4016_v16 = vpack.c.bf16 %v3607_v15, %v3606_v14  ;;  %v1365_v14 = vld [vmem:[#allocation2 + $0x258] sm:$0xff] }
 0x144   :  { %783 = vrot.lane.b32.xlu1 %v766_v21, %s4729_s26  ;;  %v3996_v61 = vpack.c.bf16 %v3593_v60, %v3592_v59  ;;  %v4084_v59 = vpack.c.bf16 %v1401_v57, %v1393_v56  ;;  %v1394_v60 = vld [vmem:[#allocation2 + $0x340] sm:$0xff]  ;;  %v1292_v15 = vld [vmem:[#allocation2 + $0x18] sm:$0xff] }
 0x145   :  { %773 = vrot.lane.b32.xlu0 %v761_v22, %s4729_s26 }
 0x148   :  { %781 = vrot.lane.b32.xlu1 %v765_v24, %s4729_s26 }
 0x14c   :  { %779 = vrot.lane.b32.xlu1 %v764_v25, %s4729_s26 }
 0x1ae   :  { %v776_v26 = vpop.permute.xlu0 %775 }
 0x1af   :  { %v792_v27 = vmax.f32 %v762_v2, %v776_v26  ;;  %v3599_v2 = vld [vmem:[%s5405_s4 + $0x98] sm:$0xff] }
 0x1b0   :  { %v4004_v4 = vpack.c.bf16 %v3599_v2, %v3598_v1  ;;  %v1403_v1 = vld [vmem:[#allocation2 + $0x388] sm:$0xff] }
 0x1b1   :  { %v799_v30 = vrot.slane %v792_v27, 4  ;;  %v1411_v2 = vld [vmem:[#allocation2 + $0x3c8] sm:$0xff] }
 0x1b3   :  { %v778_v28 = vpop.permute.xlu0 %777 }
 0x1b4   :  { %v793_v29 = vmax.f32 %v763_v13, %v778_v28  ;;  %v4012_v13 = vpack.c.bf16 %v3603_v12, %v3602_v11  ;;  %v1416_v11 = vld [vmem:[#allocation2 + $0x3f0] sm:$0xff] }
 0x1b6   :  { %v800_v31 = vrot.slane %v793_v29, 4  ;;  %v784_v32 = vpop.permute.xlu1 %783  ;;  %v1355_v29 = vld [vmem:[#allocation2 + $0x208] sm:$0xff] }
 0x1b7   :  { %v774_v33 = vpop.permute.xlu0 %773  ;;  %v796_v36 = vmax.f32 %v766_v21, %v784_v32 }
 0x1b8   :  { %v801_v34 = vsel %vm123_vm0, %v799_v30, %v800_v31  ;;  %v791_v35 = vmax.f32 %v761_v22, %v774_v33  ;;  %v5054_v40 = vmax.f32 %v792_v27, %v800_v31  ;;  %v1363_v30 = vld [vmem:[#allocation2 + $0x248] sm:$0xff]  ;;  %v1361_v31 = vld [vmem:[#allocation2 + $0x238] sm:$0xff] }
 0x1b9   :  { %v809_v41 = vrot.slane %v796_v36, 4  ;;  %v4028_v32 = vpack.c.bf16 %v1363_v30, %v1355_v29  ;;  %v1369_v33 = vld [vmem:[#allocation2 + $0x278] sm:$0xff] }
 0x1ba   :  { %v782_v37 = vpop.permute.xlu1 %781  ;;  %v5052_v38 = vmax.f32 %v791_v35, %v801_v34  ;;  %v819_v49 = vrot.slane %v5054_v40, 2  ;;  %v827_v20 = vrot.slane %v5054_v40, 4  ;;  %v1354_v34 = vld [vmem:[#allocation2 + $0x200] sm:$0xff]  ;;  %v4076_v36 = vpack.c.bf16 %v1369_v33, %v1361_v31  ;;  %v1371_v40 = vld [vmem:[#allocation2 + $0x288] sm:$0xff]  ;;  %v1356_v33 = vld [vmem:[#allocation2 + $0x210] sm:$0xff] }
 0x1bb   :  { %v795_v39 = vmax.f32 %v765_v24, %v782_v37  ;;  %v3611_v24 = vld [vmem:[%s5405_s4 + $0xe8] sm:$0xff]  ;;  %v1362_v35 = vld [vmem:[#allocation2 + $0x240] sm:$0xff]  ;;  %4029 = vmatprep.subr.bf16.mxu0 %v4028_v32 }
 0x1bc   :  { %v818_v44 = vrot.slane %v5052_v38, 2  ;;  %v826_v17 = vrot.slane %v5052_v38, 4  ;;  %v4030_v37 = vpack.c.bf16 %v1362_v35, %v1354_v34  ;;  %v1364_v34 = vld [vmem:[#allocation2 + $0x250] sm:$0xff] }
 0x1bd   :  { %v808_v42 = vrot.slane %v795_v39, 4  ;;  %v814_v3 = vmax.f32 %v795_v39, %v809_v41  ;;  %v1368_v39 = vld [vmem:[#allocation2 + $0x270] sm:$0xff] }
 0x1be   :  { %v780_v43 = vpop.permute.xlu1 %779  ;;  %v820_v52 = vsel %vm817_vm5, %v818_v44, %v819_v49  ;;  %v828_v22 = vsel %vm123_vm0, %v826_v17, %v827_v20  ;;  %v1385_v44 = vld [vmem:[#allocation2 + $0x2f8] sm:$0xff]  ;;  %4031 = vmatpush1.bf16.msra.mxu0 %v4030_v37  ;;  %v1376_v49 = vld [vmem:[#allocation2 + $0x2b0] sm:$0xff]  ;;  %v4730_v17 = vmov 0.0  }
 0x1bf   :  { %v810_v45 = vsel %vm123_vm0, %v808_v42, %v809_v41  ;;  %v794_v46 = vmax.f32 %v764_v25, %v780_v43  ;;  %v824_v8 = vrot.slane %v814_v3, 2  ;;  %v4024_v25 = vpack.c.bf16 %v3611_v24, %v3610_v23  ;;  %v1379_v42 = vld [vmem:[#allocation2 + $0x2c8] sm:$0xff]  ;;  %v1377_v43 = vld [vmem:[#allocation2 + $0x2b8] sm:$0xff]  ;;  %1487 = vmatprep.mubr.f32.mxu0 %v4730_v17  ;;  %v1299_v37 = vld [vmem:[#allocation2 + $0x50] sm:$0xff] }
 0x1c0   :  { %v830_v27 = vrot.slane %v814_v3, 4  ;;  %v1409_v3 = vld [vmem:[#allocation2 + $0x3b8] sm:$0xff] }
 0x1c1   :  { %v5065_v50 = vmax.f32 %v794_v46, %v810_v45  ;;  %v4032_v45 = vpack.c.bf16 %v1379_v42, %v1371_v40  ;;  %v4080_v46 = vpack.c.bf16 %v1385_v44, %v1377_v43  ;;  %v1308_v40 = vld [vmem:[#allocation2 + $0x98] sm:$0xff]  ;;  %v4046_v43 = vpack.c.bf16 %v1364_v34, %v1356_v33 }
 0x1c3   :  { %3855 = vmatprep.mubr.msk.f32.mxu1 %vm845_vm4, %v5065_v50  ;;  %v823_v5 = vrot.slane %v5065_v50, 2  ;;  %v829_v26 = vrot.slane %v5065_v50, 4  ;;  %4033 = vmatprep.subr.bf16.mxu0 %v4032_v45  ;;  %v1372_v45 = vld [vmem:[#allocation2 + $0x290] sm:$0xff] }
 0x1c4   :  { %3856 = vmatmul.mubr.msk.f32.vlgmr.msra.gmra.mrb[0].mxu1 %vm845_vm4, %v820_v52 }
 0x1c5   :  { %3983 = vmatpush3.bf16.msra.mxu1 %v3980_v18  ;;  %3870 = vmatprep.mubr.msk.f32.mxu1 %vm845_vm4, %v5052_v38  ;;  %v825_v10 = vsel %vm817_vm5, %v823_v5, %v824_v8  ;;  %v3608_v18 = vld [vmem:[%s5405_s4 + $0xd0] sm:$0xff]  ;;  %v831_v28 = vsel %vm123_vm0, %v829_v26, %v830_v27  ;;  %v1417_v5 = vld [vmem:[#allocation2 + $0x3f8] sm:$0xff] }
 0x1c6   :  { %3985 = vmatprep.subr.bf16.mxu1 %v3984_v51  ;;  %v4020_v21 = vpack.c.bf16 %v3609_v19, %v3608_v18  ;;  %v1360_v38 = vld [vmem:[#allocation2 + $0x230] sm:$0xff]  ;;  %v4088_v8 = vpack.c.bf16 %v1417_v5, %v1409_v3  ;;  %v1300_v19 = vld [vmem:[#allocation2 + $0x58] sm:$0xff] }
 0x1c7   :  { %v4078_v41 = vpack.c.bf16 %v1368_v39, %v1360_v38  ;;  %v4108_v20 = vpack.c.bf16 %v1300_v19, %v1292_v15  ;;  %v1373_v38 = vld [vmem:[#allocation2 + $0x298] sm:$0xff]  ;;  %v1358_v19 = vld [vmem:[#allocation2 + $0x220] sm:$0xff] }
 0x1c8   :  { %v1381_v39 = vld [vmem:[#allocation2 + $0x2d8] sm:$0xff] }
 0x1c9   :  { %3987 = vmatpush3.bf16.msra.mxu1 %v3984_v51  ;;  %v1384_v51 = vld [vmem:[#allocation2 + $0x2f0] sm:$0xff]  ;;  %v1348_v3 = vld [vmem:[#allocation2 + $0x1d8] sm:$0xff] }
 0x1ca   :  { %3989 = vmatprep.subr.bf16.mxu1 %v3988_v55  ;;  %v4082_v54 = vpack.c.bf16 %v1384_v51, %v1376_v49  ;;  %v1315_v51 = vld [vmem:[#allocation2 + $0xd0] sm:$0xff]  ;;  %v1304_v15 = vld [vmem:[#allocation2 + $0x78] sm:$0xff] }
 0x1cd   :  { %3991 = vmatpush3.bf16.msra.mxu1 %v3988_v55 }
 0x1ce   :  { %3993 = vmatprep.subr.bf16.mxu1 %v3992_v58 }
 0x1d0   :  { %3871 = vmatmul.mubr.msk.f32.vlgmr.msra.gmra.mrb[0].mxu1 %vm845_vm4, %v5065_v50  ;;  %v4034_v50 = vpack.c.bf16 %v1378_v48, %v1370_v47  ;;  %v4048_v48 = vpack.c.bf16 %v1381_v39, %v1373_v38  ;;  %v1399_v38 = vld [vmem:[#allocation2 + $0x368] sm:$0xff]  ;;  %v1328_v39 = vld [vmem:[#allocation2 + $0x138] sm:$0xff] }
 0x1d1   :  { %3995 = vmatpush3.bf16.msra.mxu1 %v3992_v58  ;;  %3885 = vmatprep.mubr.msk.f32.mxu1 %vm845_vm4, %v820_v52  ;;  %v1387_v52 = vld [vmem:[#allocation2 + $0x308] sm:$0xff]  ;;  %v1386_v58 = vld [vmem:[#allocation2 + $0x300] sm:$0xff] }
 0x1d2   :  { %3997 = vmatprep.subr.bf16.mxu1 %v3996_v61  ;;  %v4036_v55 = vpack.c.bf16 %v1395_v53, %v1387_v52  ;;  %4035 = vmatpush1.bf16.msra.mxu0 %v4034_v50  ;;  %v4038_v63 = vpack.c.bf16 %v1394_v60, %v1386_v58  ;;  %v1307_v50 = vld [vmem:[#allocation2 + $0x90] sm:$0xff]  ;;  %v1389_v52 = vld [vmem:[#allocation2 + $0x318] sm:$0xff] }
 0x1d3   :  { %v1397_v53 = vld [vmem:[#allocation2 + $0x358] sm:$0xff]  ;;  %v4114_v57 = vpack.c.bf16 %v1315_v51, %v1307_v50  ;;  %v1388_v58 = vld [vmem:[#allocation2 + $0x310] sm:$0xff]  ;;  %v1407_v51 = vld [vmem:[#allocation2 + $0x3a8] sm:$0xff] }
 0x1d4   :  { %4037 = vmatprep.subr.bf16.mxu0 %v4036_v55  ;;  %v1332_v55 = vld [vmem:[#allocation2 + $0x158] sm:$0xff]  ;;  %v4052_v60 = vpack.c.bf16 %v1397_v53, %v1389_v52  ;;  %v1335_v50 = vld [vmem:[#allocation2 + $0x170] sm:$0xff]  ;;  %v1415_v52 = vld [vmem:[#allocation2 + $0x3e8] sm:$0xff] }
 0x1d5   :  { %3999 = vmatpush3.bf16.msra.mxu1 %v3996_v61  ;;  %v1392_v61 = vld [vmem:[#allocation2 + $0x330] sm:$0xff]  ;;  %v1344_v53 = vld [vmem:[#allocation2 + $0x1b8] sm:$0xff] }
 0x1d6   :  { %4001 = vmatprep.subr.bf16.mxu1 %v4000_v0  ;;  %4039 = vmatpush1.bf16.msra.mxu0 %v4038_v63  ;;  %v1331_v63 = vld [vmem:[#allocation2 + $0x150] sm:$0xff] }
 0x1d9   :  { %4003 = vmatpush3.bf16.msra.mxu1 %v4000_v0  ;;  %v4086_v0 = vpack.c.bf16 %v1400_v62, %v1392_v61  ;;  %v1323_v62 = vld [vmem:[#allocation2 + $0x110] sm:$0xff] }
 0x1da   :  { %4005 = vmatprep.subr.bf16.mxu1 %v4004_v4  ;;  %v4118_v5 = vpack.c.bf16 %v1331_v63, %v1323_v62  ;;  %v1351_v62 = vld [vmem:[#allocation2 + $0x1f0] sm:$0xff]  ;;  %v1290_v63 = vld [vmem:[#allocation2 + $0x8] sm:$0xff] }
 0x1dc   :  { %3886 = vmatmul.mubr.msk.f32.vlgmr.msra.gmra.mrb[0].mxu1 %vm845_vm4, %v825_v10 }
 0x1dd   :  { %4007 = vmatpush3.bf16.msra.mxu1 %v4004_v4  ;;  %3900 = vmatprep.mubr.msk.f32.mxu1 %vm845_vm4, %v825_v10  ;;  %v4040_v4 = vpack.c.bf16 %v1411_v2, %v1403_v1  ;;  %v1408_v10 = vld [vmem:[#allocation2 + $0x3b0] sm:$0xff]  ;;  %v1413_v1 = vld [vmem:[#allocation2 + $0x3d8] sm:$0xff] }
 0x1de   :  { %4009 = vmatprep.subr.bf16.mxu1 %v4008_v9  ;;  %v4090_v12 = vpack.c.bf16 %v1416_v11, %v1408_v10  ;;  %v1340_v2 = vld [vmem:[#allocation2 + $0x198] sm:$0xff]  ;;  %v1339_v10 = vld [vmem:[#allocation2 + $0x190] sm:$0xff] }
 0x1df   :  { %4041 = vmatprep.subr.bf16.mxu0 %v4040_v4  ;;  %v1347_v11 = vld [vmem:[#allocation2 + $0x1d0] sm:$0xff] }
 0x1e1   :  { %4011 = vmatpush3.bf16.msra.mxu1 %v4008_v9  ;;  %v4042_v9 = vpack.c.bf16 %v1410_v7, %v1402_v6  ;;  %v1404_v6 = vld [vmem:[#allocation2 + $0x390] sm:$0xff] }
 0x1e2   :  { %4013 = vmatprep.subr.bf16.mxu1 %v4012_v13  ;;  %v1412_v7 = vld [vmem:[#allocation2 + $0x3d0] sm:$0xff] }
 0x1e3   :  { %4043 = vmatpush1.bf16.msra.mxu0 %v4042_v9  ;;  %v4120_v9 = vpack.c.bf16 %v1348_v3, %v1340_v2  ;;  %v2005_v2 = vld [vmem:[#allocation2 + $0x458] sm:$0xff] }
 0x1e5   :  { %4015 = vmatpush3.bf16.msra.mxu1 %v4012_v13  ;;  %v1357_v13 = vld [vmem:[#allocation2 + $0x218] sm:$0xff] }
 0x1e6   :  { %4017 = vmatprep.subr.bf16.mxu1 %v4016_v16  ;;  %v4044_v18 = vpack.c.bf16 %v1365_v14, %v1357_v13  ;;  %v1367_v13 = vld [vmem:[#allocation2 + $0x268] sm:$0xff]  ;;  %v1296_v14 = vld [vmem:[#allocation2 + $0x38] sm:$0xff] }
 0x1e8   :  { %3901 = vmatmul.mubr.msk.f32.vlgmr.msra.gmra.mrb[0].mxu1 %vm845_vm4, %v828_v22  ;;  %4045 = vmatprep.subr.bf16.mxu0 %v4044_v18  ;;  %v4122_v18 = vpack.c.bf16 %v1347_v11, %v1339_v10  ;;  %v2004_v10 = vld [vmem:[#allocation2 + $0x450] sm:$0xff]  ;;  %v1306_v11 = vld [vmem:[#allocation2 + $0x88] sm:$0xff] }
 0x1e9   :  { %4019 = vmatpush3.bf16.msra.mxu1 %v4016_v16  ;;  %3915 = vmatprep.mubr.msk.f32.mxu1 %vm845_vm4, %v828_v22  ;;  %v3614_v16 = vld [vmem:[%s5406_s5] ss:$0 sm:$0xff] }
 0x1ea   :  { %4021 = vmatprep.subr.bf16.mxu1 %v4020_v21 }
 0x1ed   :  { %4023 = vmatpush3.bf16.msra.mxu1 %v4020_v21 }
 0x1ee   :  { %4025 = vmatprep.subr.bf16.mxu1 %v4024_v25 }
 0x1f1   :  { %4027 = vmatpush3.bf16.msra.mxu1 %v4024_v25  ;;  %v3615_v25 = vld [vmem:[%s5407_s6] ss:$0 sm:$0xff] }
 0x1f2   :  { %4077 = vmatprep.subr.bf16.mxu1 %v4076_v36  ;;  %v1291_v36 = vld [vmem:[#allocation2 + $0x10] sm:$0xff] }
 0x1f3   :  { %v4110_v44 = vpack.c.bf16 %v1299_v37, %v1291_v36  ;;  %v1319_v36 = vld [vmem:[#allocation2 + $0xf0] sm:$0xff]  ;;  %v1391_v37 = vld [vmem:[#allocation2 + $0x328] sm:$0xff] }
 0x1f4   :  { %3916 = vmatmul.mubr.msk.f32.vlgmr.msra.gmra.mrb[0].mxu1 %vm845_vm4, %v831_v28 }
 0x1f5   :  { %4079 = vmatpush1.bf16.msra.mxu1 %v4078_v41  ;;  %1700 = vmatprep.mubr.f32.mxu1 %v4730_v17  ;;  %v1316_v41 = vld [vmem:[#allocation2 + $0xd8] sm:$0xff] }
 0x1f6   :  { %4081 = vmatprep.subr.bf16.mxu1 %v4080_v46  ;;  %v1380_v46 = vld [vmem:[#allocation2 + $0x2d0] sm:$0xff]  ;;  %v4112_v49 = vpack.c.bf16 %v1316_v41, %v1308_v40  ;;  %v1336_v40 = vld [vmem:[#allocation2 + $0x178] sm:$0xff] }
 0x1f7   :  { %v4050_v56 = vpack.c.bf16 %v1380_v46, %v1372_v45  ;;  %v1398_v45 = vld [vmem:[#allocation2 + $0x360] sm:$0xff]  ;;  %v4068_v46 = vpack.c.bf16 %v1399_v38, %v1391_v37  ;;  %v1346_v37 = vld [vmem:[#allocation2 + $0x1c8] sm:$0xff]  ;;  %v2045_v38 = vld [vmem:[#allocation2 + $0x598] sm:$0xff] }
 0x1f9   :  { %4083 = vmatpush1.bf16.msra.mxu1 %v4082_v54  ;;  %v1324_v54 = vld [vmem:[#allocation2 + $0x118] sm:$0xff] }
 0x1fa   :  { %4085 = vmatprep.subr.bf16.mxu1 %v4084_v59  ;;  %v1396_v59 = vld [vmem:[#allocation2 + $0x350] sm:$0xff]  ;;  %v4116_v61 = vpack.c.bf16 %v1332_v55, %v1324_v54  ;;  %v1352_v54 = vld [vmem:[#allocation2 + $0x1f8] sm:$0xff] }
 0x1fb   :  { %v4054_v4 = vpack.c.bf16 %v1396_v59, %v1388_v58  ;;  %v1414_v58 = vld [vmem:[#allocation2 + $0x3e0] sm:$0xff]  ;;  %v4072_v59 = vpack.c.bf16 %v1415_v52, %v1407_v51  ;;  %v2001_v51 = vld [vmem:[#allocation2 + $0x438] sm:$0xff] }
 0x1fc   :  { %v2009_v52 = vld [vmem:[#allocation2 + $0x478] sm:$0xff] }
 0x1fd   :  { %4087 = vmatpush1.bf16.msra.mxu1 %v4086_v0  ;;  %v1405_v0 = vld [vmem:[#allocation2 + $0x398] sm:$0xff] }
 0x1fe   :  { %4089 = vmatprep.subr.bf16.mxu1 %v4088_v8  ;;  %v4056_v8 = vpack.c.bf16 %v1413_v1, %v1405_v0  ;;  %v1298_v0 = vld [vmem:[#allocation2 + $0x48] sm:$0xff]  ;;  %v1997_v1 = vld [vmem:[#allocation2 + $0x418] sm:$0xff] }
 0x201   :  { %4091 = vmatpush1.bf16.msra.mxu1 %v4090_v12  ;;  %v1359_v12 = vld [vmem:[#allocation2 + $0x228] sm:$0xff] }
 0x202   :  { %4109 = vmatprep.subr.bf16.mxu1 %v4108_v20  ;;  %v1366_v20 = vld [vmem:[#allocation2 + $0x260] sm:$0xff] }
 0x2c7   :  { %v3917_v21 = vpop.f32.mrb[0].mxu1 }
 0x2c8   :  { %v1267_v22 = vadd.f32 %v3917_v21, %v3614_v16  ;;  %v1249_v23 = vpop.f32.mrb[1].mxu1  ;;  %v4060_v21 = vpack.c.bf16 %v1367_v13, %v1359_v12  ;;  %v1314_v12 = vld [vmem:[#allocation2 + $0xc8] sm:$0xff]  ;;  %v2013_v13 = vld [vmem:[#allocation2 + $0x498] sm:$0xff] }
 0x2c9   :  { %v1266_v24 = vadd.f32 %v3614_v16, %v1249_v23  ;;  %v4058_v16 = vpack.c.bf16 %v1412_v7, %v1404_v6  ;;  %v1295_v23 = vld [vmem:[#allocation2 + $0x30] sm:$0xff]  ;;  %v1297_v6 = vld [vmem:[#allocation2 + $0x40] sm:$0xff]  ;;  %v4092_v7 = vpack.c.bf16 %v1298_v0, %v1290_v63  ;;  %v2017_v63 = vld [vmem:[#allocation2 + $0x4b8] sm:$0xff] }
 0x2ca   :  { %v1269_v26 = vmax.f32 %v1267_v22, 0.0  ;;  %v4140_v22 = vpack.c.bf16 %v1304_v15, %v1296_v14  ;;  %v2021_v14 = vld [vmem:[#allocation2 + $0x4d8] sm:$0xff] }
 0x2cb   :  { %v1268_v27 = vmax.f32 %v1266_v24, 0.0  ;;  %v1303_v24 = vld [vmem:[#allocation2 + $0x70] sm:$0xff]  ;;  %v2025_v0 = vld [vmem:[#allocation2 + $0x4f8] sm:$0xff] }
 0x2cc   :  { %v1277_v28 = vadd.f32 %v3615_v25, %v1269_v26  ;;  %v1383_v26 = vld [vmem:[#allocation2 + $0x2e8] sm:$0xff] }
 0x2cd   :  { %v1276_v29 = vadd.f32 %v3615_v25, %v1268_v27  ;;  %v1375_v25 = vld [vmem:[#allocation2 + $0x2a8] sm:$0xff]  ;;  %v1312_v27 = vld [vmem:[#allocation2 + $0xb8] sm:$0xff] }
 0x2ce   :  { %1282 = vrot.lane.b32.xlu1 %v1277_v28, %s4724_s29  ;;  %v4064_v33 = vpack.c.bf16 %v1383_v26, %v1375_v25  ;;  %v1330_v25 = vld [vmem:[#allocation2 + $0x148] sm:$0xff]  ;;  %v2029_v26 = vld [vmem:[#allocation2 + $0x518] sm:$0xff] }
 0x2cf   :  { %1280 = vrot.lane.b32.xlu0 %v1276_v29, %s4724_s29 }
 0x340   :  { %v1283_v30 = vpop.permute.xlu1 %1282 }
 0x341   :  { %v1287_v31 = vmax.f32 %v1277_v28, %v1283_v30  ;;  %v1281_v32 = vpop.permute.xlu0 %1280  ;;  %v1320_v28 = vld [vmem:[#allocation2 + $0xf8] sm:$0xff]  ;;  %v4142_v30 = vpack.c.bf16 %v1303_v24, %v1295_v23  ;;  %v2020_v23 = vld [vmem:[#allocation2 + $0x4d0] sm:$0xff]  ;;  %v1322_v24 = vld [vmem:[#allocation2 + $0x108] sm:$0xff] }
 0x342   :  { %v1286_v35 = vmax.f32 %v1276_v29, %v1281_v32  ;;  %v4062_v29 = vpack.c.bf16 %v1366_v20, %v1358_v19  ;;  %v1382_v32 = vld [vmem:[#allocation2 + $0x2e0] sm:$0xff]  ;;  %v4144_v34 = vpack.c.bf16 %v1320_v28, %v1312_v27  ;;  %v4096_v20 = vpack.c.bf16 %v1314_v12, %v1306_v11  ;;  %v2037_v27 = vld [vmem:[#allocation2 + $0x558] sm:$0xff]  ;;  %v1334_v11 = vld [vmem:[#allocation2 + $0x168] sm:$0xff] }
 0x343   :  { %v1313_v19 = vld [vmem:[#allocation2 + $0xc0] sm:$0xff]  ;;  %v2033_v12 = vld [vmem:[#allocation2 + $0x538] sm:$0xff] }
 0x344   :  { %v5158_v42 = vmax.f32 %v1286_v35, %v1287_v31  ;;  %v1374_v31 = vld [vmem:[#allocation2 + $0x2a0] sm:$0xff]  ;;  %v1311_v35 = vld [vmem:[#allocation2 + $0xb0] sm:$0xff] }
 0x345   :  { %v4066_v41 = vpack.c.bf16 %v1382_v32, %v1374_v31  ;;  %v1329_v31 = vld [vmem:[#allocation2 + $0x140] sm:$0xff]  ;;  %v4100_v32 = vpack.c.bf16 %v1330_v25, %v1322_v24  ;;  %v1350_v24 = vld [vmem:[#allocation2 + $0x1e8] sm:$0xff]  ;;  %v2049_v25 = vld [vmem:[#allocation2 + $0x5b8] sm:$0xff] }
 0x346   :  { %v5161_v47 = vrot.slane %v5158_v42, 2 }
 0x348   :  { %3616 = vmatmul.mubr.msk.f32.vlgmr.msra.gmra.mrb[6].mxu0 %vm1420_vm6, %v5161_v47  ;;  %3619 = vmatmul.mubr.msk.f32.vlgmr.msra.gmra.mrb[2].mxu1 %vm1420_vm6, %v5161_v47 }
 0x349   :  { %4047 = vmatpush1.bf16.msra.mxu0 %v4046_v43  ;;  %4111 = vmatpush1.bf16.msra.mxu1 %v4110_v44  ;;  %v4146_v43 = vpack.c.bf16 %v1319_v36, %v1311_v35  ;;  %v1390_v44 = vld [vmem:[#allocation2 + $0x320] sm:$0xff]  ;;  %v2036_v35 = vld [vmem:[#allocation2 + $0x550] sm:$0xff]  ;;  %v1338_v36 = vld [vmem:[#allocation2 + $0x188] sm:$0xff] }
 0x34a   :  { %4049 = vmatprep.subr.bf16.mxu0 %v4048_v48  ;;  %4113 = vmatprep.subr.bf16.mxu1 %v4112_v49  ;;  %v4148_v48 = vpack.c.bf16 %v1336_v40, %v1328_v39  ;;  %v1327_v49 = vld [vmem:[#allocation2 + $0x130] sm:$0xff]  ;;  %v4070_v55 = vpack.c.bf16 %v1398_v45, %v1390_v44  ;;  %v2053_v39 = vld [vmem:[#allocation2 + $0x5d8] sm:$0xff]  ;;  %v4104_v44 = vpack.c.bf16 %v1346_v37, %v1338_v36  ;;  %v2003_v36 = vld [vmem:[#allocation2 + $0x448] sm:$0xff] }
 0x34b   :  { %1558 = vmatprep.mubr.f32.mxu0 %v4730_v17  ;;  %1844 = vmatprep.mubr.f32.mxu1 %v4730_v17  ;;  %v4184_v45 = vpack.c.bf16 %v2053_v39, %v2045_v38  ;;  %v2357_v37 = vld [vmem:[#allocation2 + $0x618] sm:$0xff] }
 0x34c   :  { %v2365_v38 = vld [vmem:[#allocation2 + $0x658] sm:$0xff] }
 0x34d   :  { %4051 = vmatpush1.bf16.msra.mxu0 %v4050_v56  ;;  %4115 = vmatpush1.bf16.msra.mxu1 %v4114_v57  ;;  %v4150_v56 = vpack.c.bf16 %v1335_v50, %v1327_v49  ;;  %v1406_v57 = vld [vmem:[#allocation2 + $0x3a0] sm:$0xff]  ;;  %v1294_v49 = vld [vmem:[#allocation2 + $0x28] sm:$0xff] }
 0x34e   :  { %4053 = vmatprep.subr.bf16.mxu0 %v4052_v60  ;;  %4117 = vmatprep.subr.bf16.mxu1 %v4116_v61  ;;  %v4152_v60 = vpack.c.bf16 %v1352_v54, %v1344_v53  ;;  %v1343_v61 = vld [vmem:[#allocation2 + $0x1b0] sm:$0xff]  ;;  %v4074_v3 = vpack.c.bf16 %v1414_v58, %v1406_v57  ;;  %v1302_v50 = vld [vmem:[#allocation2 + $0x68] sm:$0xff]  ;;  %v4204_v58 = vpack.c.bf16 %v2009_v52, %v2001_v51  ;;  %v2381_v51 = vld [vmem:[#allocation2 + $0x6d8] sm:$0xff] }
 0x34f   :  { %v4124_v57 = vpack.c.bf16 %v1302_v50, %v1294_v49  ;;  %v2019_v49 = vld [vmem:[#allocation2 + $0x4c8] sm:$0xff]  ;;  %v2373_v50 = vld [vmem:[#allocation2 + $0x698] sm:$0xff] }
 0x351   :  { %4055 = vmatpush1.bf16.msra.mxu0 %v4054_v4  ;;  %4119 = vmatpush1.bf16.msra.mxu1 %v4118_v5  ;;  %v4154_v4 = vpack.c.bf16 %v1351_v62, %v1343_v61  ;;  %v1289_v5 = vld [vmem:[#allocation2] sm:$0xff]  ;;  %v1310_v61 = vld [vmem:[#allocation2 + $0xa8] sm:$0xff] }
 0x352   :  { %4057 = vmatprep.subr.bf16.mxu0 %v4056_v8  ;;  %4121 = vmatprep.subr.bf16.mxu1 %v4120_v9  ;;  %v4172_v8 = vpack.c.bf16 %v2005_v2, %v1997_v1  ;;  %v1996_v9 = vld [vmem:[#allocation2 + $0x410] sm:$0xff]  ;;  %v4094_v15 = vpack.c.bf16 %v1297_v6, %v1289_v5  ;;  %v1318_v62 = vld [vmem:[#allocation2 + $0xe8] sm:$0xff]  ;;  %v5182_v5 = vrot.slane %v5158_v42, 4 }
 0x353   :  { %v4128_v6 = vpack.c.bf16 %v1318_v62, %v1310_v61  ;;  %v2035_v61 = vld [vmem:[#allocation2 + $0x548] sm:$0xff]  ;;  %v2389_v62 = vld [vmem:[#allocation2 + $0x718] sm:$0xff] }
 0x355   :  { %4059 = vmatpush1.bf16.msra.mxu0 %v4058_v16  ;;  %4123 = vmatpush1.bf16.msra.mxu1 %v4122_v18  ;;  %v4174_v16 = vpack.c.bf16 %v2004_v10, %v1996_v9  ;;  %v1305_v18 = vld [vmem:[#allocation2 + $0x80] sm:$0xff]  ;;  %v2024_v9 = vld [vmem:[#allocation2 + $0x4f0] sm:$0xff]  ;;  %v1326_v10 = vld [vmem:[#allocation2 + $0x128] sm:$0xff] }
 0x356   :  { %4061 = vmatprep.subr.bf16.mxu0 %v4060_v21  ;;  %4141 = vmatprep.subr.bf16.mxu1 %v4140_v22  ;;  %v4176_v21 = vpack.c.bf16 %v2021_v14, %v2013_v13  ;;  %v2012_v22 = vld [vmem:[#allocation2 + $0x490] sm:$0xff]  ;;  %v4098_v28 = vpack.c.bf16 %v1313_v19, %v1305_v18  ;;  %v2041_v13 = vld [vmem:[#allocation2 + $0x578] sm:$0xff]  ;;  %v1333_v18 = vld [vmem:[#allocation2 + $0x160] sm:$0xff]  ;;  %v4132_v19 = vpack.c.bf16 %v1334_v11, %v1326_v10 }
 0x357   :  { %v2051_v10 = vld [vmem:[#allocation2 + $0x5c8] sm:$0xff]  ;;  %v2405_v11 = vld [vmem:[#allocation2 + $0x798] sm:$0xff] }
 0x358   :  { %3617 = vmatmul.mubr.msk.f32.vlgmr.msra.gmra.mrb[8].mxu0 %vm1420_vm6, %v5161_v47  ;;  %3621 = vmatmul.mubr.msk.f32.vlgmr.msra.gmra.mrb[4].mxu1 %vm1420_vm6, %v5158_v42 }
 0x359   :  { %4063 = vmatpush1.bf16.msra.mxu0 %v4062_v29  ;;  %4143 = vmatpush1.bf16.msra.mxu1 %v4142_v30  ;;  %v4178_v29 = vpack.c.bf16 %v2020_v23, %v2012_v22  ;;  %v1321_v30 = vld [vmem:[#allocation2 + $0x100] sm:$0xff]  ;;  %v2040_v22 = vld [vmem:[#allocation2 + $0x570] sm:$0xff]  ;;  %v1342_v23 = vld [vmem:[#allocation2 + $0x1a8] sm:$0xff] }
 0x35a   :  { %4065 = vmatprep.subr.bf16.mxu0 %v4064_v33  ;;  %4145 = vmatprep.subr.bf16.mxu1 %v4144_v34  ;;  %v4180_v33 = vpack.c.bf16 %v2037_v27, %v2029_v26  ;;  %v2028_v34 = vld [vmem:[#allocation2 + $0x510] sm:$0xff]  ;;  %v2057_v26 = vld [vmem:[#allocation2 + $0x5f8] sm:$0xff] }
 0x35b   :  { %1629 = vmatprep.mubr.f32.mxu0 %v4730_v17  ;;  %1986 = vmatprep.mubr.f32.mxu1 %v4730_v17  ;;  %v4182_v40 = vpack.c.bf16 %v2036_v35, %v2028_v34  ;;  %v2056_v34 = vld [vmem:[#allocation2 + $0x5f0] sm:$0xff]  ;;  %v1995_v35 = vld [vmem:[#allocation2 + $0x408] sm:$0xff] }
 0x35d   :  { %4067 = vmatpush1.bf16.msra.mxu0 %v4066_v41  ;;  %4147 = vmatpush1.bf16.msra.mxu1 %v4146_v43  ;;  %v1337_v41 = vld [vmem:[#allocation2 + $0x180] sm:$0xff] }
 0x35e   :  { %4069 = vmatprep.subr.bf16.mxu0 %v4068_v46  ;;  %4149 = vmatprep.subr.bf16.mxu1 %v4148_v48  ;;  %v1345_v43 = vld [vmem:[#allocation2 + $0x1c0] sm:$0xff]  ;;  %v2044_v46 = vld [vmem:[#allocation2 + $0x590] sm:$0xff] }
 0x35f   :  { %v2052_v48 = vld [vmem:[#allocation2 + $0x5d0] sm:$0xff]  ;;  %v4106_v53 = vpack.c.bf16 %v1345_v43, %v1337_v41  ;;  %v2002_v41 = vld [vmem:[#allocation2 + $0x440] sm:$0xff]  ;;  %v4156_v43 = vpack.c.bf16 %v2003_v36, %v1995_v35  ;;  %v2023_v35 = vld [vmem:[#allocation2 + $0x4e8] sm:$0xff] }
 0x360   :  { %v4186_v54 = vpack.c.bf16 %v2052_v48, %v2044_v46  ;;  %v2364_v46 = vld [vmem:[#allocation2 + $0x650] sm:$0xff]  ;;  %v2011_v48 = vld [vmem:[#allocation2 + $0x488] sm:$0xff]  ;;  %v2377_v36 = vld [vmem:[#allocation2 + $0x6b8] sm:$0xff] }
 0x361   :  { %4071 = vmatpush1.bf16.msra.mxu0 %v4070_v55  ;;  %4151 = vmatpush1.bf16.msra.mxu1 %v4150_v56  ;;  %v1293_v55 = vld [vmem:[#allocation2 + $0x20] sm:$0xff] }
 0x362   :  { %4073 = vmatprep.subr.bf16.mxu0 %v4072_v59  ;;  %4153 = vmatprep.subr.bf16.mxu1 %v4152_v60  ;;  %v1301_v56 = vld [vmem:[#allocation2 + $0x60] sm:$0xff]  ;;  %v2000_v59 = vld [vmem:[#allocation2 + $0x430] sm:$0xff] }
 0x363   :  { %v2008_v60 = vld [vmem:[#allocation2 + $0x470] sm:$0xff]  ;;  %v4126_v1 = vpack.c.bf16 %v1301_v56, %v1293_v55  ;;  %v2018_v55 = vld [vmem:[#allocation2 + $0x4c0] sm:$0xff]  ;;  %v4160_v56 = vpack.c.bf16 %v2019_v49, %v2011_v48  ;;  %v2031_v48 = vld [vmem:[#allocation2 + $0x528] sm:$0xff] }
 0x364   :  { %v4206_v2 = vpack.c.bf16 %v2008_v60, %v2000_v59  ;;  %v2380_v59 = vld [vmem:[#allocation2 + $0x6d0] sm:$0xff]  ;;  %v2027_v60 = vld [vmem:[#allocation2 + $0x508] sm:$0xff] }
 0x365   :  { %4075 = vmatpush1.bf16.msra.mxu0 %v4074_v3  ;;  %4155 = vmatpush1.bf16.msra.mxu1 %v4154_v4  ;;  %v1309_v3 = vld [vmem:[#allocation2 + $0xa0] sm:$0xff]  ;;  %v2039_v49 = vld [vmem:[#allocation2 + $0x568] sm:$0xff] }
 0x366   :  { %4093 = vmatprep.subr.bf16.mxu0 %v4092_v7  ;;  %4173 = vmatprep.subr.bf16.mxu1 %v4172_v8  ;;  %v1317_v4 = vld [vmem:[#allocation2 + $0xe0] sm:$0xff]  ;;  %v4208_v7 = vpack.c.bf16 %v2025_v0, %v2017_v63  ;;  %v2016_v8 = vld [vmem:[#allocation2 + $0x4b0] sm:$0xff]  ;;  %v2397_v63 = vld [vmem:[#allocation2 + $0x758] sm:$0xff] }
 0x367   :  { %v4130_v14 = vpack.c.bf16 %v1317_v4, %v1309_v3  ;;  %v2034_v3 = vld [vmem:[#allocation2 + $0x540] sm:$0xff]  ;;  %v4164_v4 = vpack.c.bf16 %v2035_v61, %v2027_v60  ;;  %v2055_v60 = vld [vmem:[#allocation2 + $0x5e8] sm:$0xff]  ;;  %v2409_v61 = vld [vmem:[#allocation2 + $0x7b8] sm:$0xff] }
 0x368   :  { %3618 = vmatmul.mubr.msk.f32.vlgmr.msra.gmra.mrb[10].mxu0 %vm1420_vm6, %v5161_v47  ;;  %3623 = vmatmul.mubr.msk.f32.vlgmr.msra.gmra.mrb[2].mxu1 %vm1420_vm6, %v5158_v42  ;;  %v4102_v47 = vpack.c.bf16 %v1329_v31, %v1321_v30  ;;  %v1349_v30 = vld [vmem:[#allocation2 + $0x1e0] sm:$0xff]  ;;  %v4136_v31 = vpack.c.bf16 %v1350_v24, %v1342_v23  ;;  %v2007_v23 = vld [vmem:[#allocation2 + $0x468] sm:$0xff]  ;;  %v2361_v24 = vld [vmem:[#allocation2 + $0x638] sm:$0xff] }
 0x369   :  { %4095 = vmatpush1.bf16.msra.mxu0 %v4094_v15  ;;  %4175 = vmatpush1.bf16.msra.mxu1 %v4174_v16  ;;  %v4210_v15 = vpack.c.bf16 %v2024_v9, %v2016_v8  ;;  %v1325_v16 = vld [vmem:[#allocation2 + $0x120] sm:$0xff]  ;;  %v2396_v8 = vld [vmem:[#allocation2 + $0x750] sm:$0xff]  ;;  %v2043_v9 = vld [vmem:[#allocation2 + $0x588] sm:$0xff] }
 0x36a   :  { %4097 = vmatprep.subr.bf16.mxu0 %v4096_v20  ;;  %4177 = vmatprep.subr.bf16.mxu1 %v4176_v21  ;;  %v4212_v20 = vpack.c.bf16 %v2041_v13, %v2033_v12  ;;  %v2032_v21 = vld [vmem:[#allocation2 + $0x530] sm:$0xff]  ;;  %v4134_v27 = vpack.c.bf16 %v1333_v18, %v1325_v16  ;;  %v2413_v12 = vld [vmem:[#allocation2 + $0x7d8] sm:$0xff]  ;;  %v2050_v16 = vld [vmem:[#allocation2 + $0x5c0] sm:$0xff]  ;;  %v4168_v18 = vpack.c.bf16 %v2051_v10, %v2043_v9 }
 0x36b   :  { %1773 = vmatprep.mubr.f32.mxu0 %v4730_v17  ;;  %2196 = vmatprep.mubr.f32.mxu1 %v4730_v17  ;;  %v2363_v9 = vld [vmem:[#allocation2 + $0x648] sm:$0xff] }
 0x36d   :  { %4099 = vmatpush1.bf16.msra.mxu0 %v4098_v28  ;;  %4179 = vmatpush1.bf16.msra.mxu1 %v4178_v29  ;;  %v4214_v28 = vpack.c.bf16 %v2040_v22, %v2032_v21  ;;  %v1341_v29 = vld [vmem:[#allocation2 + $0x1a0] sm:$0xff]  ;;  %v2412_v21 = vld [vmem:[#allocation2 + $0x7d0] sm:$0xff]  ;;  %v1999_v22 = vld [vmem:[#allocation2 + $0x428] sm:$0xff] }
 0x36e   :  { %4101 = vmatprep.subr.bf16.mxu0 %v4100_v32  ;;  %4181 = vmatprep.subr.bf16.mxu1 %v4180_v33  ;;  %v4216_v32 = vpack.c.bf16 %v2057_v26, %v2049_v25  ;;  %v2048_v33 = vld [vmem:[#allocation2 + $0x5b0] sm:$0xff]  ;;  %v4138_v39 = vpack.c.bf16 %v1349_v30, %v1341_v29  ;;  %v2369_v25 = vld [vmem:[#allocation2 + $0x678] sm:$0xff]  ;;  %v2006_v29 = vld [vmem:[#allocation2 + $0x460] sm:$0xff]  ;;  %v4188_v30 = vpack.c.bf16 %v2007_v23, %v1999_v22 }
 0x36f   :  { %v2387_v22 = vld [vmem:[#allocation2 + $0x708] sm:$0xff] }
 0x370   :  { %v2395_v23 = vld [vmem:[#allocation2 + $0x748] sm:$0xff] }
 0x371   :  { %4103 = vmatpush1.bf16.msra.mxu0 %v4102_v47  ;;  %4183 = vmatpush1.bf16.msra.mxu1 %v4182_v40  ;;  %v4218_v47 = vpack.c.bf16 %v2056_v34, %v2048_v33  ;;  %v1994_v40 = vld [vmem:[#allocation2 + $0x400] sm:$0xff]  ;;  %v2368_v33 = vld [vmem:[#allocation2 + $0x670] sm:$0xff]  ;;  %v2015_v34 = vld [vmem:[#allocation2 + $0x4a8] sm:$0xff] }
 0x372   :  { %4105 = vmatprep.subr.bf16.mxu0 %v4104_v44  ;;  %4185 = vmatprep.subr.bf16.mxu1 %v4184_v45  ;;  %v4236_v44 = vpack.c.bf16 %v2365_v38, %v2357_v37  ;;  %v2356_v45 = vld [vmem:[#allocation2 + $0x610] sm:$0xff]  ;;  %v4158_v52 = vpack.c.bf16 %v2002_v41, %v1994_v40  ;;  %v2385_v37 = vld [vmem:[#allocation2 + $0x6f8] sm:$0xff]  ;;  %v2022_v40 = vld [vmem:[#allocation2 + $0x4e0] sm:$0xff]  ;;  %v5197_v41 = vrot.slane %v5158_v42, 6 }
 0x375   :  { %4107 = vmatpush1.bf16.msra.mxu0 %v4106_v53  ;;  %4187 = vmatpush1.bf16.msra.mxu1 %v4186_v54  ;;  %v4238_v53 = vpack.c.bf16 %v2364_v46, %v2356_v45  ;;  %v2010_v54 = vld [vmem:[#allocation2 + $0x480] sm:$0xff]  ;;  %v2376_v45 = vld [vmem:[#allocation2 + $0x6b0] sm:$0xff] }
 0x376   :  { %4125 = vmatprep.subr.bf16.mxu0 %v4124_v57  ;;  %4205 = vmatprep.subr.bf16.mxu1 %v4204_v58  ;;  %v4240_v57 = vpack.c.bf16 %v2381_v51, %v2373_v50  ;;  %v2372_v58 = vld [vmem:[#allocation2 + $0x690] sm:$0xff]  ;;  %v4162_v0 = vpack.c.bf16 %v2018_v55, %v2010_v54  ;;  %v2393_v50 = vld [vmem:[#allocation2 + $0x738] sm:$0xff]  ;;  %v2038_v54 = vld [vmem:[#allocation2 + $0x560] sm:$0xff]  ;;  %v4196_v55 = vpack.c.bf16 %v2039_v49, %v2031_v48 }
 0x377   :  { %v2384_v46 = vld [vmem:[#allocation2 + $0x6f0] sm:$0xff]  ;;  %v2401_v51 = vld [vmem:[#allocation2 + $0x778] sm:$0xff]  ;;  %v2367_v48 = vld [vmem:[#allocation2 + $0x668] sm:$0xff] }
 0x378   :  { %3620 = vmatmul.mubr.msk.f32.vlgmr.msra.gmra.mrb[6].mxu0 %vm1420_vm6, %v5158_v42  ;;  %3625 = vmatmul.mubr.msk.f32.vlgmr.msra.gmra.mrb[4].mxu1 %vm1420_vm6, %v5182_v5  ;;  %v2832_v49 = vld [vmem:[#allocation5 + $0x58] sm:$0xff] }
 0x379   :  { %4127 = vmatpush1.bf16.msra.mxu0 %v4126_v1  ;;  %4207 = vmatpush1.bf16.msra.mxu1 %v4206_v2  ;;  %v4242_v1 = vpack.c.bf16 %v2380_v59, %v2372_v58  ;;  %v2026_v2 = vld [vmem:[#allocation2 + $0x500] sm:$0xff]  ;;  %v2400_v58 = vld [vmem:[#allocation2 + $0x770] sm:$0xff]  ;;  %v2047_v59 = vld [vmem:[#allocation2 + $0x5a8] sm:$0xff] }
 0x37a   :  { %4129 = vmatprep.subr.bf16.mxu0 %v4128_v6  ;;  %4209 = vmatprep.subr.bf16.mxu1 %v4208_v7  ;;  %v4244_v6 = vpack.c.bf16 %v2397_v63, %v2389_v62  ;;  %v2388_v7 = vld [vmem:[#allocation2 + $0x710] sm:$0xff]  ;;  %v4166_v13 = vpack.c.bf16 %v2034_v3, %v2026_v2  ;;  %v2417_v62 = vld [vmem:[#allocation2 + $0x7f8] sm:$0xff]  ;;  %v4200_v2 = vpack.c.bf16 %v2055_v60, %v2047_v59  ;;  %v2834_v59 = vld [vmem:[#allocation5 + $0x68] sm:$0xff] }
 0x37b   :  { %1915 = vmatprep.mubr.f32.mxu0 %v4730_v17  ;;  %2338 = vmatprep.mubr.f32.mxu1 %v4730_v17  ;;  %v4280_v3 = vpack.c.bf16 %v2417_v62, %v2409_v61  ;;  %v2836_v60 = vld [vmem:[#allocation5 + $0x78] sm:$0xff] }
 0x37d   :  { %4131 = vmatpush1.bf16.msra.mxu0 %v4130_v14  ;;  %4211 = vmatpush1.bf16.msra.mxu1 %v4210_v15  ;;  %v4246_v14 = vpack.c.bf16 %v2396_v8, %v2388_v7  ;;  %v2042_v15 = vld [vmem:[#allocation2 + $0x580] sm:$0xff]  ;;  %v2416_v7 = vld [vmem:[#allocation2 + $0x7f0] sm:$0xff]  ;;  %v2355_v8 = vld [vmem:[#allocation2 + $0x608] sm:$0xff] }
 0x37e   :  { %4133 = vmatprep.subr.bf16.mxu0 %v4132_v19  ;;  %4213 = vmatprep.subr.bf16.mxu1 %v4212_v20  ;;  %v4248_v19 = vpack.c.bf16 %v2413_v12, %v2405_v11  ;;  %v2404_v20 = vld [vmem:[#allocation2 + $0x790] sm:$0xff]  ;;  %v4170_v26 = vpack.c.bf16 %v2050_v16, %v2042_v15  ;;  %v4220_v12 = vpack.c.bf16 %v2363_v9, %v2355_v8  ;;  %v2371_v15 = vld [vmem:[#allocation2 + $0x688] sm:$0xff] }
 0x37f   :  { %v2379_v16 = vld [vmem:[#allocation2 + $0x6c8] sm:$0xff] }
 0x380   :  { %v2391_v8 = vld [vmem:[#allocation2 + $0x728] sm:$0xff] }
 0x381   :  { %4135 = vmatpush1.bf16.msra.mxu0 %v4134_v27  ;;  %4215 = vmatpush1.bf16.msra.mxu1 %v4214_v28  ;;  %v4250_v27 = vpack.c.bf16 %v2412_v21, %v2404_v20  ;;  %v1998_v28 = vld [vmem:[#allocation2 + $0x420] sm:$0xff]  ;;  %v2399_v9 = vld [vmem:[#allocation2 + $0x768] sm:$0xff] }
 0x382   :  { %4137 = vmatprep.subr.bf16.mxu0 %v4136_v31  ;;  %4217 = vmatprep.subr.bf16.mxu1 %v4216_v32  ;;  %v4268_v31 = vpack.c.bf16 %v2369_v25, %v2361_v24  ;;  %v2360_v32 = vld [vmem:[#allocation2 + $0x630] sm:$0xff]  ;;  %v4190_v38 = vpack.c.bf16 %v2006_v29, %v1998_v28  ;;  %v2370_v20 = vld [vmem:[#allocation2 + $0x680] sm:$0xff]  ;;  %v4228_v25 = vpack.c.bf16 %v2395_v23, %v2387_v22  ;;  %v2403_v28 = vld [vmem:[#allocation2 + $0x788] sm:$0xff] }
 0x383   :  { %v2378_v21 = vld [vmem:[#allocation2 + $0x6c0] sm:$0xff]  ;;  %v2411_v29 = vld [vmem:[#allocation2 + $0x7c8] sm:$0xff] }
 0x384   :  { %v4226_v24 = vpack.c.bf16 %v2378_v21, %v2370_v20  ;;  %v2844_v20 = vld [vmem:[#allocation5 + $0xb8] sm:$0xff]  ;;  %v2407_v21 = vld [vmem:[#allocation2 + $0x7a8] sm:$0xff] }
 0x385   :  { %4139 = vmatpush1.bf16.msra.mxu0 %v4138_v39  ;;  %4219 = vmatpush1.bf16.msra.mxu1 %v4218_v47  ;;  %v4270_v39 = vpack.c.bf16 %v2368_v33, %v2360_v32  ;;  %v2014_v47 = vld [vmem:[#allocation2 + $0x4a0] sm:$0xff]  ;;  %v2822_v32 = vld [vmem:[#allocation5 + $0x8] sm:$0xff]  ;;  %v2824_v33 = vld [vmem:[#allocation5 + $0x18] sm:$0xff] }
 0x386   :  { %4157 = vmatprep.subr.bf16.mxu0 %v4156_v43  ;;  %4237 = vmatprep.subr.bf16.mxu1 %v4236_v44  ;;  %v4192_v43 = vpack.c.bf16 %v2023_v35, %v2015_v34  ;;  %v4272_v44 = vpack.c.bf16 %v2385_v37, %v2377_v36  ;;  %v2821_v34 = vld [vmem:[#allocation5] sm:$0xff]  ;;  %v4284_v35 = vpack.c.bf16 %v2824_v33, %v2822_v32  ;;  %v2823_v36 = vld [vmem:[#allocation5 + $0x10] sm:$0xff]  ;;  %v2826_v37 = vld [vmem:[#allocation5 + $0x28] sm:$0xff] }
 0x387   :  { %v2415_v22 = vld [vmem:[#allocation2 + $0x7e8] sm:$0xff] }
 0x388   :  { %3622 = vmatmul.mubr.msk.f32.vlgmr.msra.gmra.mrb[10].mxu0 %vm1420_vm6, %v5158_v42  ;;  %3627 = vmatmul.mubr.msk.f32.vlgmr.msra.gmra.mrb[2].mxu1 %vm1420_vm6, %v5182_v5  ;;  %v4274_v42 = vpack.c.bf16 %v2384_v46, %v2376_v45  ;;  %v2830_v45 = vld [vmem:[#allocation5 + $0x48] sm:$0xff] }
 0x389   :  { %4159 = vmatpush1.bf16.msra.mxu0 %v4158_v52  ;;  %4239 = vmatpush1.bf16.msra.mxu1 %v4238_v53  ;;  %v4194_v52 = vpack.c.bf16 %v2022_v40, %v2014_v47  ;;  %v2030_v53 = vld [vmem:[#allocation2 + $0x520] sm:$0xff]  ;;  %v4286_v47 = vpack.c.bf16 %v2823_v36, %v2821_v34  ;;  %v2359_v46 = vld [vmem:[#allocation2 + $0x628] sm:$0xff] }
 0x38a   :  { %4161 = vmatprep.subr.bf16.mxu0 %v4160_v56  ;;  %4241 = vmatprep.subr.bf16.mxu1 %v4240_v57  ;;  %v4276_v56 = vpack.c.bf16 %v2401_v51, %v2393_v50  ;;  %v2392_v57 = vld [vmem:[#allocation2 + $0x730] sm:$0xff]  ;;  %v4198_v63 = vpack.c.bf16 %v2038_v54, %v2030_v53  ;;  %v4252_v54 = vpack.c.bf16 %v2367_v48, %v2359_v46  ;;  %v2954_v36 = vld [vmem:[#allocation5 + $0x428] sm:$0xff]  ;;  %v2848_v48 = vld [vmem:[#allocation5 + $0xd8] sm:$0xff] }
 0x38b   :  { %2125 = vmatprep.mubr.f32.mxu0 %v4730_v17  ;;  %2556 = vmatprep.mubr.f32.mxu1 %v4730_v17  ;;  %v2831_v53 = vld [vmem:[#allocation5 + $0x50] sm:$0xff]  ;;  %v2846_v46 = vld [vmem:[#allocation5 + $0xc8] sm:$0xff] }
 0x38d   :  { %4163 = vmatpush1.bf16.msra.mxu0 %v4162_v0  ;;  %4243 = vmatpush1.bf16.msra.mxu1 %v4242_v1  ;;  %v4278_v0 = vpack.c.bf16 %v2400_v58, %v2392_v57  ;;  %v2046_v1 = vld [vmem:[#allocation2 + $0x5a0] sm:$0xff]  ;;  %v2375_v57 = vld [vmem:[#allocation2 + $0x6a8] sm:$0xff] }
 0x38e   :  { %4165 = vmatprep.subr.bf16.mxu0 %v4164_v4  ;;  %4245 = vmatprep.subr.bf16.mxu1 %v4244_v6  ;;  %v2054_v4 = vld [vmem:[#allocation2 + $0x5e0] sm:$0xff]  ;;  %v2408_v6 = vld [vmem:[#allocation2 + $0x7b0] sm:$0xff]  ;;  %v2383_v58 = vld [vmem:[#allocation2 + $0x6e8] sm:$0xff] }
 0x38f   :  { %v4202_v10 = vpack.c.bf16 %v2054_v4, %v2046_v1  ;;  %v4282_v11 = vpack.c.bf16 %v2416_v7, %v2408_v6  ;;  %v2835_v1 = vld [vmem:[#allocation5 + $0x70] sm:$0xff]  ;;  %v4296_v4 = vpack.c.bf16 %v2836_v60, %v2834_v59  ;;  %v2838_v6 = vld [vmem:[#allocation5 + $0x88] sm:$0xff]  ;;  %v2840_v7 = vld [vmem:[#allocation5 + $0x98] sm:$0xff] }
 0x390   :  { %v2850_v60 = vld [vmem:[#allocation5 + $0xe8] sm:$0xff] }
 0x391   :  { %4167 = vmatpush1.bf16.msra.mxu0 %v4166_v13  ;;  %4247 = vmatpush1.bf16.msra.mxu1 %v4246_v14  ;;  %v2354_v13 = vld [vmem:[#allocation2 + $0x600] sm:$0xff] }
 0x392   :  { %4169 = vmatprep.subr.bf16.mxu0 %v4168_v18  ;;  %4249 = vmatprep.subr.bf16.mxu1 %v4248_v19  ;;  %v2362_v14 = vld [vmem:[#allocation2 + $0x640] sm:$0xff]  ;;  %v4224_v19 = vpack.c.bf16 %v2379_v16, %v2371_v15  ;;  %v2839_v15 = vld [vmem:[#allocation5 + $0x90] sm:$0xff]  ;;  %v4260_v16 = vpack.c.bf16 %v2399_v9, %v2391_v8 }
 0x393   :  { %v4222_v18 = vpack.c.bf16 %v2362_v14, %v2354_v13  ;;  %v4300_v13 = vpack.c.bf16 %v2840_v7, %v2838_v6  ;;  %v2837_v14 = vld [vmem:[#allocation5 + $0x80] sm:$0xff]  ;;  %v2963_v7 = vld [vmem:[#allocation5 + $0x470] sm:$0xff] }
 0x394   :  { %v4302_v23 = vpack.c.bf16 %v2839_v15, %v2837_v14  ;;  %v2961_v6 = vld [vmem:[#allocation5 + $0x460] sm:$0xff]  ;;  %v2968_v15 = vld [vmem:[#allocation5 + $0x498] sm:$0xff] }
 0x395   :  { %4171 = vmatpush1.bf16.msra.mxu0 %v4170_v26  ;;  %4251 = vmatpush1.bf16.msra.mxu1 %v4250_v27  ;;  %v2386_v26 = vld [vmem:[#allocation2 + $0x700] sm:$0xff]  ;;  %v4426_v9 = vpack.c.bf16 %v2963_v7, %v2961_v6  ;;  %v2871_v7 = vld [vmem:[#allocation5 + $0x190] sm:$0xff] }
 0x396   :  { %4189 = vmatprep.subr.bf16.mxu0 %v4188_v30  ;;  %4269 = vmatprep.subr.bf16.mxu1 %v4268_v31  ;;  %v2394_v27 = vld [vmem:[#allocation2 + $0x740] sm:$0xff] }
 0x397   :  { %v2402_v30 = vld [vmem:[#allocation2 + $0x780] sm:$0xff] }
 0x398   :  { %3624 = vmatmul.mubr.msk.f32.vlgmr.msra.gmra.mrb[6].mxu0 %vm1420_vm6, %v5182_v5  ;;  %3629 = vmatmul.mubr.msk.f32.vlgmr.msra.gmra.mrb[4].mxu1 %vm1420_vm6, %v5197_v41  ;;  %v2410_v31 = vld [vmem:[#allocation2 + $0x7c0] sm:$0xff] }
 0x399   :  { %4191 = vmatpush1.bf16.msra.mxu0 %v4190_v38  ;;  %4271 = vmatpush1.bf16.msra.mxu1 %v4270_v39  ;;  %v2828_v38 = vld [vmem:[#allocation5 + $0x38] sm:$0xff]  ;;  %v4232_v39 = vpack.c.bf16 %v2411_v29, %v2403_v28  ;;  %v4234_v51 = vpack.c.bf16 %v2410_v31, %v2402_v30  ;;  %v2406_v28 = vld [vmem:[#allocation2 + $0x7a0] sm:$0xff]  ;;  %v2950_v30 = vld [vmem:[#allocation5 + $0x408] sm:$0xff] }
 0x39a   :  { %4193 = vmatprep.subr.bf16.mxu0 %v4192_v43  ;;  %4273 = vmatprep.subr.bf16.mxu1 %v4272_v44  ;;  %v4288_v40 = vpack.c.bf16 %v2828_v38, %v2826_v37  ;;  %v2825_v43 = vld [vmem:[#allocation5 + $0x20] sm:$0xff]  ;;  %v2827_v44 = vld [vmem:[#allocation5 + $0x30] sm:$0xff]  ;;  %v2952_v31 = vld [vmem:[#allocation5 + $0x418] sm:$0xff] }
 0x39b   :  { %2267 = vmatprep.mubr.f32.mxu0 %v4730_v17  ;;  %2698 = vmatprep.mubr.f32.mxu1 %v4730_v17  ;;  %v4290_v50 = vpack.c.bf16 %v2827_v44, %v2825_v43  ;;  %v2414_v29 = vld [vmem:[#allocation2 + $0x7e0] sm:$0xff]  ;;  %v4412_v34 = vpack.c.bf16 %v2952_v31, %v2950_v30  ;;  %v2956_v37 = vld [vmem:[#allocation5 + $0x438] sm:$0xff]  ;;  %v2715_v44 = vlaneseq  ;;  %v2859_v30 = vld [vmem:[#allocation5 + $0x130] sm:$0xff] }
 0x39c   :  { %v4266_v33 = vpack.c.bf16 %v2414_v29, %v2406_v28  ;;  %v5229_v8 = vld [vmem:[%s5410_s9] sm:$0xff] }
 0x39d   :  { %4195 = vmatpush1.bf16.msra.mxu0 %v4194_v52  ;;  %4275 = vmatpush1.bf16.msra.mxu1 %v4274_v42  ;;  %v4292_v52 = vpack.c.bf16 %v2832_v49, %v2830_v45  ;;  %v2829_v42 = vld [vmem:[#allocation5 + $0x40] sm:$0xff]  ;;  %v5215_v45 = vshrl.u32 %v2715_v44, 7  ;;  %v2958_v49 = vld [vmem:[#allocation5 + $0x448] sm:$0xff] }
 0x39e   :  { %4197 = vmatprep.subr.bf16.mxu0 %v4196_v55  ;;  %4277 = vmatprep.subr.bf16.mxu1 %v4276_v56  ;;  %v2358_v55 = vld [vmem:[#allocation2 + $0x620] sm:$0xff]  ;;  %v4294_v61 = vpack.c.bf16 %v2831_v53, %v2829_v42  ;;  %v2847_v42 = vld [vmem:[#allocation5 + $0xd0] sm:$0xff] }
 0x39f   :  { %v2366_v56 = vld [vmem:[#allocation2 + $0x660] sm:$0xff]  ;;  %v2725_v53 = vsub.s32 2, %v5215_v45 }
 0x3a0   :  { %v4254_v62 = vpack.c.bf16 %v2366_v56, %v2358_v55  ;;  %v2957_v56 = vld [vmem:[#allocation5 + $0x440] sm:$0xff] }
 0x3a1   :  { %4199 = vmatpush1.bf16.msra.mxu0 %v4198_v63  ;;  %4279 = vmatpush1.bf16.msra.mxu1 %v4278_v0  ;;  %v2374_v63 = vld [vmem:[#allocation2 + $0x6a0] sm:$0xff] }
 0x3a2   :  { %4201 = vmatprep.subr.bf16.mxu0 %v4200_v2  ;;  %4281 = vmatprep.subr.bf16.mxu1 %v4280_v3  ;;  %v2833_v0 = vld [vmem:[#allocation5 + $0x60] sm:$0xff]  ;;  %v4256_v2 = vpack.c.bf16 %v2383_v58, %v2375_v57 }
 0x3a3   :  { %v2382_v3 = vld [vmem:[#allocation2 + $0x6e0] sm:$0xff] }
 0x3a4   :  { %v5221_v57 = vld [vmem:[%s5409_s8] sm:$0xff] }
 0x3a5   :  { %4203 = vmatpush1.bf16.msra.mxu0 %v4202_v10  ;;  %4283 = vmatpush1.bf16.msra.mxu1 %v4282_v11  ;;  %v4298_v10 = vpack.c.bf16 %v2835_v1, %v2833_v0  ;;  %v4258_v11 = vpack.c.bf16 %v2382_v3, %v2374_v63  ;;  %v5224_v59 = vrot.slane %v5221_v57, %v2725_v53  ;;  %v2964_v0 = vld [vmem:[#allocation5 + $0x478] sm:$0xff]  ;;  %v2849_v1 = vld [vmem:[#allocation5 + $0xe0] sm:$0xff] }
 0x3a6   :  { %4221 = vmatprep.subr.bf16.mxu0 %v4220_v12  ;;  %4285 = vmatprep.subr.bf16.mxu1 %v4284_v35  ;;  %v2390_v12 = vld [vmem:[#allocation2 + $0x720] sm:$0xff]  ;;  %v2951_v35 = vld [vmem:[#allocation5 + $0x410] sm:$0xff] }
 0x3a7   :  { %v2857_v29 = vld [vmem:[#allocation5 + $0x120] sm:$0xff] }
 0x3a8   :  { %3626 = vmatmul.mubr.msk.f32.vlgmr.msra.gmra.mrb[10].mxu0 %vm1420_vm6, %v5182_v5  ;;  %3631 = vmatmul.mubr.msk.f32.vlgmr.msra.gmra.mrb[2].mxu1 %vm1420_vm6, %v5197_v41  ;;  %v4230_v5 = vpack.c.bf16 %v2394_v27, %v2386_v26  ;;  %v2841_v26 = vld [vmem:[#allocation5 + $0xa0] sm:$0xff]  ;;  %v2843_v27 = vld [vmem:[#allocation5 + $0xb0] sm:$0xff] }
 0x3a9   :  { %4223 = vmatpush1.bf16.msra.mxu0 %v4222_v18  ;;  %2485 = vmatprep.mubr.f32.mxu0 %v4730_v17  ;;  %v2398_v18 = vld [vmem:[#allocation2 + $0x760] sm:$0xff]  ;;  %v4306_v32 = vpack.c.bf16 %v2843_v27, %v2841_v26  ;;  %v2970_v26 = vld [vmem:[#allocation5 + $0x4a8] sm:$0xff]  ;;  %v2972_v27 = vld [vmem:[#allocation5 + $0x4b8] sm:$0xff] }
 0x3aa   :  { %4225 = vmatprep.subr.bf16.mxu0 %v4224_v19  ;;  %4287 = vmatpush1.bf16.msra.mxu1 %v4286_v47  ;;  %v2842_v19 = vld [vmem:[#allocation5 + $0xa8] sm:$0xff]  ;;  %v2953_v47 = vld [vmem:[#allocation5 + $0x420] sm:$0xff]  ;;  %v4432_v28 = vpack.c.bf16 %v2972_v27, %v2970_v26  ;;  %v2987_v26 = vld [vmem:[#allocation5 + $0x530] sm:$0xff] }
 0x3ab   :  { %4289 = vmatprep.subr.bf16.mxu1 %v4288_v40  ;;  %v2955_v40 = vld [vmem:[#allocation5 + $0x430] sm:$0xff]  ;;  %v2969_v31 = vld [vmem:[#allocation5 + $0x4a0] sm:$0xff] }
 0x3ac   :  { %v4418_v43 = vpack.c.bf16 %v2955_v40, %v2953_v47  ;;  %v2861_v47 = vld [vmem:[#allocation5 + $0x140] sm:$0xff]  ;;  %v2863_v40 = vld [vmem:[#allocation5 + $0x150] sm:$0xff] }
 0x3ad   :  { %4227 = vmatpush1.bf16.msra.mxu0 %v4226_v24  ;;  %v4262_v24 = vpack.c.bf16 %v2398_v18, %v2390_v12  ;;  %v2856_v12 = vld [vmem:[#allocation5 + $0x118] sm:$0xff]  ;;  %v2855_v18 = vld [vmem:[#allocation5 + $0x110] sm:$0xff]  ;;  %v2869_v6 = vld [vmem:[#allocation5 + $0x180] sm:$0xff] }
 0x3ae   :  { %4229 = vmatprep.subr.bf16.mxu0 %v4228_v25  ;;  %4291 = vmatpush1.bf16.msra.mxu1 %v4290_v50  ;;  %v4304_v25 = vpack.c.bf16 %v2844_v20, %v2842_v19  ;;  %v4308_v50 = vpack.c.bf16 %v2848_v48, %v2846_v46  ;;  %v4326_v46 = vpack.c.bf16 %v2863_v40, %v2861_v47  ;;  %v2973_v48 = vld [vmem:[#allocation5 + $0x4c0] sm:$0xff]  ;;  %v2994_v47 = vld [vmem:[#allocation5 + $0x568] sm:$0xff] }
 0x3af   :  { %4293 = vmatprep.subr.bf16.mxu1 %v4292_v52  ;;  %v2845_v52 = vld [vmem:[#allocation5 + $0xc0] sm:$0xff] }
 0x3b0   :  { %v4310_v55 = vpack.c.bf16 %v2847_v42, %v2845_v52  ;;  %v2868_v52 = vld [vmem:[#allocation5 + $0x178] sm:$0xff]  ;;  %v2978_v42 = vld [vmem:[#allocation5 + $0x4e8] sm:$0xff] }
 0x3b1   :  { %4231 = vmatpush1.bf16.msra.mxu0 %v4230_v5  ;;  %v2949_v5 = vld [vmem:[#allocation5 + $0x400] sm:$0xff] }
 0x3b2   :  { %4233 = vmatprep.subr.bf16.mxu0 %v4232_v39  ;;  %4295 = vmatpush1.bf16.msra.mxu1 %v4294_v61  ;;  %v4414_v38 = vpack.c.bf16 %v2951_v35, %v2949_v5  ;;  %v4416_v39 = vpack.c.bf16 %v2956_v37, %v2954_v36  ;;  %v2852_v61 = vld [vmem:[#allocation5 + $0xf8] sm:$0xff]  ;;  %v2741_v5 = vsub.s32 6, %v5215_v45  ;;  %v2862_v35 = vld [vmem:[#allocation5 + $0x148] sm:$0xff] }
 0x3b3   :  { %4297 = vmatprep.subr.bf16.mxu1 %v4296_v4  ;;  %v4312_v63 = vpack.c.bf16 %v2852_v61, %v2850_v60  ;;  %v2864_v36 = vld [vmem:[#allocation5 + $0x158] sm:$0xff]  ;;  %v2974_v37 = vld [vmem:[#allocation5 + $0x4c8] sm:$0xff]  ;;  %v2977_v61 = vld [vmem:[#allocation5 + $0x4e0] sm:$0xff] }
 0x3b5   :  { %4235 = vmatpush1.bf16.msra.mxu0 %v4234_v51  ;;  %v2960_v51 = vld [vmem:[#allocation5 + $0x458] sm:$0xff] }
 0x3b6   :  { %4253 = vmatprep.subr.bf16.mxu0 %v4252_v54  ;;  %4299 = vmatpush1.bf16.msra.mxu1 %v4298_v10  ;;  %v4420_v54 = vpack.c.bf16 %v2960_v51, %v2958_v49  ;;  %v5232_v10 = vrot.slane %v5229_v8, %v2725_v53  ;;  %v2975_v49 = vld [vmem:[#allocation5 + $0x4d0] sm:$0xff]  ;;  %v2866_v51 = vld [vmem:[#allocation5 + $0x168] sm:$0xff] }
 0x3b7   :  { %4301 = vmatprep.subr.bf16.mxu1 %v4300_v13  ;;  %v2966_v13 = vld [vmem:[#allocation5 + $0x488] sm:$0xff]  ;;  %v4328_v53 = vpack.c.bf16 %v2868_v52, %v2866_v51  ;;  %v2993_v51 = vld [vmem:[#allocation5 + $0x560] sm:$0xff]  ;;  %v2995_v52 = vld [vmem:[#allocation5 + $0x570] sm:$0xff] }
 0x3b8   :  { %3628 = vmatmul.mubr.msk.f32.vlgmr.msra.gmra.mrb[6].mxu0 %vm1420_vm6, %v5197_v41  ;;  %v4428_v19 = vpack.c.bf16 %v2968_v15, %v2966_v13  ;;  %v2983_v13 = vld [vmem:[#allocation5 + $0x510] sm:$0xff] }
 0x3b9   :  { %4255 = vmatpush1.bf16.msra.mxu0 %v4254_v62  ;;  %2627 = vmatprep.mubr.f32.mxu0 %v4730_v17  ;;  %v4264_v17 = vpack.c.bf16 %v2415_v22, %v2407_v21  ;;  %v2962_v62 = vld [vmem:[#allocation5 + $0x468] sm:$0xff]  ;;  %v2965_v21 = vld [vmem:[#allocation5 + $0x480] sm:$0xff]  ;;  %v2967_v22 = vld [vmem:[#allocation5 + $0x490] sm:$0xff] }
 0x3ba   :  { %4257 = vmatprep.subr.bf16.mxu0 %v4256_v2  ;;  %4303 = vmatpush1.bf16.msra.mxu1 %v4302_v23  ;;  %v2851_v2 = vld [vmem:[#allocation5 + $0xf0] sm:$0xff]  ;;  %v4424_v3 = vpack.c.bf16 %v2964_v0, %v2962_v62  ;;  %v2858_v23 = vld [vmem:[#allocation5 + $0x128] sm:$0xff] }
 0x3bb   :  { %4305 = vmatprep.subr.bf16.mxu1 %v4304_v25  ;;  %v4314_v4 = vpack.c.bf16 %v2851_v2, %v2849_v1  ;;  %v2860_v25 = vld [vmem:[#allocation5 + $0x138] sm:$0xff]  ;;  %v2979_v62 = vld [vmem:[#allocation5 + $0x4f0] sm:$0xff]  ;;  %v2870_v0 = vld [vmem:[#allocation5 + $0x188] sm:$0xff] }
 0x3bc   :  { %v2872_v1 = vld [vmem:[#allocation5 + $0x198] sm:$0xff]  ;;  %v2982_v2 = vld [vmem:[#allocation5 + $0x508] sm:$0xff] }
 0x3bd   :  { %4259 = vmatpush1.bf16.msra.mxu0 %v4258_v11  ;;  %v2854_v11 = vld [vmem:[#allocation5 + $0x108] sm:$0xff] }
 0x3be   :  { %4261 = vmatprep.subr.bf16.mxu0 %v4260_v16  ;;  %4307 = vmatpush1.bf16.msra.mxu1 %v4306_v32  ;;  %v4316_v14 = vpack.c.bf16 %v2856_v12, %v2854_v11  ;;  %v2853_v16 = vld [vmem:[#allocation5 + $0x100] sm:$0xff]  ;;  %v4322_v32 = vpack.c.bf16 %v2859_v30, %v2857_v29  ;;  %v4334_v11 = vpack.c.bf16 %v2871_v7, %v2869_v6  ;;  %v2990_v29 = vld [vmem:[#allocation5 + $0x548] sm:$0xff] }
 0x3bf   :  { %4309 = vmatprep.subr.bf16.mxu1 %v4308_v50  ;;  %v4318_v20 = vpack.c.bf16 %v2855_v18, %v2853_v16  ;;  %v4438_v50 = vpack.c.bf16 %v2975_v49, %v2973_v48  ;;  %v2981_v12 = vld [vmem:[#allocation5 + $0x500] sm:$0xff]  ;;  %v2876_v16 = vld [vmem:[#allocation5 + $0x1b8] sm:$0xff]  ;;  %v2986_v18 = vld [vmem:[#allocation5 + $0x528] sm:$0xff] }
 0x3c0   :  { %v4446_v15 = vpack.c.bf16 %v2983_v13, %v2981_v12  ;;  %v2883_v48 = vld [vmem:[#allocation5 + $0x1f0] sm:$0xff]  ;;  %v3006_v7 = vld [vmem:[#allocation5 + $0x5c8] sm:$0xff]  ;;  %v3005_v12 = vld [vmem:[#allocation5 + $0x5c0] sm:$0xff] }
 0x3c1   :  { %4263 = vmatpush1.bf16.msra.mxu0 %v4262_v24  ;;  %v4430_v24 = vpack.c.bf16 %v2967_v22, %v2965_v21  ;;  %v2873_v22 = vld [vmem:[#allocation5 + $0x1a0] sm:$0xff]  ;;  %v3007_v13 = vld [vmem:[#allocation5 + $0x5d0] sm:$0xff] }
 0x3c2   :  { %4265 = vmatprep.subr.bf16.mxu0 %v4264_v17  ;;  %4311 = vmatpush1.bf16.msra.mxu1 %v4310_v55  ;;  %v4320_v17 = vpack.c.bf16 %v2860_v25, %v2858_v23  ;;  %v2865_v55 = vld [vmem:[#allocation5 + $0x160] sm:$0xff]  ;;  %v2875_v23 = vld [vmem:[#allocation5 + $0x1b0] sm:$0xff] }
 0x3c3   :  { %4313 = vmatprep.subr.bf16.mxu1 %v4312_v63  ;;  %v4442_v63 = vpack.c.bf16 %v2979_v62, %v2977_v61  ;;  %v4338_v25 = vpack.c.bf16 %v2875_v23, %v2873_v22  ;;  %v2997_v61 = vld [vmem:[#allocation5 + $0x580] sm:$0xff]  ;;  %v2999_v62 = vld [vmem:[#allocation5 + $0x590] sm:$0xff]  ;;  %v3014_v22 = vld [vmem:[#allocation5 + $0x608] sm:$0xff] }
 0x3c4   :  { %v3016_v23 = vld [vmem:[#allocation5 + $0x618] sm:$0xff] }
 0x3c5   :  { %4267 = vmatpush1.bf16.msra.mxu0 %v4266_v33  ;;  %v2971_v33 = vld [vmem:[#allocation5 + $0x4b0] sm:$0xff] }
 0x3c6   :  { %4413 = vmatprep.subr.bf16.mxu0 %v4412_v34  ;;  %4315 = vmatpush1.bf16.msra.mxu1 %v4314_v4  ;;  %v4434_v34 = vpack.c.bf16 %v2971_v33, %v2969_v31  ;;  %v2984_v4 = vld [vmem:[#allocation5 + $0x518] sm:$0xff]  ;;  %v2879_v33 = vld [vmem:[#allocation5 + $0x1d0] sm:$0xff] }
 0x3c7   :  { %4317 = vmatprep.subr.bf16.mxu1 %v4316_v14  ;;  %v2874_v14 = vld [vmem:[#allocation5 + $0x1a8] sm:$0xff]  ;;  %v2992_v31 = vld [vmem:[#allocation5 + $0x558] sm:$0xff] }
 0x3c8   :  { %3630 = vmatmul.mubr.msk.f32.vlgmr.msra.gmra.mrb[10].mxu0 %vm1420_vm6, %v5197_v41  ;;  %v2959_v41 = vld [vmem:[#allocation5 + $0x450] sm:$0xff] }
 0x3c9   :  { %4415 = vmatpush1.bf16.msra.mxu0 %v4414_v38  ;;  %v4422_v58 = vpack.c.bf16 %v2959_v41, %v2957_v56  ;;  %v4324_v38 = vpack.c.bf16 %v2864_v36, %v2862_v35  ;;  %v2867_v56 = vld [vmem:[#allocation5 + $0x170] sm:$0xff]  ;;  %v5239_v41 = vrot.slane %v5229_v8, %v2741_v5  ;;  %v2989_v35 = vld [vmem:[#allocation5 + $0x540] sm:$0xff] }
 0x3ca   :  { %4417 = vmatprep.subr.bf16.mxu0 %v4416_v39  ;;  %4319 = vmatpush1.bf16.msra.mxu1 %v4318_v20  ;;  %v2976_v39 = vld [vmem:[#allocation5 + $0x4d8] sm:$0xff]  ;;  %v4330_v60 = vpack.c.bf16 %v2867_v56, %v2865_v55  ;;  %v4336_v20 = vpack.c.bf16 %v2876_v16, %v2874_v14  ;;  %v2991_v36 = vld [vmem:[#allocation5 + $0x550] sm:$0xff]  ;;  %v2998_v55 = vld [vmem:[#allocation5 + $0x588] sm:$0xff]  ;;  %v4470_v14 = vpack.c.bf16 %v3007_v13, %v3005_v12 }
 0x3cb   :  { %4321 = vmatprep.subr.bf16.mxu1 %v4320_v17  ;;  %v4436_v44 = vpack.c.bf16 %v2976_v39, %v2974_v37  ;;  %v2878_v17 = vld [vmem:[#allocation5 + $0x1c8] sm:$0xff]  ;;  %v4454_v37 = vpack.c.bf16 %v2991_v36, %v2989_v35  ;;  %v2884_v39 = vld [vmem:[#allocation5 + $0x1f8] sm:$0xff]  ;;  %v2893_v12 = vld [vmem:[#allocation5 + $0x240] sm:$0xff] }
 0x3cc   :  { %v3012_v16 = vld [vmem:[#allocation5 + $0x5f8] sm:$0xff]  ;;  %v2895_v13 = vld [vmem:[#allocation5 + $0x250] sm:$0xff] }
 0x3cd   :  { %4419 = vmatpush1.bf16.msra.mxu0 %v4418_v43  ;;  %v5236_v43 = vrot.slane %v5221_v57, %v2741_v5 }
 0x3ce   :  { %4421 = vmatprep.subr.bf16.mxu0 %v4420_v54  ;;  %4323 = vmatpush1.bf16.msra.mxu1 %v4322_v32  ;;  %v2980_v54 = vld [vmem:[#allocation5 + $0x4f8] sm:$0xff]  ;;  %v2877_v32 = vld [vmem:[#allocation5 + $0x1c0] sm:$0xff] }
 0x3cf   :  { %4325 = vmatprep.subr.bf16.mxu1 %v4324_v38  ;;  %v4342_v5 = vpack.c.bf16 %v2879_v33, %v2877_v32  ;;  %v2882_v38 = vld [vmem:[#allocation5 + $0x1e8] sm:$0xff] }
 0x3d0   :  { %v4344_v40 = vpack.c.bf16 %v2884_v39, %v2882_v38  ;;  %v5251_v38 = vsub.s32 0, %v5215_v45  ;;  %v5254_v39 = vsub.s32 1, %v5215_v45 }
 0x3d1   :  { %4423 = vmatpush1.bf16.msra.mxu0 %v4422_v58  ;;  %v4440_v58 = vpack.c.bf16 %v2980_v54, %v2978_v42  ;;  %v4458_v42 = vpack.c.bf16 %v2995_v52, %v2993_v51  ;;  %v2888_v54 = vld [vmem:[#allocation5 + $0x218] sm:$0xff]  ;;  %v2885_v51 = vld [vmem:[#allocation5 + $0x200] sm:$0xff]  ;;  %v2887_v52 = vld [vmem:[#allocation5 + $0x210] sm:$0xff] }
 0x3d2   :  { %4425 = vmatprep.subr.bf16.mxu0 %v4424_v3  ;;  %4327 = vmatpush1.bf16.msra.mxu1 %v4326_v46  ;;  %v4332_v3 = vpack.c.bf16 %v2872_v1, %v2870_v0  ;;  %v2881_v46 = vld [vmem:[#allocation5 + $0x1e0] sm:$0xff]  ;;  %v3002_v0 = vld [vmem:[#allocation5 + $0x5a8] sm:$0xff]  ;;  %v3004_v1 = vld [vmem:[#allocation5 + $0x5b8] sm:$0xff] }
 0x3d3   :  { %4329 = vmatprep.subr.bf16.mxu1 %v4328_v53  ;;  %v2886_v53 = vld [vmem:[#allocation5 + $0x208] sm:$0xff] }
 0x3d4   :  { %v4348_v56 = vpack.c.bf16 %v2888_v54, %v2886_v53 }
 0x3d5   :  { %4427 = vmatpush1.bf16.msra.mxu0 %v4426_v9  ;;  %v4444_v9 = vpack.c.bf16 %v2984_v4, %v2982_v2  ;;  %v4464_v2 = vpack.c.bf16 %v3004_v1, %v3002_v0  ;;  %v3003_v4 = vld [vmem:[#allocation5 + $0x5b0] sm:$0xff] }
 0x3d6   :  { %4429 = vmatprep.subr.bf16.mxu0 %v4428_v19  ;;  %4331 = vmatpush1.bf16.msra.mxu1 %v4330_v60  ;;  %v2988_v19 = vld [vmem:[#allocation5 + $0x538] sm:$0xff]  ;;  %v2891_v0 = vld [vmem:[#allocation5 + $0x230] sm:$0xff] }
 0x3d7   :  { %4333 = vmatprep.subr.bf16.mxu1 %v4332_v3  ;;  %v4448_v21 = vpack.c.bf16 %v2988_v19, %v2986_v18  ;;  %v3001_v3 = vld [vmem:[#allocation5 + $0x5a0] sm:$0xff] }
 0x3d8   :  { %v4466_v6 = vpack.c.bf16 %v3003_v4, %v3001_v3  ;;  %v3009_v19 = vld [vmem:[#allocation5 + $0x5e0] sm:$0xff]  ;;  %v2896_v3 = vld [vmem:[#allocation5 + $0x258] sm:$0xff]  ;;  %v2745_v4 = vsub.s32 7, %v5215_v45 }
 0x3d9   :  { %4431 = vmatpush1.bf16.msra.mxu0 %v4430_v24  ;;  %v2985_v24 = vld [vmem:[#allocation5 + $0x520] sm:$0xff] }
 0x3da   :  { %4433 = vmatprep.subr.bf16.mxu0 %v4432_v28  ;;  %4335 = vmatpush1.bf16.msra.mxu1 %v4334_v11  ;;  %v4450_v27 = vpack.c.bf16 %v2987_v26, %v2985_v24  ;;  %v2880_v28 = vld [vmem:[#allocation5 + $0x1d8] sm:$0xff]  ;;  %v4476_v24 = vpack.c.bf16 %v3016_v23, %v3014_v22  ;;  %v2897_v22 = vld [vmem:[#allocation5 + $0x260] sm:$0xff]  ;;  %v2899_v23 = vld [vmem:[#allocation5 + $0x270] sm:$0xff] }
 0x3db   :  { %4337 = vmatprep.subr.bf16.mxu1 %v4336_v20  ;;  %v4340_v30 = vpack.c.bf16 %v2880_v28, %v2878_v17  ;;  %v3011_v20 = vld [vmem:[#allocation5 + $0x5f0] sm:$0xff] }
 0x3dd   :  { %4435 = vmatpush1.bf16.msra.mxu0 %v4434_v34  ;;  %v4452_v34 = vpack.c.bf16 %v2992_v31, %v2990_v29 }
 0x3de   :  { %4437 = vmatprep.subr.bf16.mxu0 %v4436_v44  ;;  %4339 = vmatpush1.bf16.msra.mxu1 %v4338_v25  ;;  %v2996_v44 = vld [vmem:[#allocation5 + $0x578] sm:$0xff] }
 0x3df   :  { %4341 = vmatprep.subr.bf16.mxu1 %v4340_v30  ;;  %v4456_v49 = vpack.c.bf16 %v2996_v44, %v2994_v47 }
 0x3e1   :  { %4439 = vmatpush1.bf16.msra.mxu0 %v4438_v50  ;;  %v4346_v50 = vpack.c.bf16 %v2883_v48, %v2881_v46  ;;  %v2780_v48 = vrot.slane %v5229_v8, %v5254_v39 }
 0x3e2   :  { %4441 = vmatprep.subr.bf16.mxu0 %v4440_v58  ;;  %4343 = vmatpush1.bf16.msra.mxu1 %v4342_v5  ;;  %v3000_v58 = vld [vmem:[#allocation5 + $0x598] sm:$0xff] }
 0x3e3   :  { %4345 = vmatprep.subr.bf16.mxu1 %v4344_v40  ;;  %v4460_v60 = vpack.c.bf16 %v3000_v58, %v2998_v55  ;;  %v2890_v55 = vld [vmem:[#allocation5 + $0x228] sm:$0xff] }
 0x3e5   :  { %4443 = vmatpush1.bf16.msra.mxu0 %v4442_v63  ;;  %v4462_v63 = vpack.c.bf16 %v2999_v62, %v2997_v61 }
 0x3e6   :  { %4445 = vmatprep.subr.bf16.mxu0 %v4444_v9  ;;  %4347 = vmatpush1.bf16.msra.mxu1 %v4346_v50  ;;  %v3008_v9 = vld [vmem:[#allocation5 + $0x5d8] sm:$0xff]  ;;  %v2776_v50 = vrot.slane %v5229_v8, %v5251_v38 }
 0x3e7   :  { %4349 = vmatprep.subr.bf16.mxu1 %v4348_v56  ;;  %v4468_v11 = vpack.c.bf16 %v3008_v9, %v3006_v7  ;;  %v2892_v56 = vld [vmem:[#allocation5 + $0x238] sm:$0xff]  ;;  %v2737_v9 = vsub.s32 5, %v5215_v45 }
 0x3e8   :  { %v4352_v62 = vpack.c.bf16 %v2892_v56, %v2890_v55  ;;  %v2910_v55 = vld [vmem:[#allocation5 + $0x2c8] sm:$0xff] }
 0x3e9   :  { %4447 = vmatpush1.bf16.msra.mxu0 %v4446_v15  ;;  %v3010_v15 = vld [vmem:[#allocation5 + $0x5e8] sm:$0xff] }
 0x3ea   :  { %4449 = vmatprep.subr.bf16.mxu0 %v4448_v21  ;;  %v4472_v18 = vpack.c.bf16 %v3012_v16, %v3010_v15  ;;  %v4474_v21 = vpack.c.bf16 %v3011_v20, %v3009_v19  ;;  %v2900_v15 = vld [vmem:[#allocation5 + $0x278] sm:$0xff]  ;;  %v2746_v16 = vrot.slane %v5221_v57, %v2745_v4  ;;  %v2738_v19 = vrot.slane %v5221_v57, %v2737_v9 }
 0x3eb   :  { %v4358_v20 = vpack.c.bf16 %v2895_v13, %v2893_v12  ;;  %v3028_v12 = vld [vmem:[#allocation5 + $0x678] sm:$0xff] }
 0x3ed   :  { %4451 = vmatpush1.bf16.msra.mxu0 %v4450_v27 }
 0x3ee   :  { %4453 = vmatprep.subr.bf16.mxu0 %v4452_v34 }
 0x3f1   :  { %4455 = vmatpush1.bf16.msra.mxu0 %v4454_v37  ;;  %v2729_v37 = vsub.s32 3, %v5215_v45 }
 0x3f2   :  { %4457 = vmatprep.subr.bf16.mxu0 %v4456_v49 }
 0x3f3   :  { %v2788_v54 = vrot.slane %v5229_v8, %v2729_v37 }
 0x3f5   :  { %4459 = vmatpush1.bf16.msra.mxu0 %v4458_v42 }
 0x3f6   :  { %4461 = vmatprep.subr.bf16.mxu0 %v4460_v60  ;;  %v4350_v60 = vpack.c.bf16 %v2887_v52, %v2885_v51  ;;  %v2907_v51 = vld [vmem:[#allocation5 + $0x2b0] sm:$0xff] }
 0x3f9   :  { %4463 = vmatpush1.bf16.msra.mxu0 %v4462_v63  ;;  %v2889_v63 = vld [vmem:[#allocation5 + $0x220] sm:$0xff] }
 0x3fa   :  { %4465 = vmatprep.subr.bf16.mxu0 %v4464_v2  ;;  %v2894_v2 = vld [vmem:[#allocation5 + $0x248] sm:$0xff]  ;;  %v4354_v7 = vpack.c.bf16 %v2891_v0, %v2889_v63  ;;  %v2909_v0 = vld [vmem:[#allocation5 + $0x2c0] sm:$0xff] }
 0x3fd   :  { %4467 = vmatpush1.bf16.msra.mxu0 %v4466_v6  ;;  %v2733_v6 = vsub.s32 4, %v5215_v45  ;;  %v2902_v45 = vld [vmem:[#allocation5 + $0x288] sm:$0xff] }
 0x3fe   :  { %4469 = vmatprep.subr.bf16.mxu0 %v4468_v11  ;;  %v4356_v11 = vpack.c.bf16 %v2896_v3, %v2894_v2 }
 0x401   :  { %4471 = vmatpush1.bf16.msra.mxu0 %v4470_v14  ;;  %v2898_v14 = vld [vmem:[#allocation5 + $0x268] sm:$0xff] }
 0x402   :  { %4473 = vmatprep.subr.bf16.mxu0 %v4472_v18  ;;  %v2734_v18 = vrot.slane %v5221_v57, %v2733_v6 }
 0x405   :  { %4475 = vmatpush1.bf16.msra.mxu0 %v4474_v21  ;;  %v4360_v21 = vpack.c.bf16 %v2900_v15, %v2898_v14  ;;  %v2913_v15 = vld [vmem:[#allocation5 + $0x2e0] sm:$0xff] }
 0x406   :  { %4477 = vmatprep.subr.bf16.mxu0 %v4476_v24 }
 0x42b   :  { %v1560_v25 = vpop.f32.mrb[8].mxu0 }
 0x42c   :  { %v1562_v26 = vpop.f32.mrb[9].mxu0 }
 0x46b   :  { %v2558_v27 = vpop.f32.mrb[4].mxu1 }
 0x46c   :  { %v4572_v17 = vadd.f32 %v2558_v27, %v1560_v25  ;;  %v2560_v28 = vpop.f32.mrb[5].mxu1  ;;  %v2904_v25 = vld [vmem:[#allocation5 + $0x298] sm:$0xff] }
 0x46d   :  { %v4573_v29 = vadd.f32 %v2560_v28, %v1562_v26 }
 0x46e   :  { %v2757_v30 = vadd.f32 %v4572_v17, %v5224_v59  ;;  %v2730_v59 = vrot.slane %v5221_v57, %v2729_v37  ;;  %v3013_v37 = vld [vmem:[#allocation5 + $0x600] sm:$0xff] }
 0x470   :  { %v2765_v31 = vmax.f32 %v2757_v30, 0.0  ;;  %v2758_v47 = vadd.f32 %v4573_v29, %v2730_v59  ;;  %v2796_v29 = vrot.slane %v5229_v8, %v2737_v9  ;;  %v4362_v30 = vpack.c.bf16 %v2899_v23, %v2897_v22  ;;  %v3015_v59 = vld [vmem:[#allocation5 + $0x610] sm:$0xff]  ;;  %v2916_v9 = vld [vmem:[#allocation5 + $0x2f8] sm:$0xff]  ;;  %v2918_v22 = vld [vmem:[#allocation5 + $0x308] sm:$0xff] }
 0x471   :  { %v2920_v23 = vld [vmem:[#allocation5 + $0x318] sm:$0xff] }
 0x472   :  { %v5243_v32 = vadd.f32 %v5232_v10, %v2765_v31  ;;  %v2718_v10 = vrot.slane %v5221_v57, %v5251_v38  ;;  %v2766_v42 = vmax.f32 %v2758_v47, 0.0  ;;  %v2901_v31 = vld [vmem:[#allocation5 + $0x280] sm:$0xff]  ;;  %v2908_v47 = vld [vmem:[#allocation5 + $0x2b8] sm:$0xff] }
 0x474   :  { %v2816_v1 = vadd.f32 %v2788_v54, %v2766_v42  ;;  %v3019_v54 = vld [vmem:[#allocation5 + $0x630] sm:$0xff] }
 0x47b   :  { %v2700_v33 = vpop.f32.mrb[2].mxu1 }
 0x47c   :  { %v2761_v34 = vadd.f32 %v5236_v43, %v2700_v33  ;;  %v2702_v5 = vpop.f32.mrb[3].mxu1  ;;  %v2722_v43 = vrot.slane %v5221_v57, %v5254_v39  ;;  %v2792_v57 = vrot.slane %v5229_v8, %v2733_v6  ;;  %v3023_v6 = vld [vmem:[#allocation5 + $0x650] sm:$0xff] }
 0x47d   :  { %v2762_v26 = vadd.f32 %v2746_v16, %v2702_v5  ;;  %v2915_v16 = vld [vmem:[#allocation5 + $0x2f0] sm:$0xff] }
 0x47e   :  { %v2769_v35 = vmax.f32 %v2761_v34, 0.0  ;;  %v4364_v34 = vpack.c.bf16 %v2904_v25, %v2902_v45  ;;  %v3032_v45 = vld [vmem:[#allocation5 + $0x698] sm:$0xff]  ;;  %v4378_v25 = vpack.c.bf16 %v2915_v16, %v2913_v15  ;;  %v2933_v15 = vld [vmem:[#allocation5 + $0x380] sm:$0xff]  ;;  %v2935_v16 = vld [vmem:[#allocation5 + $0x390] sm:$0xff] }
 0x47f   :  { %v2770_v5 = vmax.f32 %v2762_v26, 0.0 }
 0x480   :  { %v5247_v36 = vadd.f32 %v5239_v41, %v2769_v35  ;;  %v2903_v35 = vld [vmem:[#allocation5 + $0x290] sm:$0xff] }
 0x48b   :  { %v2487_v40 = vpop.f32.mrb[6].mxu0 }
 0x48c   :  { %v2755_v41 = vadd.f32 %v2718_v10, %v2487_v40  ;;  %v2489_v44 = vpop.f32.mrb[7].mxu0  ;;  %v2804_v40 = vrot.slane %v5229_v8, %v2745_v4  ;;  %v3021_v4 = vld [vmem:[#allocation5 + $0x640] sm:$0xff] }
 0x48d   :  { %v2756_v46 = vadd.f32 %v2722_v43, %v2489_v44  ;;  %v2906_v43 = vld [vmem:[#allocation5 + $0x2a8] sm:$0xff]  ;;  %v3020_v44 = vld [vmem:[#allocation5 + $0x638] sm:$0xff]  ;;  %v4486_v14 = vpack.c.bf16 %v3023_v6, %v3021_v4  ;;  %v3041_v4 = vld [vmem:[#allocation5 + $0x6e0] sm:$0xff] }
 0x48e   :  { %v2763_v49 = vmax.f32 %v2755_v41, 0.0  ;;  %v3018_v41 = vld [vmem:[#allocation5 + $0x628] sm:$0xff]  ;;  %v4368_v42 = vpack.c.bf16 %v2908_v47, %v2906_v43  ;;  %v2820_v8 = vadd.f32 %v2804_v40, %v2770_v5  ;;  %v2923_v43 = vld [vmem:[#allocation5 + $0x330] sm:$0xff]  ;;  %v3033_v40 = vld [vmem:[#allocation5 + $0x6a0] sm:$0xff] }
 0x48f   :  { %v2764_v53 = vmax.f32 %v2756_v46, 0.0  ;;  %v4480_v56 = vpack.c.bf16 %v3020_v44, %v3018_v41  ;;  %v3035_v41 = vld [vmem:[#allocation5 + $0x6b0] sm:$0xff]  ;;  %v2926_v44 = vld [vmem:[#allocation5 + $0x348] sm:$0xff] }
 0x490   :  { %v2813_v61 = vadd.f32 %v2776_v50, %v2763_v49  ;;  %v4478_v49 = vpack.c.bf16 %v3015_v59, %v3013_v37  ;;  %v2905_v50 = vld [vmem:[#allocation5 + $0x2a0] sm:$0xff]  ;;  %v3043_v6 = vld [vmem:[#allocation5 + $0x6f0] sm:$0xff] }
 0x491   :  { %v2814_v58 = vadd.f32 %v2780_v48, %v2764_v53  ;;  %v4366_v48 = vpack.c.bf16 %v2903_v35, %v2901_v31  ;;  %v3017_v53 = vld [vmem:[#allocation5 + $0x620] sm:$0xff]  ;;  %v3031_v31 = vld [vmem:[#allocation5 + $0x690] sm:$0xff]  ;;  %v3036_v35 = vld [vmem:[#allocation5 + $0x6b8] sm:$0xff] }
 0x492   :  { %v4482_v63 = vpack.c.bf16 %v3019_v54, %v3017_v53 }
 0x493   :  { %3153 = vmatprep.mubr.f32.mxu1 %v2814_v58  ;;  %v2912_v58 = vld [vmem:[#allocation5 + $0x2d8] sm:$0xff] }
 0x494   :  { %3154 = vmatmul.mubr.f32.vlgmr.msra.gmra.mrb[6].mxu1 %v2813_v61  ;;  %v3024_v61 = vld [vmem:[#allocation5 + $0x658] sm:$0xff]  ;;  %v4372_v2 = vpack.c.bf16 %v2912_v58, %v2910_v55  ;;  %v3037_v55 = vld [vmem:[#allocation5 + $0x6c0] sm:$0xff]  ;;  %v2930_v58 = vld [vmem:[#allocation5 + $0x368] sm:$0xff] }
 0x495   :  { %4351 = vmatpush1.bf16.msra.mxu1 %v4350_v60  ;;  %3224 = vmatprep.mubr.f32.mxu1 %v2816_v1  ;;  %v3022_v60 = vld [vmem:[#allocation5 + $0x648] sm:$0xff]  ;;  %v2911_v1 = vld [vmem:[#allocation5 + $0x2d0] sm:$0xff] }
 0x496   :  { %4353 = vmatprep.subr.bf16.mxu1 %v4352_v62  ;;  %v4370_v62 = vpack.c.bf16 %v2907_v51, %v2905_v50  ;;  %v4484_v3 = vpack.c.bf16 %v3024_v61, %v3022_v60  ;;  %v4374_v13 = vpack.c.bf16 %v2911_v1, %v2909_v0  ;;  %v4498_v51 = vpack.c.bf16 %v3035_v41, %v3033_v40  ;;  %v2932_v60 = vld [vmem:[#allocation5 + $0x378] sm:$0xff]  ;;  %v3042_v61 = vld [vmem:[#allocation5 + $0x6e8] sm:$0xff]  ;;  %v2929_v0 = vld [vmem:[#allocation5 + $0x360] sm:$0xff] }
 0x497   :  { %v2931_v1 = vld [vmem:[#allocation5 + $0x370] sm:$0xff]  ;;  %v3053_v40 = vld [vmem:[#allocation5 + $0x740] sm:$0xff] }
 0x498   :  { %v3055_v41 = vld [vmem:[#allocation5 + $0x750] sm:$0xff] }
 0x499   :  { %4355 = vmatpush1.bf16.msra.mxu1 %v4354_v7  ;;  %v2914_v7 = vld [vmem:[#allocation5 + $0x2e8] sm:$0xff] }
 0x49a   :  { %4357 = vmatprep.subr.bf16.mxu1 %v4356_v11  ;;  %v3026_v11 = vld [vmem:[#allocation5 + $0x668] sm:$0xff] }
 0x49b   :  { %v2629_v24 = vpop.f32.mrb[10].mxu0 }
 0x49c   :  { %v2759_v27 = vadd.f32 %v2734_v18, %v2629_v24  ;;  %v2631_v17 = vpop.f32.mrb[11].mxu0  ;;  %v4376_v18 = vpack.c.bf16 %v2916_v9, %v2914_v7  ;;  %v3030_v24 = vld [vmem:[#allocation5 + $0x688] sm:$0xff]  ;;  %v2936_v9 = vld [vmem:[#allocation5 + $0x398] sm:$0xff] }
 0x49d   :  { %v2760_v28 = vadd.f32 %v2738_v19, %v2631_v17  ;;  %4359 = vmatpush1.bf16.msra.mxu1 %v4358_v20  ;;  %v4488_v19 = vpack.c.bf16 %v3028_v12, %v3026_v11  ;;  %v3025_v20 = vld [vmem:[#allocation5 + $0x660] sm:$0xff]  ;;  %v2919_v17 = vld [vmem:[#allocation5 + $0x310] sm:$0xff]  ;;  %v2934_v7 = vld [vmem:[#allocation5 + $0x388] sm:$0xff] }
 0x49e   :  { %v2767_v33 = vmax.f32 %v2759_v27, 0.0  ;;  %4361 = vmatprep.subr.bf16.mxu1 %v4360_v21  ;;  %v3027_v21 = vld [vmem:[#allocation5 + $0x670] sm:$0xff]  ;;  %v2917_v27 = vld [vmem:[#allocation5 + $0x300] sm:$0xff]  ;;  %v3046_v11 = vld [vmem:[#allocation5 + $0x708] sm:$0xff] }
 0x49f   :  { %v2768_v10 = vmax.f32 %v2760_v28, 0.0  ;;  %v4490_v26 = vpack.c.bf16 %v3027_v21, %v3025_v20  ;;  %v4380_v28 = vpack.c.bf16 %v2920_v23, %v2918_v22  ;;  %v4382_v37 = vpack.c.bf16 %v2919_v17, %v2917_v27  ;;  %v3048_v12 = vld [vmem:[#allocation5 + $0x718] sm:$0xff]  ;;  %v3045_v20 = vld [vmem:[#allocation5 + $0x700] sm:$0xff]  ;;  %v3047_v21 = vld [vmem:[#allocation5 + $0x710] sm:$0xff] }
 0x4a0   :  { %v2817_v52 = vadd.f32 %v2792_v57, %v2767_v33  ;;  %v2922_v33 = vld [vmem:[#allocation5 + $0x328] sm:$0xff]  ;;  %v2924_v57 = vld [vmem:[#allocation5 + $0x338] sm:$0xff]  ;;  %v2937_v27 = vld [vmem:[#allocation5 + $0x3a0] sm:$0xff] }
 0x4a1   :  { %v2818_v46 = vadd.f32 %v2796_v29, %v2768_v10  ;;  %4363 = vmatpush1.bf16.msra.mxu1 %v4362_v30  ;;  %v4492_v29 = vpack.c.bf16 %v3032_v45, %v3030_v24  ;;  %v3029_v30 = vld [vmem:[#allocation5 + $0x680] sm:$0xff]  ;;  %v4384_v47 = vpack.c.bf16 %v2924_v57, %v2922_v33  ;;  %v2938_v22 = vld [vmem:[#allocation5 + $0x3a8] sm:$0xff]  ;;  %v2940_v23 = vld [vmem:[#allocation5 + $0x3b8] sm:$0xff] }
 0x4a2   :  { %4365 = vmatprep.subr.bf16.mxu1 %v4364_v34  ;;  %v3034_v34 = vld [vmem:[#allocation5 + $0x6a8] sm:$0xff]  ;;  %v4494_v59 = vpack.c.bf16 %v3031_v31, %v3029_v30  ;;  %v2921_v10 = vld [vmem:[#allocation5 + $0x320] sm:$0xff]  ;;  %v3052_v45 = vld [vmem:[#allocation5 + $0x738] sm:$0xff] }
 0x4a3   :  { %3295 = vmatprep.mubr.f32.mxu0 %v2818_v46  ;;  %v4496_v5 = vpack.c.bf16 %v3036_v35, %v3034_v34  ;;  %v2928_v46 = vld [vmem:[#allocation5 + $0x358] sm:$0xff]  ;;  %v4386_v50 = vpack.c.bf16 %v2923_v43, %v2921_v10  ;;  %v3050_v24 = vld [vmem:[#allocation5 + $0x728] sm:$0xff]  ;;  %v2939_v17 = vld [vmem:[#allocation5 + $0x3b0] sm:$0xff] }
 0x4a4   :  { %3296 = vmatmul.mubr.f32.vlgmr.msra.gmra.mrb[12].mxu0 %v2817_v52  ;;  %v2925_v52 = vld [vmem:[#allocation5 + $0x340] sm:$0xff]  ;;  %v4388_v53 = vpack.c.bf16 %v2928_v46, %v2926_v44  ;;  %v3051_v31 = vld [vmem:[#allocation5 + $0x730] sm:$0xff]  ;;  %v2942_v33 = vld [vmem:[#allocation5 + $0x3c8] sm:$0xff] }
 0x4a5   :  { %4367 = vmatpush1.bf16.msra.mxu1 %v4366_v48  ;;  %4479 = vmatpush1.bf16.msra.mxu0 %v4478_v49  ;;  %v3038_v48 = vld [vmem:[#allocation5 + $0x6c8] sm:$0xff]  ;;  %v3040_v49 = vld [vmem:[#allocation5 + $0x6d8] sm:$0xff]  ;;  %v3049_v30 = vld [vmem:[#allocation5 + $0x720] sm:$0xff] }
 0x4a6   :  { %3366 = vmatprep.mubr.f32.mxu0 %v2820_v8  ;;  %4369 = vmatprep.subr.bf16.mxu1 %v4368_v42  ;;  %v2927_v42 = vld [vmem:[#allocation5 + $0x350] sm:$0xff]  ;;  %v4500_v54 = vpack.c.bf16 %v3040_v49, %v3038_v48  ;;  %v3044_v8 = vld [vmem:[#allocation5 + $0x6f8] sm:$0xff]  ;;  %v3054_v34 = vld [vmem:[#allocation5 + $0x748] sm:$0xff] }
 0x4a7   :  { %4481 = vmatprep.subr.bf16.mxu0 %v4480_v56  ;;  %v3039_v56 = vld [vmem:[#allocation5 + $0x6d0] sm:$0xff]  ;;  %v2944_v57 = vld [vmem:[#allocation5 + $0x3d8] sm:$0xff]  ;;  %v2941_v10 = vld [vmem:[#allocation5 + $0x3c0] sm:$0xff] }
 0x4a8   :  { %v3056_v35 = vld [vmem:[#allocation5 + $0x758] sm:$0xff]  ;;  %v2943_v43 = vld [vmem:[#allocation5 + $0x3d0] sm:$0xff]  ;;  %v2946_v44 = vld [vmem:[#allocation5 + $0x3e8] sm:$0xff] }
 0x4a9   :  { %4371 = vmatpush1.bf16.msra.mxu1 %v4370_v62  ;;  %4483 = vmatpush1.bf16.msra.mxu0 %v4482_v63  ;;  %v4390_v62 = vpack.c.bf16 %v2927_v42, %v2925_v52  ;;  %v4502_v63 = vpack.c.bf16 %v3039_v56, %v3037_v55  ;;  %v2948_v46 = vld [vmem:[#allocation5 + $0x3f8] sm:$0xff]  ;;  %v3058_v48 = vld [vmem:[#allocation5 + $0x768] sm:$0xff]  ;;  %v2945_v52 = vld [vmem:[#allocation5 + $0x3e0] sm:$0xff] }
 0x4aa   :  { %4373 = vmatprep.subr.bf16.mxu1 %v4372_v2  ;;  %4485 = vmatprep.subr.bf16.mxu0 %v4484_v3  ;;  %v4392_v2 = vpack.c.bf16 %v2932_v60, %v2930_v58  ;;  %v4504_v3 = vpack.c.bf16 %v3044_v8, %v3042_v61  ;;  %v3060_v49 = vld [vmem:[#allocation5 + $0x778] sm:$0xff]  ;;  %v2947_v42 = vld [vmem:[#allocation5 + $0x3f0] sm:$0xff]  ;;  %v3057_v55 = vld [vmem:[#allocation5 + $0x760] sm:$0xff] }
 0x4ab   :  { %v3059_v56 = vld [vmem:[#allocation5 + $0x770] sm:$0xff]  ;;  %v3062_v58 = vld [vmem:[#allocation5 + $0x788] sm:$0xff]  ;;  %v3064_v60 = vld [vmem:[#allocation5 + $0x798] sm:$0xff] }
 0x4ac   :  { %v3405_v61 = vld [vmem:[%s5414_s13 + $0x80] sm:$0xff]  ;;  %v3406_v8 = vld [vmem:[%s5414_s13 + $0x88] sm:$0xff] }
 0x4ad   :  { %4375 = vmatpush1.bf16.msra.mxu1 %v4374_v13  ;;  %4487 = vmatpush1.bf16.msra.mxu0 %v4486_v14  ;;  %v4394_v13 = vpack.c.bf16 %v2931_v1, %v2929_v0  ;;  %v4506_v14 = vpack.c.bf16 %v3043_v6, %v3041_v4  ;;  %v3061_v0 = vld [vmem:[#allocation5 + $0x780] sm:$0xff]  ;;  %v3063_v1 = vld [vmem:[#allocation5 + $0x790] sm:$0xff]  ;;  %v4540_v4 = vpack.c.bf16 %v3406_v8, %v3405_v61 }
 0x4ae   :  { %4377 = vmatprep.subr.bf16.mxu1 %v4376_v18  ;;  %4489 = vmatprep.subr.bf16.mxu0 %v4488_v19  ;;  %v4396_v18 = vpack.c.bf16 %v2936_v9, %v2934_v7  ;;  %v4508_v19 = vpack.c.bf16 %v3048_v12, %v3046_v11  ;;  %v3389_v6 = vld [vmem:[%s5414_s13] sm:$0xff]  ;;  %v3390_v7 = vld [vmem:[%s5414_s13 + $0x8] sm:$0xff]  ;;  %v3068_v9 = vld [vmem:[#allocation5 + $0x7b8] sm:$0xff] }
 0x4af   :  { %v3407_v11 = vld [vmem:[%s5414_s13 + $0x90] sm:$0xff]  ;;  %v3408_v12 = vld [vmem:[%s5414_s13 + $0x98] sm:$0xff]  ;;  %v3401_v8 = vld [vmem:[%s5414_s13 + $0x60] sm:$0xff] }
 0x4b1   :  { %4379 = vmatpush1.bf16.msra.mxu1 %v4378_v25  ;;  %4491 = vmatpush1.bf16.msra.mxu0 %v4490_v26  ;;  %v4398_v25 = vpack.c.bf16 %v2935_v16, %v2933_v15  ;;  %v4510_v26 = vpack.c.bf16 %v3047_v21, %v3045_v20  ;;  %v4542_v15 = vpack.c.bf16 %v3390_v7, %v3389_v6  ;;  %v3391_v20 = vld [vmem:[%s5414_s13 + $0x10] sm:$0xff]  ;;  %v3392_v21 = vld [vmem:[%s5414_s13 + $0x18] sm:$0xff] }
 0x4b2   :  { %4381 = vmatprep.subr.bf16.mxu1 %v4380_v28  ;;  %4493 = vmatprep.subr.bf16.mxu0 %v4492_v29  ;;  %v4400_v28 = vpack.c.bf16 %v2940_v23, %v2938_v22  ;;  %v4512_v29 = vpack.c.bf16 %v3052_v45, %v3050_v24  ;;  %v3070_v22 = vld [vmem:[#allocation5 + $0x7c8] sm:$0xff]  ;;  %v3072_v23 = vld [vmem:[#allocation5 + $0x7d8] sm:$0xff]  ;;  %v4546_v45 = vpack.c.bf16 %v3392_v21, %v3391_v20 }
 0x4b5   :  { %4383 = vmatpush1.bf16.msra.mxu1 %v4382_v37  ;;  %4495 = vmatpush1.bf16.msra.mxu0 %v4494_v59  ;;  %v4402_v37 = vpack.c.bf16 %v2939_v17, %v2937_v27  ;;  %v4514_v59 = vpack.c.bf16 %v3051_v31, %v3049_v30  ;;  %v3071_v27 = vld [vmem:[#allocation5 + $0x7d0] sm:$0xff]  ;;  %v3074_v17 = vld [vmem:[#allocation5 + $0x7e8] sm:$0xff]  ;;  %v3073_v31 = vld [vmem:[#allocation5 + $0x7e0] sm:$0xff] }
 0x4b6   :  { %4385 = vmatprep.subr.bf16.mxu1 %v4384_v47  ;;  %4497 = vmatprep.subr.bf16.mxu0 %v4496_v5  ;;  %v4404_v47 = vpack.c.bf16 %v2944_v57, %v2942_v33  ;;  %v4516_v5 = vpack.c.bf16 %v3056_v35, %v3054_v34  ;;  %v3075_v33 = vld [vmem:[#allocation5 + $0x7f0] sm:$0xff]  ;;  %v3409_v57 = vld [vmem:[%s5414_s13 + $0xa0] sm:$0xff]  ;;  %v3410_v34 = vld [vmem:[%s5414_s13 + $0xa8] sm:$0xff] }
 0x4b7   :  { %v4548_v35 = vpack.c.bf16 %v3410_v34, %v3409_v57 }
 0x4b9   :  { %4387 = vmatpush1.bf16.msra.mxu1 %v4386_v50  ;;  %4499 = vmatpush1.bf16.msra.mxu0 %v4498_v51  ;;  %v4406_v50 = vpack.c.bf16 %v2943_v43, %v2941_v10  ;;  %v4518_v51 = vpack.c.bf16 %v3055_v41, %v3053_v40  ;;  %v3412_v43 = vld [vmem:[%s5414_s13 + $0xb8] sm:$0xff]  ;;  %v3413_v41 = vld [vmem:[%s5414_s13 + $0xc0] sm:$0xff] }
 0x4ba   :  { %4389 = vmatprep.subr.bf16.mxu1 %v4388_v53  ;;  %4501 = vmatprep.subr.bf16.mxu0 %v4500_v54  ;;  %v4408_v53 = vpack.c.bf16 %v2948_v46, %v2946_v44  ;;  %v4520_v54 = vpack.c.bf16 %v3060_v49, %v3058_v48  ;;  %v3396_v40 = vld [vmem:[%s5414_s13 + $0x38] sm:$0xff]  ;;  %v3414_v44 = vld [vmem:[%s5414_s13 + $0xc8] sm:$0xff]  ;;  %v3397_v49 = vld [vmem:[%s5414_s13 + $0x40] sm:$0xff] }
 0x4bb   :  { %v4556_v48 = vpack.c.bf16 %v3414_v44, %v3413_v41 }
 0x4bd   :  { %4391 = vmatpush1.bf16.msra.mxu1 %v4390_v62  ;;  %4503 = vmatpush1.bf16.msra.mxu0 %v4502_v63  ;;  %v4410_v62 = vpack.c.bf16 %v2947_v42, %v2945_v52  ;;  %v4522_v63 = vpack.c.bf16 %v3059_v56, %v3057_v55  ;;  %v3416_v52 = vld [vmem:[%s5414_s13 + $0xd8] sm:$0xff] }
 0x4be   :  { %4393 = vmatprep.subr.bf16.mxu1 %v4392_v2  ;;  %4505 = vmatprep.subr.bf16.mxu0 %v4504_v3  ;;  %v4524_v2 = vpack.c.bf16 %v3064_v60, %v3062_v58  ;;  %v3066_v3 = vld [vmem:[#allocation5 + $0x7a8] sm:$0xff]  ;;  %v3400_v55 = vld [vmem:[%s5414_s13 + $0x58] sm:$0xff]  ;;  %v3417_v58 = vld [vmem:[%s5414_s13 + $0xe0] sm:$0xff] }
 0x4bf   :  { %v4528_v16 = vpack.c.bf16 %v3068_v9, %v3066_v3  ;;  %v3418_v60 = vld [vmem:[%s5414_s13 + $0xe8] sm:$0xff]  ;;  %v3403_v3 = vld [vmem:[%s5414_s13 + $0x70] sm:$0xff] }
 0x4c0   :  { %v4564_v61 = vpack.c.bf16 %v3418_v60, %v3417_v58 }
 0x4c1   :  { %4395 = vmatpush1.bf16.msra.mxu1 %v4394_v13  ;;  %4507 = vmatpush1.bf16.msra.mxu0 %v4506_v14  ;;  %v4526_v13 = vpack.c.bf16 %v3063_v1, %v3061_v0  ;;  %v3065_v14 = vld [vmem:[#allocation5 + $0x7a0] sm:$0xff]  ;;  %v3419_v0 = vld [vmem:[%s5414_s13 + $0xf0] sm:$0xff]  ;;  %v3420_v1 = vld [vmem:[%s5414_s13 + $0xf8] sm:$0xff] }
 0x4c2   :  { %4397 = vmatprep.subr.bf16.mxu1 %v4396_v18  ;;  %4509 = vmatprep.subr.bf16.mxu0 %v4508_v19  ;;  %v3067_v18 = vld [vmem:[#allocation5 + $0x7b0] sm:$0xff]  ;;  %v4544_v19 = vpack.c.bf16 %v3408_v12, %v3407_v11  ;;  %v3077_v11 = vld [vmem:[%s5412_s11] sm:$0x3] }
 0x4c3   :  { %v4530_v24 = vpack.c.bf16 %v3067_v18, %v3065_v14  ;;  %v3082_v12 = vrot.slane %v3077_v11, %v5251_v38 }
 0x4c5   :  { %4399 = vmatpush1.bf16.msra.mxu1 %v4398_v25  ;;  %4511 = vmatpush1.bf16.msra.mxu0 %v4510_v26  ;;  %v4532_v25 = vpack.c.bf16 %v3072_v23, %v3070_v22  ;;  %v3069_v26 = vld [vmem:[#allocation5 + $0x7c0] sm:$0xff] }
 0x4c6   :  { %4401 = vmatprep.subr.bf16.mxu1 %v4400_v28  ;;  %4513 = vmatprep.subr.bf16.mxu0 %v4512_v29  ;;  %v3076_v28 = vld [vmem:[#allocation5 + $0x7f8] sm:$0xff]  ;;  %v4534_v29 = vpack.c.bf16 %v3071_v27, %v3069_v26 }
 0x4c7   :  { %v4536_v30 = vpack.c.bf16 %v3076_v28, %v3074_v17  ;;  %v3632_v28 = vld [vmem:[%s5415_s14] ss:$0 sm:$0xff] }
 0x4c9   :  { %4403 = vmatpush1.bf16.msra.mxu1 %v4402_v37  ;;  %4515 = vmatpush1.bf16.msra.mxu0 %v4514_v59  ;;  %v3393_v37 = vld [vmem:[%s5414_s13 + $0x20] sm:$0xff]  ;;  %v3394_v59 = vld [vmem:[%s5414_s13 + $0x28] sm:$0xff] }
 0x4ca   :  { %4405 = vmatprep.subr.bf16.mxu1 %v4404_v47  ;;  %4517 = vmatprep.subr.bf16.mxu0 %v4516_v5  ;;  %v4550_v10 = vpack.c.bf16 %v3394_v59, %v3393_v37  ;;  %v3395_v47 = vld [vmem:[%s5414_s13 + $0x30] sm:$0xff] }
 0x4cb   :  { %v4554_v46 = vpack.c.bf16 %v3396_v40, %v3395_v47 }
 0x4cd   :  { %4407 = vmatpush1.bf16.msra.mxu1 %v4406_v50  ;;  %4519 = vmatpush1.bf16.msra.mxu0 %v4518_v51  ;;  %v3398_v50 = vld [vmem:[%s5414_s13 + $0x48] sm:$0xff]  ;;  %v3415_v51 = vld [vmem:[%s5414_s13 + $0xd0] sm:$0xff] }
 0x4ce   :  { %4409 = vmatprep.subr.bf16.mxu1 %v4408_v53  ;;  %4521 = vmatprep.subr.bf16.mxu0 %v4520_v54  ;;  %v4558_v42 = vpack.c.bf16 %v3398_v50, %v3397_v49  ;;  %v4560_v53 = vpack.c.bf16 %v3416_v52, %v3415_v51  ;;  %v3399_v54 = vld [vmem:[%s5414_s13 + $0x50] sm:$0xff] }
 0x4cf   :  { %v4562_v56 = vpack.c.bf16 %v3400_v55, %v3399_v54 }
 0x4d1   :  { %4411 = vmatpush1.bf16.msra.mxu1 %v4410_v62  ;;  %4523 = vmatpush1.bf16.msra.mxu0 %v4522_v63  ;;  %v3402_v62 = vld [vmem:[%s5414_s13 + $0x68] sm:$0xff] }
 0x4d2   :  { %4525 = vmatprep.subr.bf16.mxu0 %v4524_v2  ;;  %4541 = vmatprep.subr.bf16.mxu1 %v4540_v4  ;;  %v4566_v63 = vpack.c.bf16 %v3402_v62, %v3401_v8  ;;  %v4568_v2 = vpack.c.bf16 %v3420_v1, %v3419_v0  ;;  %v3404_v4 = vld [vmem:[%s5414_s13 + $0x78] sm:$0xff] }
 0x4d3   :  { %v4570_v6 = vpack.c.bf16 %v3404_v4, %v3403_v3 }
 0x4d4   :  { %3225 = vmatmul.mubr.f32.vlgmr.msra.gmra.mrb[6].mxu1 %v5243_v32  ;;  %v4538_v32 = vpack.c.bf16 %v3075_v33, %v3073_v31 }
 0x4d5   :  { %4527 = vmatpush1.bf16.msra.mxu0 %v4526_v13  ;;  %4543 = vmatpush3.bf16.msra.mxu1 %v4542_v15  ;;  %v3086_v13 = vrot.slane %v3077_v11, %v5254_v39  ;;  %v3375_v15 = vld [vmem:[%s5413_s12] sm:$0x3]  ;;  %s4731_s12 = smov [#allocation7]  }
 0x4d6   :  { %4529 = vmatprep.subr.bf16.mxu0 %v4528_v16  ;;  %4545 = vmatprep.subr.bf16.mxu1 %v4544_v19  ;;  %v3384_v22 = vrot.slane %v3375_v15, %v5254_v39  ;;  %s3517_s22 = sshll.u32 %s4731_s12, 4  ;;  %s3518_s22 = int_to_ptr.vmem [resolvable:$true] %s3517_s22 }
 0x4d7   :  { %s4694_s14 = scalar_lea.vmem %s3518_s22, 32  ;;  %p4699_p3 = scmp.lt.s32.totalorder %s3518_s22, %s3518_s22 }
 0x4d8   :  { %p4695_p2 = scmp.ne.s32.totalorder %s3518_s22, %s4694_s14  ;;  %p4700_p4 = scmp.lt.s32.totalorder %s4694_s14, %s4694_s14 }
 0x4d9   :  { %4531 = vmatpush1.bf16.msra.mxu0 %v4530_v24  ;;  %4547 = vmatpush3.bf16.msra.mxu1 %v4546_v45  ;;  %v3380_v24 = vrot.slane %v3375_v15, %v5251_v38 }
 0x4da   :  { %4533 = vmatprep.subr.bf16.mxu0 %v4532_v25  ;;  %4549 = vmatprep.subr.bf16.mxu1 %v4548_v35  ;;  %p4701_p5 = por %p4700_p4, %p4699_p3 }
 0x4dc   :  { %p4702_p6 = pnand %p4701_p5, %p4695_p2 }
 0x4dd   :  { %4535 = vmatpush1.bf16.msra.mxu0 %v4534_v29  ;;  %4551 = vmatpush3.bf16.msra.mxu1 %v4550_v10 }
 0x4de   :  { %4537 = vmatprep.subr.bf16.mxu0 %v4536_v30 }
 0x4e1   :  { %4539 = vmatpush1.bf16.msra.mxu0 %v4538_v32 }
 0x4e4   :  { %3367 = vmatmul.mubr.f32.vlgmr.msra.gmra.mrb[12].mxu0 %v5247_v36  ;;  %v3411_v36 = vld [vmem:[%s5414_s13 + $0xb0] sm:$0xff] }
 0x4e5   :  { %v4552_v5 = vpack.c.bf16 %v3412_v43, %v3411_v36 }
 0x4e7   :  { %4553 = vmatprep.subr.bf16.mxu1 %v4552_v5 }
 0x4e8   :  { %4555 = vmatpush3.bf16.msra.mxu1 %v4554_v46 }
 0x4e9   :  { %4557 = vmatprep.subr.bf16.mxu1 %v4556_v48 }
 0x4ec   :  { %4559 = vmatpush3.bf16.msra.mxu1 %v4558_v42 }
 0x4ed   :  { %4561 = vmatprep.subr.bf16.mxu1 %v4560_v53 }
 0x4f0   :  { %4563 = vmatpush3.bf16.msra.mxu1 %v4562_v56 }
 0x4f1   :  { %4565 = vmatprep.subr.bf16.mxu1 %v4564_v61 }
 0x4f4   :  { %4567 = vmatpush3.bf16.msra.mxu1 %v4566_v63 }
 0x4f5   :  { %4569 = vmatprep.subr.bf16.mxu1 %v4568_v2 }
 0x4f8   :  { %4571 = vmatpush3.bf16.msra.mxu1 %v4570_v6 }
 0x5a7   :  { %v3226_v7 = vpop.f32.mrb[6].mxu1 }
 0x5a8   :  { %v3228_v9 = vpop.f32.mrb[7].mxu1  ;;  %v4574_v14 = vadd.f32 %v3226_v7, %v3082_v12 }
 0x5a9   :  { %v4576_v16 = vadd.f32 %v3228_v9, %v3086_v13 }
 0x5b7   :  { %v3368_v18 = vpop.f32.mrb[12].mxu0 }
 0x5b8   :  { %v4575_v19 = vadd.f32 %v4574_v14, %v3368_v18  ;;  %v3370_v20 = vpop.f32.mrb[13].mxu0 }
 0x5b9   :  { %v4577_v21 = vadd.f32 %v4576_v16, %v3370_v20 }
 0x5ba   :  { %v3373_v23 = vmax.f32 %v4575_v19, 0.0 }
 0x5bb   :  { %v3374_v45 = vmax.f32 %v4577_v21, 0.0 }
 0x5bc   :  { %v3387_v26 = vadd.f32 %v3380_v24, %v3373_v23 }
 0x5bd   :  { %v3388_v25 = vadd.f32 %v3384_v22, %v3374_v45 }
 0x5bf   :  { %3492 = vmatprep.mubr.f32.mxu1 %v3388_v25 }
 0x5c0   :  { %3493 = vmatmul.mubr.f32.vlgmr.msra.gmra.mrb[8].mxu1 %v3387_v26 }
 0x693   :  { %v3755_v27 = vpop.f32.mrb[8].mxu1 }
 0x694   :  { %v3756_v17 = vpop.f32.mrb[9].mxu1 }
 0x695   :  { %v3757_v29 = vadd.f32 %v3756_v17, %v3755_v27 }
 0x697   :  { %v3495_v30 = vadd.f32 %v3757_v29, %v3632_v28 }
 0x699   :  { %v3499_v31 = vsel %vm3498_vm7, %v3495_v30, -inf }
 0x69a   :  { %3500 = vmax.xlane.f32.xlu0 %v3499_v31 }
 0x727   :  { %v3501_v39 = vpop.xlane.xlu0 %3500 }
 0x728   :  { %v3502_v33 = vsub.f32 %v3495_v30, %v3501_v39 }
 0x72a   :  { %v3503_v38 = vmul.f32 1.442695, %v3502_v33 }
 0x72c   :  { %4646 = vpow2.f32 %v3503_v38 }
 0x736   :  { %v4647_v32 = vpop.eup %4646 }
 0x737   :  { %v3505_v57 = vsel %vm3498_vm7, %v4647_v32, 0.0 }
 0x738   :  { %3506 = vadd.xlane.f32.xlu1 %v3505_v57 }
 0x7c5   :  { %v3507_v34 = vpop.xlane.xlu1 %3506 }
 0x7c6   :  { %4648 = vrcp.f32 %v3507_v34 }
 0x7d0   :  { %v4649_v35 = vpop.eup %4648 }
 0x7d1   :  { %v3509_v37 = vmul.f32 %v4649_v35, %v4647_v32 }
 0x7d3   :  { %3510 = vst.msk [vmem:[#allocation7] sm:$0x3] %vm3498_vm7, %v3509_v37 }
 0x7d4   :  { %4705 = shalt.err (!%p4702_p6)
}
 0x7d5   :  { %s4706_s10 = scalar_lea.hbm %s5416_s15, 32 }
 0x7d6   :  { %p4707_p7 = scmp.ne.s32.totalorder %s5416_s15, %s4706_s10  ;;  %p4710_p8 = scmp.lt.u32.totalorder %s4706_s10, %s5416_s15 }
 0x7d8   :  { %p4712_p9 = pnand %p4710_p8, %p4707_p7 }
 0x7da   :  { %4715 = shalt.err (!%p4712_p9)
}
 0x7db   :  { %3520 = dma.vmem_to_hbm [thread:$0]  %s3518_s22, 32, %s5416_s15, [#allocation4]  }
 0x7dc   :  { %4720 = dma.done.wait [#allocation4], 32  }
 0x7dd   :  { %4721 = vsyncadd [#allocation4], 4294967264 }
 0x7de   :  { %3524 = vsyncpa [#allocation3], 1 }
 0x7df   :  { %3525 = vsyncpa [#allocation6], 1 }
 0x7e0   :  { %3526 = vsyncpa [#allocation4], 1 }

</bundles_post_ra>
